<compile_context>
chip_gen: v6e
topology: v6e:2x2x1
jax: 0.10.0
libtpu: 0.0.40
codegen_flags: <defaults>
</compile_context>

<pallas_src>
import functools

import jax
import jax.numpy as jnp
from jax.experimental import pallas as pl
from jax.experimental.pallas import tpu as pltpu

LEAKY_SLOPE = 0.1
BN_EPS = 1e-5


# --------------------------------------------------------------------------
# Fused kernel
# --------------------------------------------------------------------------
def _yolo_block_kernel(x_ref, masks_ref,
                       w1, b1, w2, b2, w3, b3, w4, b4, w5, b5, w6, b6,
                       route_ref, out_ref, im2col_ref,
                       *, row_shifts, lane_shifts):
    """Fused 6-layer Conv(+folded BN)+LeakyReLU block for one batch element.

    x_ref      : (1, Cin0, HWp) f32   input activations (channels x padded H*W)
    masks_ref  : (9, HWp)       f32   {0,1} SAME-padding validity per 3x3 tap
    w*         : (Cout, Cin) or (Cout, 9*Cin) bf16 (BN scale folded in)
    b*         : (Cout, 1)      f32   folded BatchNorm bias
    route_ref  : (1, C5, HWp)   out_ref : (1, C6, HWp)
    im2col_ref : (9*Cin3, HWp)  bf16 VMEM scratch reused by all 3x3 layers
    row_shifts / lane_shifts : static roll amounts (dh / dw factorisation)
    """

    def leaky_bias(acc, b_ref):
        y = acc + b_ref[...]                       # (Cout, HWp) f32
        return jnp.where(y > 0, y, LEAKY_SLOPE * y)

    def conv1x1(h, w_ref, b_ref):                  # h: (Cin, HWp) f32
        acc = jnp.dot(w_ref[...], h.astype(jnp.bfloat16),
                      preferred_element_type=jnp.float32)
        return leaky_bias(acc, b_ref)

    def conv3x3(h, w_ref, b_ref):                  # h: (Cin, HWp) f32
        cin = h.shape[0]
        k = 0
        for rs in row_shifts:                      # dh = -1, 0, +1 (shared roll)
            row = pltpu.roll(h, rs, axis=1) if rs else h
            for ls in lane_shifts:                 # dw = -1, 0, +1 (small roll)
                tap = pltpu.roll(row, ls, axis=1) if ls else row
                # mask out-of-image taps, cast to bf16 directly into scratch
                im2col_ref[pl.ds(k * cin, cin), :] = (
                    tap * masks_ref[k:k + 1, :]).astype(jnp.bfloat16)
                k += 1
        acc = jnp.dot(w_ref[...], im2col_ref[...],
                      preferred_element_type=jnp.float32)
        return leaky_bias(acc, b_ref)

    h = conv1x1(x_ref[0], w1, b1)                  # layer1  1x1
    h = conv3x3(h, w2, b2)                         # layer2  3x3
    h = conv1x1(h, w3, b3)                         # layer3  1x1
    h = conv3x3(h, w4, b4)                         # layer4  3x3
    route = conv1x1(h, w5, b5)                     # layer5  1x1 -> route
    out = conv3x3(route, w6, b6)                   # layer6  3x3 -> x

    route_ref[...] = route.reshape(route_ref.shape).astype(route_ref.dtype)
    out_ref[...] = out.reshape(out_ref.shape).astype(out_ref.dtype)


# --------------------------------------------------------------------------
# Host-side helpers (static masks / roll shifts for the 3x3 taps)
# --------------------------------------------------------------------------
def _tap_masks(H, W, HWp):
    """(9, HWp) f32 {0,1}: validity of each 3x3 tap under SAME zero padding,
    with the lane-padding columns (index >= H*W) always invalid."""
    HW = H * W
    idx = jnp.arange(HWp)
    hh, ww = idx // W, idx % W
    in_img = idx < HW
    masks = []
    for dh in (-1, 0, 1):
        for dw in (-1, 0, 1):
            masks.append(in_img & (hh + dh >= 0) & (hh + dh < H)
                         & (ww + dw >= 0) & (ww + dw < W))
    return jnp.stack(masks).astype(jnp.float32)


def _roll_shifts(W, HWp):
    """Factor each tap roll into a shared row roll (dh) + a small lane roll
    (dw):  rolled[i] == x[(i + dh*W + dw) mod HWp]."""
    row = tuple((-dh * W) % HWp for dh in (-1, 0, 1))
    lane = tuple((-dw) % HWp for dw in (-1, 0, 1))
    return row, lane


def _vmem_limit_bytes(default=64 * 1024 * 1024):
    """~3/4 of physical VMEM per generation (96 MiB v5e/v6e, 48 MiB v7x)."""
    try:
        cap = getattr(pltpu.get_tpu_info(), "vmem_capacity_bytes", None)
        if cap:
            return int(cap) * 3 // 4
    except Exception:
        pass
    return default


# --------------------------------------------------------------------------
# One-time parameter prep (outside the hot path)
# --------------------------------------------------------------------------
def _fold_bn_into_weight(w_hwio, scale):
    """Fold BN scale into the conv weight in f32, single cast to bf16."""
    return (w_hwio.astype(jnp.float32)
            * scale.astype(jnp.float32).reshape(1, 1, 1, -1)).astype(jnp.bfloat16)


def prepare_yolo_block_params(params):
    """HWIO -> (Cout, K*K*Cin) bf16 repack with BN scale folded in, plus f32
    (Cout, 1) bias.  Done once at setup time, never per forward call."""
    prepped = []
    for (w, scale, bias) in params:
        KH, KW, Cin, Cout = w.shape
        wk = _fold_bn_into_weight(w, scale)
        # row index = (kh*KW + kw)*Cin + ci  (tap-major im2col order)
        wk = jnp.transpose(wk.reshape(KH * KW * Cin, Cout))
        bk = bias.astype(jnp.float32).reshape(Cout, 1)
        prepped.append((wk, bk))
    return prepped


# --------------------------------------------------------------------------
# Wrapper: one pallas_call for the whole Yolo_Block
# --------------------------------------------------------------------------
def yolo_block_forward(x_nchw, prepped, *, single_buffer_consts=True):
    """Matches Yolo_Block.forward: returns (route, x), both NCHW."""
    N, C0, H, W = x_nchw.shape
    HW = H * W
    HWp = ((HW + 127) // 128) * 128            # lane-dense, 128-multiple
    x = x_nchw.reshape(N, C0, HW)
    if HWp != HW:
        x = jnp.pad(x, ((0, 0), (0, 0), (0, HWp - HW)))
    masks = _tap_masks(H, W, HWp)
    row_shifts, lane_shifts = _roll_shifts(W, HWp)

    def const_spec(shape):
        # Constant index map -> request single-buffering (no pipelining gain,
        # halves resident weight VMEM; critical at real widths on v7x).
        if single_buffer_consts:
            return pl.BlockSpec(shape, lambda n: (0, 0),
                                pipeline_mode=pl.Buffered(buffer_count=1))
        return pl.BlockSpec(shape, lambda n: (0, 0))

    in_specs = [pl.BlockSpec((1, C0, HWp), lambda n: (n, 0, 0)),
                const_spec(masks.shape)]
    flat_params = []
    for (wk, bk) in prepped:
        flat_params += [wk, bk]
        in_specs += [const_spec(wk.shape), const_spec(bk.shape)]

    c5 = prepped[4][0].shape[0]           # planes       (route channels)
    c6 = prepped[5][0].shape[0]           # planes * 2   (x channels)
    cin3 = prepped[1][0].shape[1] // 9    # Cin of every 3x3 layer (= planes)

    out_shape = (jax.ShapeDtypeStruct((N, c5, HWp), x_nchw.dtype),
                 jax.ShapeDtypeStruct((N, c6, HWp), x_nchw.dtype))
    out_specs = (pl.BlockSpec((1, c5, HWp), lambda n: (n, 0, 0)),
                 pl.BlockSpec((1, c6, HWp), lambda n: (n, 0, 0)))

    route, out = pl.pallas_call(
        functools.partial(_yolo_block_kernel,
                          row_shifts=row_shifts, lane_shifts=lane_shifts),
        out_shape=out_shape,
        grid=(N,),
        in_specs=in_specs,
        out_specs=out_specs,
        scratch_shapes=[pltpu.VMEM((9 * cin3, HWp), jnp.bfloat16)],
        compiler_params=pltpu.CompilerParams(
            dimension_semantics=("parallel",),
            vmem_limit_bytes=_vmem_limit_bytes(),
        ),
    )(x, masks, *flat_params)

    route = route[:, :, :HW].reshape(N, c5, H, W)
    out = out[:, :, :HW].reshape(N, c6, H, W)
    return route, out


def _run_forward(x, prepped):
    try:
        fwd = jax.jit(yolo_block_forward)
        return jax.block_until_ready(fwd(x, prepped))
    except Exception:
        # Fallback if this JAX build rejects single-buffered (Buffered(1)) inputs.
        fwd = jax.jit(functools.partial(yolo_block_forward,
                                        single_buffer_consts=False))
        return jax.block_until_ready(fwd(x, prepped))


# --------------------------------------------------------------------------
# Parameters (inference-mode BatchNorm folded into scale/bias)
# --------------------------------------------------------------------------
def make_yolo_block_params(key, in_planes, planes):
    layer_cfg = [
        (in_planes, planes, 1),
        (planes, planes * 2, 3),
        (planes * 2, planes, 1),
        (planes, planes * 2, 3),
        (planes * 2, planes, 1),
        (planes, planes * 2, 3),
    ]
    params = []
    for (cin, cout, k) in layer_cfg:
        key, kw_, kg, kb, km, kv = jax.random.split(key, 6)
        w = 0.1 * jax.random.normal(kw_, (k, k, cin, cout), jnp.float32)
        gamma = 1.0 + 0.1 * jax.random.normal(kg, (cout,), jnp.float32)
        beta = 0.1 * jax.random.normal(kb, (cout,), jnp.float32)
        mean = 0.1 * jax.random.normal(km, (cout,), jnp.float32)
        var = jax.random.uniform(kv, (cout,), jnp.float32, 0.5, 1.5)
        scale = gamma / jnp.sqrt(var + BN_EPS)
        bias = beta - mean * scale
        params.append((w, scale, bias))
    return params


# --------------------------------------------------------------------------
# Pure-JAX reference (same numeric policy as the kernel: BN scale folded into
# bf16 weights, bf16 conv operands, f32 accumulation + epilogue)
# --------------------------------------------------------------------------
def _ref_layer(x_nhwc, w, scale, bias):
    wf = _fold_bn_into_weight(w, scale)       # bitwise-identical fold to prep
    y = jax.lax.conv_general_dilated(
        x_nhwc.astype(jnp.bfloat16), wf,
        window_strides=(1, 1), padding="SAME",
        dimension_numbers=("NHWC", "HWIO", "NHWC"),
        preferred_element_type=jnp.float32)
    y = y + bias.reshape(1, 1, 1, -1)
    return jnp.where(y > 0, y, LEAKY_SLOPE * y)


def yolo_block_ref(x_nchw, params):
    x = jnp.transpose(x_nchw, (0, 2, 3, 1))
    for i in range(4):
        x = _ref_layer(x, *params[i])
    route = _ref_layer(x, *params[4])
    x = _ref_layer(route, *params[5])
    return (jnp.transpose(route, (0, 3, 1, 2)),
            jnp.transpose(x, (0, 3, 1, 2)))


if __name__ == "__main__":
    key = jax.random.PRNGKey(0)
    k_x, k_p, k_x2 = jax.random.split(key, 3)

    batch, in_planes, planes, spatial = 2, 4, 8, 16
    params = make_yolo_block_params(k_p, in_planes, planes)
    prepped = prepare_yolo_block_params(params)     # one-time weight repack

    # --- main test: 16x16 (HW = 256, already a multiple of 128) -------------
    x = jax.random.normal(k_x, (batch, in_planes, spatial, spatial), jnp.float32)
    route, out = _run_forward(x, prepped)
    route_ref, out_ref = yolo_block_ref(x, params)
    assert route.shape == (batch, planes, spatial, spatial)
    assert out.shape == (batch, planes * 2, spatial, spatial)
    assert jnp.allclose(route, route_ref, atol=1e-3, rtol=1e-2), float(
        jnp.max(jnp.abs(route - route_ref)))
    assert jnp.allclose(out, out_ref, atol=1e-3, rtol=1e-2), float(
        jnp.max(jnp.abs(out - out_ref)))

    # --- padding-path test: 13x13 (HW = 169 -> padded to 256 on lanes) ------
    x13 = jax.random.normal(k_x2, (batch, in_planes, 13, 13), jnp.float32)
    route13, out13 = _run_forward(x13, prepped)
    route13_ref, out13_ref = yolo_block_ref(x13, params)
    assert jnp.allclose(route13, route13_ref, atol=1e-3, rtol=1e-2), float(
        jnp.max(jnp.abs(route13 - route13_ref)))
    assert jnp.allclose(out13, out13_ref, atol=1e-3, rtol=1e-2), float(
        jnp.max(jnp.abs(out13 - out13_ref)))

    print("KERNEL_OK")
</pallas_src>

<mosaic_0001>
module attributes {stable_mosaic.version = 11 : i64} {
  func.func @_yolo_block_kernel(%arg0: i32, %arg1: memref<1x4x256xf32, #tpu.memory_space<vmem>>, %arg2: memref<9x256xf32, #tpu.memory_space<vmem>>, %arg3: memref<8x4xbf16, #tpu.memory_space<vmem>>, %arg4: memref<8x1xf32, #tpu.memory_space<vmem>>, %arg5: memref<16x72xbf16, #tpu.memory_space<vmem>>, %arg6: memref<16x1xf32, #tpu.memory_space<vmem>>, %arg7: memref<8x16xbf16, #tpu.memory_space<vmem>>, %arg8: memref<8x1xf32, #tpu.memory_space<vmem>>, %arg9: memref<16x72xbf16, #tpu.memory_space<vmem>>, %arg10: memref<16x1xf32, #tpu.memory_space<vmem>>, %arg11: memref<8x16xbf16, #tpu.memory_space<vmem>>, %arg12: memref<8x1xf32, #tpu.memory_space<vmem>>, %arg13: memref<16x72xbf16, #tpu.memory_space<vmem>>, %arg14: memref<16x1xf32, #tpu.memory_space<vmem>>, %arg15: memref<1x8x256xf32, #tpu.memory_space<vmem>>, %arg16: memref<1x16x256xf32, #tpu.memory_space<vmem>>, %arg17: memref<72x256xbf16, #tpu.memory_space<vmem>>) attributes {dimension_semantics = [#tpu.dimension_semantics<parallel>], iteration_bounds = array<i64: 2>, scalar_prefetch = 0 : i64, scratch_operands = 1 : i64, tpu.core_type = #tpu.core_type<tc>, window_params = [{transform_indices = @transform_0, window_bounds = array<i64: 1, 4, 256>}, {pipeline_mode = #tpu.pipeline_mode<synchronous>, transform_indices = @transform_1, window_bounds = array<i64: 9, 256>}, {pipeline_mode = #tpu.pipeline_mode<synchronous>, transform_indices = @transform_2, window_bounds = array<i64: 8, 4>}, {pipeline_mode = #tpu.pipeline_mode<synchronous>, transform_indices = @transform_3, window_bounds = array<i64: 8, 1>}, {pipeline_mode = #tpu.pipeline_mode<synchronous>, transform_indices = @transform_4, window_bounds = array<i64: 16, 72>}, {pipeline_mode = #tpu.pipeline_mode<synchronous>, transform_indices = @transform_5, window_bounds = array<i64: 16, 1>}, {pipeline_mode = #tpu.pipeline_mode<synchronous>, transform_indices = @transform_6, window_bounds = array<i64: 8, 16>}, {pipeline_mode = #tpu.pipeline_mode<synchronous>, transform_indices = @transform_7, window_bounds = array<i64: 8, 1>}, {pipeline_mode = #tpu.pipeline_mode<synchronous>, transform_indices = @transform_8, window_bounds = array<i64: 16, 72>}, {pipeline_mode = #tpu.pipeline_mode<synchronous>, transform_indices = @transform_9, window_bounds = array<i64: 16, 1>}, {pipeline_mode = #tpu.pipeline_mode<synchronous>, transform_indices = @transform_10, window_bounds = array<i64: 8, 16>}, {pipeline_mode = #tpu.pipeline_mode<synchronous>, transform_indices = @transform_11, window_bounds = array<i64: 8, 1>}, {pipeline_mode = #tpu.pipeline_mode<synchronous>, transform_indices = @transform_12, window_bounds = array<i64: 16, 72>}, {pipeline_mode = #tpu.pipeline_mode<synchronous>, transform_indices = @transform_13, window_bounds = array<i64: 16, 1>}, {transform_indices = @transform_14, window_bounds = array<i64: 1, 8, 256>}, {transform_indices = @transform_15, window_bounds = array<i64: 1, 16, 256>}]} {
    %c0 = arith.constant 0 : index
    %c0_0 = arith.constant 0 : index
    %c0_1 = arith.constant 0 : index
    %0 = vector.load %arg1[%c0, %c0_0, %c0_1] : memref<1x4x256xf32, #tpu.memory_space<vmem>>, vector<1x4x256xf32>
    %1 = vector.shape_cast %0 : vector<1x4x256xf32> to vector<4x256xf32>
    %c0_2 = arith.constant 0 : index
    %c0_3 = arith.constant 0 : index
    %2 = vector.load %arg3[%c0_2, %c0_3] : memref<8x4xbf16, #tpu.memory_space<vmem>>, vector<8x4xbf16>
    %3 = arith.truncf %1 : vector<4x256xf32> to vector<4x256xbf16>
    %cst = arith.constant dense<0.000000e+00> : vector<8x256xf32>
    %4 = tpu.matmul %2, %3, %cst {dimension_numbers = #tpu.dot_dimension_numbers<[1], [0], [0], [1], [0, 0, 1, 1], [], []>} : vector<8x4xbf16>, vector<4x256xbf16>, vector<8x256xf32> -> vector<8x256xf32>
    %c0_4 = arith.constant 0 : index
    %c0_5 = arith.constant 0 : index
    %5 = vector.load %arg4[%c0_4, %c0_5] : memref<8x1xf32, #tpu.memory_space<vmem>>, vector<8x1xf32>
    %6 = vector.broadcast %5 : vector<8x1xf32> to vector<8x256xf32>
    %7 = arith.addf %4, %6 : vector<8x256xf32>
    %cst_6 = arith.constant 0.000000e+00 : f32
    %8 = vector.broadcast %cst_6 : f32 to vector<8x256xf32>
    %9 = arith.cmpf ogt, %7, %8 : vector<8x256xf32>
    %cst_7 = arith.constant 1.000000e-01 : f32
    %10 = vector.broadcast %cst_7 : f32 to vector<8x256xf32>
    %11 = arith.mulf %10, %7 : vector<8x256xf32>
    %12 = arith.select %9, %7, %11 : vector<8x256xi1>, vector<8x256xf32>
    %c16_i32 = arith.constant 16 : i32
    %13 = tpu.dynamic_rotate %12 by %c16_i32 dim 1 : vector<8x256xf32>, i32 -> vector<8x256xf32>
    %c1_i32 = arith.constant 1 : i32
    %14 = tpu.dynamic_rotate %13 by %c1_i32 dim 1 : vector<8x256xf32>, i32 -> vector<8x256xf32>
    %c0_8 = arith.constant 0 : index
    %c0_9 = arith.constant 0 : index
    %15 = vector.load %arg2[%c0_8, %c0_9] : memref<9x256xf32, #tpu.memory_space<vmem>>, vector<1x256xf32>
    %16 = vector.broadcast %15 : vector<1x256xf32> to vector<8x256xf32>
    %17 = arith.mulf %14, %16 : vector<8x256xf32>
    %18 = arith.truncf %17 : vector<8x256xf32> to vector<8x256xbf16>
    %c0_10 = arith.constant 0 : index
    %c0_11 = arith.constant 0 : index
    %19 = vector.load %arg17[%c0_10, %c0_11] : memref<72x256xbf16, #tpu.memory_space<vmem>>, vector<8x256xbf16>
    tpu.vector_store %arg17[%c0_10, %c0_11], %18 {strides = array<i32>} : memref<72x256xbf16, #tpu.memory_space<vmem>>, vector<8x256xbf16>,
    %c1 = arith.constant 1 : index
    %c0_12 = arith.constant 0 : index
    %20 = vector.load %arg2[%c1, %c0_12] : memref<9x256xf32, #tpu.memory_space<vmem>>, vector<1x256xf32>
    %21 = vector.broadcast %20 : vector<1x256xf32> to vector<8x256xf32>
    %22 = arith.mulf %13, %21 : vector<8x256xf32>
    %23 = arith.truncf %22 : vector<8x256xf32> to vector<8x256xbf16>
    %c8 = arith.constant 8 : index
    %c0_13 = arith.constant 0 : index
    %24 = vector.load %arg17[%c8, %c0_13] : memref<72x256xbf16, #tpu.memory_space<vmem>>, vector<8x256xbf16>
    tpu.vector_store %arg17[%c8, %c0_13], %23 {strides = array<i32>} : memref<72x256xbf16, #tpu.memory_space<vmem>>, vector<8x256xbf16>,
    %c255_i32 = arith.constant 255 : i32
    %25 = tpu.dynamic_rotate %13 by %c255_i32 dim 1 : vector<8x256xf32>, i32 -> vector<8x256xf32>
    %c2 = arith.constant 2 : index
    %c0_14 = arith.constant 0 : index
    %26 = vector.load %arg2[%c2, %c0_14] : memref<9x256xf32, #tpu.memory_space<vmem>>, vector<1x256xf32>
    %27 = vector.broadcast %26 : vector<1x256xf32> to vector<8x256xf32>
    %28 = arith.mulf %25, %27 : vector<8x256xf32>
    %29 = arith.truncf %28 : vector<8x256xf32> to vector<8x256xbf16>
    %c16 = arith.constant 16 : index
    %c0_15 = arith.constant 0 : index
    %30 = vector.load %arg17[%c16, %c0_15] : memref<72x256xbf16, #tpu.memory_space<vmem>>, vector<8x256xbf16>
    tpu.vector_store %arg17[%c16, %c0_15], %29 {strides = array<i32>} : memref<72x256xbf16, #tpu.memory_space<vmem>>, vector<8x256xbf16>,
    %c1_i32_16 = arith.constant 1 : i32
    %31 = tpu.dynamic_rotate %12 by %c1_i32_16 dim 1 : vector<8x256xf32>, i32 -> vector<8x256xf32>
    %c3 = arith.constant 3 : index
    %c0_17 = arith.constant 0 : index
    %32 = vector.load %arg2[%c3, %c0_17] : memref<9x256xf32, #tpu.memory_space<vmem>>, vector<1x256xf32>
    %33 = vector.broadcast %32 : vector<1x256xf32> to vector<8x256xf32>
    %34 = arith.mulf %31, %33 : vector<8x256xf32>
    %35 = arith.truncf %34 : vector<8x256xf32> to vector<8x256xbf16>
    %c24 = arith.constant 24 : index
    %c0_18 = arith.constant 0 : index
    %36 = vector.load %arg17[%c24, %c0_18] : memref<72x256xbf16, #tpu.memory_space<vmem>>, vector<8x256xbf16>
    tpu.vector_store %arg17[%c24, %c0_18], %35 {strides = array<i32>} : memref<72x256xbf16, #tpu.memory_space<vmem>>, vector<8x256xbf16>,
    %c4 = arith.constant 4 : index
    %c0_19 = arith.constant 0 : index
    %37 = vector.load %arg2[%c4, %c0_19] : memref<9x256xf32, #tpu.memory_space<vmem>>, vector<1x256xf32>
    %38 = vector.broadcast %37 : vector<1x256xf32> to vector<8x256xf32>
    %39 = arith.mulf %12, %38 : vector<8x256xf32>
    %40 = arith.truncf %39 : vector<8x256xf32> to vector<8x256xbf16>
    %c32 = arith.constant 32 : index
    %c0_20 = arith.constant 0 : index
    %41 = vector.load %arg17[%c32, %c0_20] : memref<72x256xbf16, #tpu.memory_space<vmem>>, vector<8x256xbf16>
    tpu.vector_store %arg17[%c32, %c0_20], %40 {strides = array<i32>} : memref<72x256xbf16, #tpu.memory_space<vmem>>, vector<8x256xbf16>,
    %c255_i32_21 = arith.constant 255 : i32
    %42 = tpu.dynamic_rotate %12 by %c255_i32_21 dim 1 : vector<8x256xf32>, i32 -> vector<8x256xf32>
    %c5 = arith.constant 5 : index
    %c0_22 = arith.constant 0 : index
    %43 = vector.load %arg2[%c5, %c0_22] : memref<9x256xf32, #tpu.memory_space<vmem>>, vector<1x256xf32>
    %44 = vector.broadcast %43 : vector<1x256xf32> to vector<8x256xf32>
    %45 = arith.mulf %42, %44 : vector<8x256xf32>
    %46 = arith.truncf %45 : vector<8x256xf32> to vector<8x256xbf16>
    %c40 = arith.constant 40 : index
    %c0_23 = arith.constant 0 : index
    %47 = vector.load %arg17[%c40, %c0_23] : memref<72x256xbf16, #tpu.memory_space<vmem>>, vector<8x256xbf16>
    tpu.vector_store %arg17[%c40, %c0_23], %46 {strides = array<i32>} : memref<72x256xbf16, #tpu.memory_space<vmem>>, vector<8x256xbf16>,
    %c240_i32 = arith.constant 240 : i32
    %48 = tpu.dynamic_rotate %12 by %c240_i32 dim 1 : vector<8x256xf32>, i32 -> vector<8x256xf32>
    %c1_i32_24 = arith.constant 1 : i32
    %49 = tpu.dynamic_rotate %48 by %c1_i32_24 dim 1 : vector<8x256xf32>, i32 -> vector<8x256xf32>
    %c6 = arith.constant 6 : index
    %c0_25 = arith.constant 0 : index
    %50 = vector.load %arg2[%c6, %c0_25] : memref<9x256xf32, #tpu.memory_space<vmem>>, vector<1x256xf32>
    %51 = vector.broadcast %50 : vector<1x256xf32> to vector<8x256xf32>
    %52 = arith.mulf %49, %51 : vector<8x256xf32>
    %53 = arith.truncf %52 : vector<8x256xf32> to vector<8x256xbf16>
    %c48 = arith.constant 48 : index
    %c0_26 = arith.constant 0 : index
    %54 = vector.load %arg17[%c48, %c0_26] : memref<72x256xbf16, #tpu.memory_space<vmem>>, vector<8x256xbf16>
    tpu.vector_store %arg17[%c48, %c0_26], %53 {strides = array<i32>} : memref<72x256xbf16, #tpu.memory_space<vmem>>, vector<8x256xbf16>,
    %c7 = arith.constant 7 : index
    %c0_27 = arith.constant 0 : index
    %55 = vector.load %arg2[%c7, %c0_27] : memref<9x256xf32, #tpu.memory_space<vmem>>, vector<1x256xf32>
    %56 = vector.broadcast %55 : vector<1x256xf32> to vector<8x256xf32>
    %57 = arith.mulf %48, %56 : vector<8x256xf32>
    %58 = arith.truncf %57 : vector<8x256xf32> to vector<8x256xbf16>
    %c56 = arith.constant 56 : index
    %c0_28 = arith.constant 0 : index
    %59 = vector.load %arg17[%c56, %c0_28] : memref<72x256xbf16, #tpu.memory_space<vmem>>, vector<8x256xbf16>
    tpu.vector_store %arg17[%c56, %c0_28], %58 {strides = array<i32>} : memref<72x256xbf16, #tpu.memory_space<vmem>>, vector<8x256xbf16>,
    %c255_i32_29 = arith.constant 255 : i32
    %60 = tpu.dynamic_rotate %48 by %c255_i32_29 dim 1 : vector<8x256xf32>, i32 -> vector<8x256xf32>
    %c8_30 = arith.constant 8 : index
    %c0_31 = arith.constant 0 : index
    %61 = vector.load %arg2[%c8_30, %c0_31] : memref<9x256xf32, #tpu.memory_space<vmem>>, vector<1x256xf32>
    %62 = vector.broadcast %61 : vector<1x256xf32> to vector<8x256xf32>
    %63 = arith.mulf %60, %62 : vector<8x256xf32>
    %64 = arith.truncf %63 : vector<8x256xf32> to vector<8x256xbf16>
    %c64 = arith.constant 64 : index
    %c0_32 = arith.constant 0 : index
    %65 = vector.load %arg17[%c64, %c0_32] : memref<72x256xbf16, #tpu.memory_space<vmem>>, vector<8x256xbf16>
    tpu.vector_store %arg17[%c64, %c0_32], %64 {strides = array<i32>} : memref<72x256xbf16, #tpu.memory_space<vmem>>, vector<8x256xbf16>,
    %c0_33 = arith.constant 0 : index
    %c0_34 = arith.constant 0 : index
    %66 = vector.load %arg5[%c0_33, %c0_34] : memref<16x72xbf16, #tpu.memory_space<vmem>>, vector<16x72xbf16>
    %c0_35 = arith.constant 0 : index
    %c0_36 = arith.constant 0 : index
    %67 = vector.load %arg17[%c0_35, %c0_36] : memref<72x256xbf16, #tpu.memory_space<vmem>>, vector<72x256xbf16>
    %cst_37 = arith.constant dense<0.000000e+00> : vector<16x256xf32>
    %68 = tpu.matmul %66, %67, %cst_37 {dimension_numbers = #tpu.dot_dimension_numbers<[1], [0], [0], [1], [0, 0, 1, 1], [], []>} : vector<16x72xbf16>, vector<72x256xbf16>, vector<16x256xf32> -> vector<16x256xf32>
    %c0_38 = arith.constant 0 : index
    %c0_39 = arith.constant 0 : index
    %69 = vector.load %arg6[%c0_38, %c0_39] : memref<16x1xf32, #tpu.memory_space<vmem>>, vector<16x1xf32>
    %70 = vector.broadcast %69 : vector<16x1xf32> to vector<16x256xf32>
    %71 = arith.addf %68, %70 : vector<16x256xf32>
    %cst_40 = arith.constant 0.000000e+00 : f32
    %72 = vector.broadcast %cst_40 : f32 to vector<16x256xf32>
    %73 = arith.cmpf ogt, %71, %72 : vector<16x256xf32>
    %cst_41 = arith.constant 1.000000e-01 : f32
    %74 = vector.broadcast %cst_41 : f32 to vector<16x256xf32>
    %75 = arith.mulf %74, %71 : vector<16x256xf32>
    %76 = arith.select %73, %71, %75 : vector<16x256xi1>, vector<16x256xf32>
    %c0_42 = arith.constant 0 : index
    %c0_43 = arith.constant 0 : index
    %77 = vector.load %arg7[%c0_42, %c0_43] : memref<8x16xbf16, #tpu.memory_space<vmem>>, vector<8x16xbf16>
    %78 = arith.truncf %76 : vector<16x256xf32> to vector<16x256xbf16>
    %cst_44 = arith.constant dense<0.000000e+00> : vector<8x256xf32>
    %79 = tpu.matmul %77, %78, %cst_44 {dimension_numbers = #tpu.dot_dimension_numbers<[1], [0], [0], [1], [0, 0, 1, 1], [], []>} : vector<8x16xbf16>, vector<16x256xbf16>, vector<8x256xf32> -> vector<8x256xf32>
    %c0_45 = arith.constant 0 : index
    %c0_46 = arith.constant 0 : index
    %80 = vector.load %arg8[%c0_45, %c0_46] : memref<8x1xf32, #tpu.memory_space<vmem>>, vector<8x1xf32>
    %81 = vector.broadcast %80 : vector<8x1xf32> to vector<8x256xf32>
    %82 = arith.addf %79, %81 : vector<8x256xf32>
    %cst_47 = arith.constant 0.000000e+00 : f32
    %83 = vector.broadcast %cst_47 : f32 to vector<8x256xf32>
    %84 = arith.cmpf ogt, %82, %83 : vector<8x256xf32>
    %cst_48 = arith.constant 1.000000e-01 : f32
    %85 = vector.broadcast %cst_48 : f32 to vector<8x256xf32>
    %86 = arith.mulf %85, %82 : vector<8x256xf32>
    %87 = arith.select %84, %82, %86 : vector<8x256xi1>, vector<8x256xf32>
    %c16_i32_49 = arith.constant 16 : i32
    %88 = tpu.dynamic_rotate %87 by %c16_i32_49 dim 1 : vector<8x256xf32>, i32 -> vector<8x256xf32>
    %c1_i32_50 = arith.constant 1 : i32
    %89 = tpu.dynamic_rotate %88 by %c1_i32_50 dim 1 : vector<8x256xf32>, i32 -> vector<8x256xf32>
    %c0_51 = arith.constant 0 : index
    %c0_52 = arith.constant 0 : index
    %90 = vector.load %arg2[%c0_51, %c0_52] : memref<9x256xf32, #tpu.memory_space<vmem>>, vector<1x256xf32>
    %91 = vector.broadcast %90 : vector<1x256xf32> to vector<8x256xf32>
    %92 = arith.mulf %89, %91 : vector<8x256xf32>
    %93 = arith.truncf %92 : vector<8x256xf32> to vector<8x256xbf16>
    %c0_53 = arith.constant 0 : index
    %c0_54 = arith.constant 0 : index
    %94 = vector.load %arg17[%c0_53, %c0_54] : memref<72x256xbf16, #tpu.memory_space<vmem>>, vector<8x256xbf16>
    tpu.vector_store %arg17[%c0_53, %c0_54], %93 {strides = array<i32>} : memref<72x256xbf16, #tpu.memory_space<vmem>>, vector<8x256xbf16>,
    %c1_55 = arith.constant 1 : index
    %c0_56 = arith.constant 0 : index
    %95 = vector.load %arg2[%c1_55, %c0_56] : memref<9x256xf32, #tpu.memory_space<vmem>>, vector<1x256xf32>
    %96 = vector.broadcast %95 : vector<1x256xf32> to vector<8x256xf32>
    %97 = arith.mulf %88, %96 : vector<8x256xf32>
    %98 = arith.truncf %97 : vector<8x256xf32> to vector<8x256xbf16>
    %c8_57 = arith.constant 8 : index
    %c0_58 = arith.constant 0 : index
    %99 = vector.load %arg17[%c8_57, %c0_58] : memref<72x256xbf16, #tpu.memory_space<vmem>>, vector<8x256xbf16>
    tpu.vector_store %arg17[%c8_57, %c0_58], %98 {strides = array<i32>} : memref<72x256xbf16, #tpu.memory_space<vmem>>, vector<8x256xbf16>,
    %c255_i32_59 = arith.constant 255 : i32
    %100 = tpu.dynamic_rotate %88 by %c255_i32_59 dim 1 : vector<8x256xf32>, i32 -> vector<8x256xf32>
    %c2_60 = arith.constant 2 : index
    %c0_61 = arith.constant 0 : index
    %101 = vector.load %arg2[%c2_60, %c0_61] : memref<9x256xf32, #tpu.memory_space<vmem>>, vector<1x256xf32>
    %102 = vector.broadcast %101 : vector<1x256xf32> to vector<8x256xf32>
    %103 = arith.mulf %100, %102 : vector<8x256xf32>
    %104 = arith.truncf %103 : vector<8x256xf32> to vector<8x256xbf16>
    %c16_62 = arith.constant 16 : index
    %c0_63 = arith.constant 0 : index
    %105 = vector.load %arg17[%c16_62, %c0_63] : memref<72x256xbf16, #tpu.memory_space<vmem>>, vector<8x256xbf16>
    tpu.vector_store %arg17[%c16_62, %c0_63], %104 {strides = array<i32>} : memref<72x256xbf16, #tpu.memory_space<vmem>>, vector<8x256xbf16>,
    %c1_i32_64 = arith.constant 1 : i32
    %106 = tpu.dynamic_rotate %87 by %c1_i32_64 dim 1 : vector<8x256xf32>, i32 -> vector<8x256xf32>
    %c3_65 = arith.constant 3 : index
    %c0_66 = arith.constant 0 : index
    %107 = vector.load %arg2[%c3_65, %c0_66] : memref<9x256xf32, #tpu.memory_space<vmem>>, vector<1x256xf32>
    %108 = vector.broadcast %107 : vector<1x256xf32> to vector<8x256xf32>
    %109 = arith.mulf %106, %108 : vector<8x256xf32>
    %110 = arith.truncf %109 : vector<8x256xf32> to vector<8x256xbf16>
    %c24_67 = arith.constant 24 : index
    %c0_68 = arith.constant 0 : index
    %111 = vector.load %arg17[%c24_67, %c0_68] : memref<72x256xbf16, #tpu.memory_space<vmem>>, vector<8x256xbf16>
    tpu.vector_store %arg17[%c24_67, %c0_68], %110 {strides = array<i32>} : memref<72x256xbf16, #tpu.memory_space<vmem>>, vector<8x256xbf16>,
    %c4_69 = arith.constant 4 : index
    %c0_70 = arith.constant 0 : index
    %112 = vector.load %arg2[%c4_69, %c0_70] : memref<9x256xf32, #tpu.memory_space<vmem>>, vector<1x256xf32>
    %113 = vector.broadcast %112 : vector<1x256xf32> to vector<8x256xf32>
    %114 = arith.mulf %87, %113 : vector<8x256xf32>
    %115 = arith.truncf %114 : vector<8x256xf32> to vector<8x256xbf16>
    %c32_71 = arith.constant 32 : index
    %c0_72 = arith.constant 0 : index
    %116 = vector.load %arg17[%c32_71, %c0_72] : memref<72x256xbf16, #tpu.memory_space<vmem>>, vector<8x256xbf16>
    tpu.vector_store %arg17[%c32_71, %c0_72], %115 {strides = array<i32>} : memref<72x256xbf16, #tpu.memory_space<vmem>>, vector<8x256xbf16>,
    %c255_i32_73 = arith.constant 255 : i32
    %117 = tpu.dynamic_rotate %87 by %c255_i32_73 dim 1 : vector<8x256xf32>, i32 -> vector<8x256xf32>
    %c5_74 = arith.constant 5 : index
    %c0_75 = arith.constant 0 : index
    %118 = vector.load %arg2[%c5_74, %c0_75] : memref<9x256xf32, #tpu.memory_space<vmem>>, vector<1x256xf32>
    %119 = vector.broadcast %118 : vector<1x256xf32> to vector<8x256xf32>
    %120 = arith.mulf %117, %119 : vector<8x256xf32>
    %121 = arith.truncf %120 : vector<8x256xf32> to vector<8x256xbf16>
    %c40_76 = arith.constant 40 : index
    %c0_77 = arith.constant 0 : index
    %122 = vector.load %arg17[%c40_76, %c0_77] : memref<72x256xbf16, #tpu.memory_space<vmem>>, vector<8x256xbf16>
    tpu.vector_store %arg17[%c40_76, %c0_77], %121 {strides = array<i32>} : memref<72x256xbf16, #tpu.memory_space<vmem>>, vector<8x256xbf16>,
    %c240_i32_78 = arith.constant 240 : i32
    %123 = tpu.dynamic_rotate %87 by %c240_i32_78 dim 1 : vector<8x256xf32>, i32 -> vector<8x256xf32>
    %c1_i32_79 = arith.constant 1 : i32
    %124 = tpu.dynamic_rotate %123 by %c1_i32_79 dim 1 : vector<8x256xf32>, i32 -> vector<8x256xf32>
    %c6_80 = arith.constant 6 : index
    %c0_81 = arith.constant 0 : index
    %125 = vector.load %arg2[%c6_80, %c0_81] : memref<9x256xf32, #tpu.memory_space<vmem>>, vector<1x256xf32>
    %126 = vector.broadcast %125 : vector<1x256xf32> to vector<8x256xf32>
    %127 = arith.mulf %124, %126 : vector<8x256xf32>
    %128 = arith.truncf %127 : vector<8x256xf32> to vector<8x256xbf16>
    %c48_82 = arith.constant 48 : index
    %c0_83 = arith.constant 0 : index
    %129 = vector.load %arg17[%c48_82, %c0_83] : memref<72x256xbf16, #tpu.memory_space<vmem>>, vector<8x256xbf16>
    tpu.vector_store %arg17[%c48_82, %c0_83], %128 {strides = array<i32>} : memref<72x256xbf16, #tpu.memory_space<vmem>>, vector<8x256xbf16>,
    %c7_84 = arith.constant 7 : index
    %c0_85 = arith.constant 0 : index
    %130 = vector.load %arg2[%c7_84, %c0_85] : memref<9x256xf32, #tpu.memory_space<vmem>>, vector<1x256xf32>
    %131 = vector.broadcast %130 : vector<1x256xf32> to vector<8x256xf32>
    %132 = arith.mulf %123, %131 : vector<8x256xf32>
    %133 = arith.truncf %132 : vector<8x256xf32> to vector<8x256xbf16>
    %c56_86 = arith.constant 56 : index
    %c0_87 = arith.constant 0 : index
    %134 = vector.load %arg17[%c56_86, %c0_87] : memref<72x256xbf16, #tpu.memory_space<vmem>>, vector<8x256xbf16>
    tpu.vector_store %arg17[%c56_86, %c0_87], %133 {strides = array<i32>} : memref<72x256xbf16, #tpu.memory_space<vmem>>, vector<8x256xbf16>,
    %c255_i32_88 = arith.constant 255 : i32
    %135 = tpu.dynamic_rotate %123 by %c255_i32_88 dim 1 : vector<8x256xf32>, i32 -> vector<8x256xf32>
    %c8_89 = arith.constant 8 : index
    %c0_90 = arith.constant 0 : index
    %136 = vector.load %arg2[%c8_89, %c0_90] : memref<9x256xf32, #tpu.memory_space<vmem>>, vector<1x256xf32>
    %137 = vector.broadcast %136 : vector<1x256xf32> to vector<8x256xf32>
    %138 = arith.mulf %135, %137 : vector<8x256xf32>
    %139 = arith.truncf %138 : vector<8x256xf32> to vector<8x256xbf16>
    %c64_91 = arith.constant 64 : index
    %c0_92 = arith.constant 0 : index
    %140 = vector.load %arg17[%c64_91, %c0_92] : memref<72x256xbf16, #tpu.memory_space<vmem>>, vector<8x256xbf16>
    tpu.vector_store %arg17[%c64_91, %c0_92], %139 {strides = array<i32>} : memref<72x256xbf16, #tpu.memory_space<vmem>>, vector<8x256xbf16>,
    %c0_93 = arith.constant 0 : index
    %c0_94 = arith.constant 0 : index
    %141 = vector.load %arg9[%c0_93, %c0_94] : memref<16x72xbf16, #tpu.memory_space<vmem>>, vector<16x72xbf16>
    %c0_95 = arith.constant 0 : index
    %c0_96 = arith.constant 0 : index
    %142 = vector.load %arg17[%c0_95, %c0_96] : memref<72x256xbf16, #tpu.memory_space<vmem>>, vector<72x256xbf16>
    %cst_97 = arith.constant dense<0.000000e+00> : vector<16x256xf32>
    %143 = tpu.matmul %141, %142, %cst_97 {dimension_numbers = #tpu.dot_dimension_numbers<[1], [0], [0], [1], [0, 0, 1, 1], [], []>} : vector<16x72xbf16>, vector<72x256xbf16>, vector<16x256xf32> -> vector<16x256xf32>
    %c0_98 = arith.constant 0 : index
    %c0_99 = arith.constant 0 : index
    %144 = vector.load %arg10[%c0_98, %c0_99] : memref<16x1xf32, #tpu.memory_space<vmem>>, vector<16x1xf32>
    %145 = vector.broadcast %144 : vector<16x1xf32> to vector<16x256xf32>
    %146 = arith.addf %143, %145 : vector<16x256xf32>
    %cst_100 = arith.constant 0.000000e+00 : f32
    %147 = vector.broadcast %cst_100 : f32 to vector<16x256xf32>
    %148 = arith.cmpf ogt, %146, %147 : vector<16x256xf32>
    %cst_101 = arith.constant 1.000000e-01 : f32
    %149 = vector.broadcast %cst_101 : f32 to vector<16x256xf32>
    %150 = arith.mulf %149, %146 : vector<16x256xf32>
    %151 = arith.select %148, %146, %150 : vector<16x256xi1>, vector<16x256xf32>
    %c0_102 = arith.constant 0 : index
    %c0_103 = arith.constant 0 : index
    %152 = vector.load %arg11[%c0_102, %c0_103] : memref<8x16xbf16, #tpu.memory_space<vmem>>, vector<8x16xbf16>
    %153 = arith.truncf %151 : vector<16x256xf32> to vector<16x256xbf16>
    %cst_104 = arith.constant dense<0.000000e+00> : vector<8x256xf32>
    %154 = tpu.matmul %152, %153, %cst_104 {dimension_numbers = #tpu.dot_dimension_numbers<[1], [0], [0], [1], [0, 0, 1, 1], [], []>} : vector<8x16xbf16>, vector<16x256xbf16>, vector<8x256xf32> -> vector<8x256xf32>
    %c0_105 = arith.constant 0 : index
    %c0_106 = arith.constant 0 : index
    %155 = vector.load %arg12[%c0_105, %c0_106] : memref<8x1xf32, #tpu.memory_space<vmem>>, vector<8x1xf32>
    %156 = vector.broadcast %155 : vector<8x1xf32> to vector<8x256xf32>
    %157 = arith.addf %154, %156 : vector<8x256xf32>
    %cst_107 = arith.constant 0.000000e+00 : f32
    %158 = vector.broadcast %cst_107 : f32 to vector<8x256xf32>
    %159 = arith.cmpf ogt, %157, %158 : vector<8x256xf32>
    %cst_108 = arith.constant 1.000000e-01 : f32
    %160 = vector.broadcast %cst_108 : f32 to vector<8x256xf32>
    %161 = arith.mulf %160, %157 : vector<8x256xf32>
    %162 = arith.select %159, %157, %161 : vector<8x256xi1>, vector<8x256xf32>
    %c16_i32_109 = arith.constant 16 : i32
    %163 = tpu.dynamic_rotate %162 by %c16_i32_109 dim 1 : vector<8x256xf32>, i32 -> vector<8x256xf32>
    %c1_i32_110 = arith.constant 1 : i32
    %164 = tpu.dynamic_rotate %163 by %c1_i32_110 dim 1 : vector<8x256xf32>, i32 -> vector<8x256xf32>
    %c0_111 = arith.constant 0 : index
    %c0_112 = arith.constant 0 : index
    %165 = vector.load %arg2[%c0_111, %c0_112] : memref<9x256xf32, #tpu.memory_space<vmem>>, vector<1x256xf32>
    %166 = vector.broadcast %165 : vector<1x256xf32> to vector<8x256xf32>
    %167 = arith.mulf %164, %166 : vector<8x256xf32>
    %168 = arith.truncf %167 : vector<8x256xf32> to vector<8x256xbf16>
    %c0_113 = arith.constant 0 : index
    %c0_114 = arith.constant 0 : index
    %169 = vector.load %arg17[%c0_113, %c0_114] : memref<72x256xbf16, #tpu.memory_space<vmem>>, vector<8x256xbf16>
    tpu.vector_store %arg17[%c0_113, %c0_114], %168 {strides = array<i32>} : memref<72x256xbf16, #tpu.memory_space<vmem>>, vector<8x256xbf16>,
    %c1_115 = arith.constant 1 : index
    %c0_116 = arith.constant 0 : index
    %170 = vector.load %arg2[%c1_115, %c0_116] : memref<9x256xf32, #tpu.memory_space<vmem>>, vector<1x256xf32>
    %171 = vector.broadcast %170 : vector<1x256xf32> to vector<8x256xf32>
    %172 = arith.mulf %163, %171 : vector<8x256xf32>
    %173 = arith.truncf %172 : vector<8x256xf32> to vector<8x256xbf16>
    %c8_117 = arith.constant 8 : index
    %c0_118 = arith.constant 0 : index
    %174 = vector.load %arg17[%c8_117, %c0_118] : memref<72x256xbf16, #tpu.memory_space<vmem>>, vector<8x256xbf16>
    tpu.vector_store %arg17[%c8_117, %c0_118], %173 {strides = array<i32>} : memref<72x256xbf16, #tpu.memory_space<vmem>>, vector<8x256xbf16>,
    %c255_i32_119 = arith.constant 255 : i32
    %175 = tpu.dynamic_rotate %163 by %c255_i32_119 dim 1 : vector<8x256xf32>, i32 -> vector<8x256xf32>
    %c2_120 = arith.constant 2 : index
    %c0_121 = arith.constant 0 : index
    %176 = vector.load %arg2[%c2_120, %c0_121] : memref<9x256xf32, #tpu.memory_space<vmem>>, vector<1x256xf32>
    %177 = vector.broadcast %176 : vector<1x256xf32> to vector<8x256xf32>
    %178 = arith.mulf %175, %177 : vector<8x256xf32>
    %179 = arith.truncf %178 : vector<8x256xf32> to vector<8x256xbf16>
    %c16_122 = arith.constant 16 : index
    %c0_123 = arith.constant 0 : index
    %180 = vector.load %arg17[%c16_122, %c0_123] : memref<72x256xbf16, #tpu.memory_space<vmem>>, vector<8x256xbf16>
    tpu.vector_store %arg17[%c16_122, %c0_123], %179 {strides = array<i32>} : memref<72x256xbf16, #tpu.memory_space<vmem>>, vector<8x256xbf16>,
    %c1_i32_124 = arith.constant 1 : i32
    %181 = tpu.dynamic_rotate %162 by %c1_i32_124 dim 1 : vector<8x256xf32>, i32 -> vector<8x256xf32>
    %c3_125 = arith.constant 3 : index
    %c0_126 = arith.constant 0 : index
    %182 = vector.load %arg2[%c3_125, %c0_126] : memref<9x256xf32, #tpu.memory_space<vmem>>, vector<1x256xf32>
    %183 = vector.broadcast %182 : vector<1x256xf32> to vector<8x256xf32>
    %184 = arith.mulf %181, %183 : vector<8x256xf32>
    %185 = arith.truncf %184 : vector<8x256xf32> to vector<8x256xbf16>
    %c24_127 = arith.constant 24 : index
    %c0_128 = arith.constant 0 : index
    %186 = vector.load %arg17[%c24_127, %c0_128] : memref<72x256xbf16, #tpu.memory_space<vmem>>, vector<8x256xbf16>
    tpu.vector_store %arg17[%c24_127, %c0_128], %185 {strides = array<i32>} : memref<72x256xbf16, #tpu.memory_space<vmem>>, vector<8x256xbf16>,
    %c4_129 = arith.constant 4 : index
    %c0_130 = arith.constant 0 : index
    %187 = vector.load %arg2[%c4_129, %c0_130] : memref<9x256xf32, #tpu.memory_space<vmem>>, vector<1x256xf32>
    %188 = vector.broadcast %187 : vector<1x256xf32> to vector<8x256xf32>
    %189 = arith.mulf %162, %188 : vector<8x256xf32>
    %190 = arith.truncf %189 : vector<8x256xf32> to vector<8x256xbf16>
    %c32_131 = arith.constant 32 : index
    %c0_132 = arith.constant 0 : index
    %191 = vector.load %arg17[%c32_131, %c0_132] : memref<72x256xbf16, #tpu.memory_space<vmem>>, vector<8x256xbf16>
    tpu.vector_store %arg17[%c32_131, %c0_132], %190 {strides = array<i32>} : memref<72x256xbf16, #tpu.memory_space<vmem>>, vector<8x256xbf16>,
    %c255_i32_133 = arith.constant 255 : i32
    %192 = tpu.dynamic_rotate %162 by %c255_i32_133 dim 1 : vector<8x256xf32>, i32 -> vector<8x256xf32>
    %c5_134 = arith.constant 5 : index
    %c0_135 = arith.constant 0 : index
    %193 = vector.load %arg2[%c5_134, %c0_135] : memref<9x256xf32, #tpu.memory_space<vmem>>, vector<1x256xf32>
    %194 = vector.broadcast %193 : vector<1x256xf32> to vector<8x256xf32>
    %195 = arith.mulf %192, %194 : vector<8x256xf32>
    %196 = arith.truncf %195 : vector<8x256xf32> to vector<8x256xbf16>
    %c40_136 = arith.constant 40 : index
    %c0_137 = arith.constant 0 : index
    %197 = vector.load %arg17[%c40_136, %c0_137] : memref<72x256xbf16, #tpu.memory_space<vmem>>, vector<8x256xbf16>
    tpu.vector_store %arg17[%c40_136, %c0_137], %196 {strides = array<i32>} : memref<72x256xbf16, #tpu.memory_space<vmem>>, vector<8x256xbf16>,
    %c240_i32_138 = arith.constant 240 : i32
    %198 = tpu.dynamic_rotate %162 by %c240_i32_138 dim 1 : vector<8x256xf32>, i32 -> vector<8x256xf32>
    %c1_i32_139 = arith.constant 1 : i32
    %199 = tpu.dynamic_rotate %198 by %c1_i32_139 dim 1 : vector<8x256xf32>, i32 -> vector<8x256xf32>
    %c6_140 = arith.constant 6 : index
    %c0_141 = arith.constant 0 : index
    %200 = vector.load %arg2[%c6_140, %c0_141] : memref<9x256xf32, #tpu.memory_space<vmem>>, vector<1x256xf32>
    %201 = vector.broadcast %200 : vector<1x256xf32> to vector<8x256xf32>
    %202 = arith.mulf %199, %201 : vector<8x256xf32>
    %203 = arith.truncf %202 : vector<8x256xf32> to vector<8x256xbf16>
    %c48_142 = arith.constant 48 : index
    %c0_143 = arith.constant 0 : index
    %204 = vector.load %arg17[%c48_142, %c0_143] : memref<72x256xbf16, #tpu.memory_space<vmem>>, vector<8x256xbf16>
    tpu.vector_store %arg17[%c48_142, %c0_143], %203 {strides = array<i32>} : memref<72x256xbf16, #tpu.memory_space<vmem>>, vector<8x256xbf16>,
    %c7_144 = arith.constant 7 : index
    %c0_145 = arith.constant 0 : index
    %205 = vector.load %arg2[%c7_144, %c0_145] : memref<9x256xf32, #tpu.memory_space<vmem>>, vector<1x256xf32>
    %206 = vector.broadcast %205 : vector<1x256xf32> to vector<8x256xf32>
    %207 = arith.mulf %198, %206 : vector<8x256xf32>
    %208 = arith.truncf %207 : vector<8x256xf32> to vector<8x256xbf16>
    %c56_146 = arith.constant 56 : index
    %c0_147 = arith.constant 0 : index
    %209 = vector.load %arg17[%c56_146, %c0_147] : memref<72x256xbf16, #tpu.memory_space<vmem>>, vector<8x256xbf16>
    tpu.vector_store %arg17[%c56_146, %c0_147], %208 {strides = array<i32>} : memref<72x256xbf16, #tpu.memory_space<vmem>>, vector<8x256xbf16>,
    %c255_i32_148 = arith.constant 255 : i32
    %210 = tpu.dynamic_rotate %198 by %c255_i32_148 dim 1 : vector<8x256xf32>, i32 -> vector<8x256xf32>
    %c8_149 = arith.constant 8 : index
    %c0_150 = arith.constant 0 : index
    %211 = vector.load %arg2[%c8_149, %c0_150] : memref<9x256xf32, #tpu.memory_space<vmem>>, vector<1x256xf32>
    %212 = vector.broadcast %211 : vector<1x256xf32> to vector<8x256xf32>
    %213 = arith.mulf %210, %212 : vector<8x256xf32>
    %214 = arith.truncf %213 : vector<8x256xf32> to vector<8x256xbf16>
    %c64_151 = arith.constant 64 : index
    %c0_152 = arith.constant 0 : index
    %215 = vector.load %arg17[%c64_151, %c0_152] : memref<72x256xbf16, #tpu.memory_space<vmem>>, vector<8x256xbf16>
    tpu.vector_store %arg17[%c64_151, %c0_152], %214 {strides = array<i32>} : memref<72x256xbf16, #tpu.memory_space<vmem>>, vector<8x256xbf16>,
    %c0_153 = arith.constant 0 : index
    %c0_154 = arith.constant 0 : index
    %216 = vector.load %arg13[%c0_153, %c0_154] : memref<16x72xbf16, #tpu.memory_space<vmem>>, vector<16x72xbf16>
    %c0_155 = arith.constant 0 : index
    %c0_156 = arith.constant 0 : index
    %217 = vector.load %arg17[%c0_155, %c0_156] : memref<72x256xbf16, #tpu.memory_space<vmem>>, vector<72x256xbf16>
    %cst_157 = arith.constant dense<0.000000e+00> : vector<16x256xf32>
    %218 = tpu.matmul %216, %217, %cst_157 {dimension_numbers = #tpu.dot_dimension_numbers<[1], [0], [0], [1], [0, 0, 1, 1], [], []>} : vector<16x72xbf16>, vector<72x256xbf16>, vector<16x256xf32> -> vector<16x256xf32>
    %c0_158 = arith.constant 0 : index
    %c0_159 = arith.constant 0 : index
    %219 = vector.load %arg14[%c0_158, %c0_159] : memref<16x1xf32, #tpu.memory_space<vmem>>, vector<16x1xf32>
    %220 = vector.broadcast %219 : vector<16x1xf32> to vector<16x256xf32>
    %221 = arith.addf %218, %220 : vector<16x256xf32>
    %cst_160 = arith.constant 0.000000e+00 : f32
    %222 = vector.broadcast %cst_160 : f32 to vector<16x256xf32>
    %223 = arith.cmpf ogt, %221, %222 : vector<16x256xf32>
    %cst_161 = arith.constant 1.000000e-01 : f32
    %224 = vector.broadcast %cst_161 : f32 to vector<16x256xf32>
    %225 = arith.mulf %224, %221 : vector<16x256xf32>
    %226 = arith.select %223, %221, %225 : vector<16x256xi1>, vector<16x256xf32>
    %227 = vector.shape_cast %162 : vector<8x256xf32> to vector<1x8x256xf32>
    %c0_162 = arith.constant 0 : index
    %c0_163 = arith.constant 0 : index
    %c0_164 = arith.constant 0 : index
    %228 = vector.load %arg15[%c0_162, %c0_163, %c0_164] : memref<1x8x256xf32, #tpu.memory_space<vmem>>, vector<1x8x256xf32>
    tpu.vector_store %arg15[%c0_162, %c0_163, %c0_164], %227 {strides = array<i32>} : memref<1x8x256xf32, #tpu.memory_space<vmem>>, vector<1x8x256xf32>,
    %229 = vector.shape_cast %226 : vector<16x256xf32> to vector<1x16x256xf32>
    %c0_165 = arith.constant 0 : index
    %c0_166 = arith.constant 0 : index
    %c0_167 = arith.constant 0 : index
    %230 = vector.load %arg16[%c0_165, %c0_166, %c0_167] : memref<1x16x256xf32, #tpu.memory_space<vmem>>, vector<1x16x256xf32>
    tpu.vector_store %arg16[%c0_165, %c0_166, %c0_167], %229 {strides = array<i32>} : memref<1x16x256xf32, #tpu.memory_space<vmem>>, vector<1x16x256xf32>,
    return
  }
  func.func @transform_0(%arg0: i32) -> (i32, i32, i32) {
    %c0_i32 = arith.constant 0 : i32
    %c0_i32_0 = arith.constant 0 : i32
    %c0_i32_1 = arith.constant 0 : i32
    return %arg0, %c0_i32, %c0_i32_0 : i32, i32, i32
  }
  func.func @transform_1(%arg0: i32) -> (i32, i32) {
    %c0_i32 = arith.constant 0 : i32
    %c0_i32_0 = arith.constant 0 : i32
    %c0_i32_1 = arith.constant 0 : i32
    return %c0_i32, %c0_i32_0 : i32, i32
  }
  func.func @transform_2(%arg0: i32) -> (i32, i32) {
    %c0_i32 = arith.constant 0 : i32
    %c0_i32_0 = arith.constant 0 : i32
    %c0_i32_1 = arith.constant 0 : i32
    return %c0_i32, %c0_i32_0 : i32, i32
  }
  func.func @transform_3(%arg0: i32) -> (i32, i32) {
    %c0_i32 = arith.constant 0 : i32
    %c0_i32_0 = arith.constant 0 : i32
    %c0_i32_1 = arith.constant 0 : i32
    return %c0_i32, %c0_i32_0 : i32, i32
  }
  func.func @transform_4(%arg0: i32) -> (i32, i32) {
    %c0_i32 = arith.constant 0 : i32
    %c0_i32_0 = arith.constant 0 : i32
    %c0_i32_1 = arith.constant 0 : i32
    return %c0_i32, %c0_i32_0 : i32, i32
  }
  func.func @transform_5(%arg0: i32) -> (i32, i32) {
    %c0_i32 = arith.constant 0 : i32
    %c0_i32_0 = arith.constant 0 : i32
    %c0_i32_1 = arith.constant 0 : i32
    return %c0_i32, %c0_i32_0 : i32, i32
  }
  func.func @transform_6(%arg0: i32) -> (i32, i32) {
    %c0_i32 = arith.constant 0 : i32
    %c0_i32_0 = arith.constant 0 : i32
    %c0_i32_1 = arith.constant 0 : i32
    return %c0_i32, %c0_i32_0 : i32, i32
  }
  func.func @transform_7(%arg0: i32) -> (i32, i32) {
    %c0_i32 = arith.constant 0 : i32
    %c0_i32_0 = arith.constant 0 : i32
    %c0_i32_1 = arith.constant 0 : i32
    return %c0_i32, %c0_i32_0 : i32, i32
  }
  func.func @transform_8(%arg0: i32) -> (i32, i32) {
    %c0_i32 = arith.constant 0 : i32
    %c0_i32_0 = arith.constant 0 : i32
    %c0_i32_1 = arith.constant 0 : i32
    return %c0_i32, %c0_i32_0 : i32, i32
  }
  func.func @transform_9(%arg0: i32) -> (i32, i32) {
    %c0_i32 = arith.constant 0 : i32
    %c0_i32_0 = arith.constant 0 : i32
    %c0_i32_1 = arith.constant 0 : i32
    return %c0_i32, %c0_i32_0 : i32, i32
  }
  func.func @transform_10(%arg0: i32) -> (i32, i32) {
    %c0_i32 = arith.constant 0 : i32
    %c0_i32_0 = arith.constant 0 : i32
    %c0_i32_1 = arith.constant 0 : i32
    return %c0_i32, %c0_i32_0 : i32, i32
  }
  func.func @transform_11(%arg0: i32) -> (i32, i32) {
    %c0_i32 = arith.constant 0 : i32
    %c0_i32_0 = arith.constant 0 : i32
    %c0_i32_1 = arith.constant 0 : i32
    return %c0_i32, %c0_i32_0 : i32, i32
  }
  func.func @transform_12(%arg0: i32) -> (i32, i32) {
    %c0_i32 = arith.constant 0 : i32
    %c0_i32_0 = arith.constant 0 : i32
    %c0_i32_1 = arith.constant 0 : i32
    return %c0_i32, %c0_i32_0 : i32, i32
  }
  func.func @transform_13(%arg0: i32) -> (i32, i32) {
    %c0_i32 = arith.constant 0 : i32
    %c0_i32_0 = arith.constant 0 : i32
    %c0_i32_1 = arith.constant 0 : i32
    return %c0_i32, %c0_i32_0 : i32, i32
  }
  func.func @transform_14(%arg0: i32) -> (i32, i32, i32) {
    %c0_i32 = arith.constant 0 : i32
    %c0_i32_0 = arith.constant 0 : i32
    %c0_i32_1 = arith.constant 0 : i32
    return %arg0, %c0_i32, %c0_i32_0 : i32, i32, i32
  }
  func.func @transform_15(%arg0: i32) -> (i32, i32, i32) {
    %c0_i32 = arith.constant 0 : i32
    %c0_i32_0 = arith.constant 0 : i32
    %c0_i32_1 = arith.constant 0 : i32
    return %arg0, %c0_i32, %c0_i32_0 : i32, i32, i32
  }
}

module attributes {stable_mosaic.version = 11 : i64} {
  func.func @_yolo_block_kernel(%arg0: i32, %arg1: memref<1x4x256xf32, #tpu.memory_space<vmem>>, %arg2: memref<9x256xf32, #tpu.memory_space<vmem>>, %arg3: memref<8x4xbf16, #tpu.memory_space<vmem>>, %arg4: memref<8x1xf32, #tpu.memory_space<vmem>>, %arg5: memref<16x72xbf16, #tpu.memory_space<vmem>>, %arg6: memref<16x1xf32, #tpu.memory_space<vmem>>, %arg7: memref<8x16xbf16, #tpu.memory_space<vmem>>, %arg8: memref<8x1xf32, #tpu.memory_space<vmem>>, %arg9: memref<16x72xbf16, #tpu.memory_space<vmem>>, %arg10: memref<16x1xf32, #tpu.memory_space<vmem>>, %arg11: memref<8x16xbf16, #tpu.memory_space<vmem>>, %arg12: memref<8x1xf32, #tpu.memory_space<vmem>>, %arg13: memref<16x72xbf16, #tpu.memory_space<vmem>>, %arg14: memref<16x1xf32, #tpu.memory_space<vmem>>, %arg15: memref<1x8x256xf32, #tpu.memory_space<vmem>>, %arg16: memref<1x16x256xf32, #tpu.memory_space<vmem>>, %arg17: memref<72x256xbf16, #tpu.memory_space<vmem>>) attributes {dimension_semantics = [#tpu.dimension_semantics<parallel>], iteration_bounds = array<i64: 2>, scalar_prefetch = 0 : i64, scratch_operands = 1 : i64, tpu.core_type = #tpu.core_type<tc>, window_params = [{transform_indices = @transform_0, window_bounds = array<i64: 1, 4, 256>}, {pipeline_mode = #tpu.pipeline_mode<synchronous>, transform_indices = @transform_1, window_bounds = array<i64: 9, 256>}, {pipeline_mode = #tpu.pipeline_mode<synchronous>, transform_indices = @transform_2, window_bounds = array<i64: 8, 4>}, {pipeline_mode = #tpu.pipeline_mode<synchronous>, transform_indices = @transform_3, window_bounds = array<i64: 8, 1>}, {pipeline_mode = #tpu.pipeline_mode<synchronous>, transform_indices = @transform_4, window_bounds = array<i64: 16, 72>}, {pipeline_mode = #tpu.pipeline_mode<synchronous>, transform_indices = @transform_5, window_bounds = array<i64: 16, 1>}, {pipeline_mode = #tpu.pipeline_mode<synchronous>, transform_indices = @transform_6, window_bounds = array<i64: 8, 16>}, {pipeline_mode = #tpu.pipeline_mode<synchronous>, transform_indices = @transform_7, window_bounds = array<i64: 8, 1>}, {pipeline_mode = #tpu.pipeline_mode<synchronous>, transform_indices = @transform_8, window_bounds = array<i64: 16, 72>}, {pipeline_mode = #tpu.pipeline_mode<synchronous>, transform_indices = @transform_9, window_bounds = array<i64: 16, 1>}, {pipeline_mode = #tpu.pipeline_mode<synchronous>, transform_indices = @transform_10, window_bounds = array<i64: 8, 16>}, {pipeline_mode = #tpu.pipeline_mode<synchronous>, transform_indices = @transform_11, window_bounds = array<i64: 8, 1>}, {pipeline_mode = #tpu.pipeline_mode<synchronous>, transform_indices = @transform_12, window_bounds = array<i64: 16, 72>}, {pipeline_mode = #tpu.pipeline_mode<synchronous>, transform_indices = @transform_13, window_bounds = array<i64: 16, 1>}, {transform_indices = @transform_14, window_bounds = array<i64: 1, 8, 256>}, {transform_indices = @transform_15, window_bounds = array<i64: 1, 16, 256>}]} {
    %c0 = arith.constant 0 : index
    %c0_0 = arith.constant 0 : index
    %c0_1 = arith.constant 0 : index
    %0 = vector.load %arg1[%c0, %c0_0, %c0_1] : memref<1x4x256xf32, #tpu.memory_space<vmem>>, vector<1x4x256xf32>
    %1 = vector.shape_cast %0 : vector<1x4x256xf32> to vector<4x256xf32>
    %c0_2 = arith.constant 0 : index
    %c0_3 = arith.constant 0 : index
    %2 = vector.load %arg3[%c0_2, %c0_3] : memref<8x4xbf16, #tpu.memory_space<vmem>>, vector<8x4xbf16>
    %3 = arith.truncf %1 : vector<4x256xf32> to vector<4x256xbf16>
    %cst = arith.constant dense<0.000000e+00> : vector<8x256xf32>
    %4 = tpu.matmul %2, %3, %cst {dimension_numbers = #tpu.dot_dimension_numbers<[1], [0], [0], [1], [0, 0, 1, 1], [], []>} : vector<8x4xbf16>, vector<4x256xbf16>, vector<8x256xf32> -> vector<8x256xf32>
    %c0_4 = arith.constant 0 : index
    %c0_5 = arith.constant 0 : index
    %5 = vector.load %arg4[%c0_4, %c0_5] : memref<8x1xf32, #tpu.memory_space<vmem>>, vector<8x1xf32>
    %6 = vector.broadcast %5 : vector<8x1xf32> to vector<8x256xf32>
    %7 = arith.addf %4, %6 : vector<8x256xf32>
    %cst_6 = arith.constant 0.000000e+00 : f32
    %8 = vector.broadcast %cst_6 : f32 to vector<8x256xf32>
    %9 = arith.cmpf ogt, %7, %8 : vector<8x256xf32>
    %cst_7 = arith.constant 1.000000e-01 : f32
    %10 = vector.broadcast %cst_7 : f32 to vector<8x256xf32>
    %11 = arith.mulf %10, %7 : vector<8x256xf32>
    %12 = arith.select %9, %7, %11 : vector<8x256xi1>, vector<8x256xf32>
    %c16_i32 = arith.constant 16 : i32
    %13 = tpu.dynamic_rotate %12 by %c16_i32 dim 1 : vector<8x256xf32>, i32 -> vector<8x256xf32>
    %c1_i32 = arith.constant 1 : i32
    %14 = tpu.dynamic_rotate %13 by %c1_i32 dim 1 : vector<8x256xf32>, i32 -> vector<8x256xf32>
    %c0_8 = arith.constant 0 : index
    %c0_9 = arith.constant 0 : index
    %15 = vector.load %arg2[%c0_8, %c0_9] : memref<9x256xf32, #tpu.memory_space<vmem>>, vector<1x256xf32>
    %16 = vector.broadcast %15 : vector<1x256xf32> to vector<8x256xf32>
    %17 = arith.mulf %14, %16 : vector<8x256xf32>
    %18 = arith.truncf %17 : vector<8x256xf32> to vector<8x256xbf16>
    %c0_10 = arith.constant 0 : index
    %c0_11 = arith.constant 0 : index
    %19 = vector.load %arg17[%c0_10, %c0_11] : memref<72x256xbf16, #tpu.memory_space<vmem>>, vector<8x256xbf16>
    tpu.vector_store %arg17[%c0_10, %c0_11], %18 {strides = array<i32>} : memref<72x256xbf16, #tpu.memory_space<vmem>>, vector<8x256xbf16>,
    %c1 = arith.constant 1 : index
    %c0_12 = arith.constant 0 : index
    %20 = vector.load %arg2[%c1, %c0_12] : memref<9x256xf32, #tpu.memory_space<vmem>>, vector<1x256xf32>
    %21 = vector.broadcast %20 : vector<1x256xf32> to vector<8x256xf32>
    %22 = arith.mulf %13, %21 : vector<8x256xf32>
    %23 = arith.truncf %22 : vector<8x256xf32> to vector<8x256xbf16>
    %c8 = arith.constant 8 : index
    %c0_13 = arith.constant 0 : index
    %24 = vector.load %arg17[%c8, %c0_13] : memref<72x256xbf16, #tpu.memory_space<vmem>>, vector<8x256xbf16>
    tpu.vector_store %arg17[%c8, %c0_13], %23 {strides = array<i32>} : memref<72x256xbf16, #tpu.memory_space<vmem>>, vector<8x256xbf16>,
    %c255_i32 = arith.constant 255 : i32
    %25 = tpu.dynamic_rotate %13 by %c255_i32 dim 1 : vector<8x256xf32>, i32 -> vector<8x256xf32>
    %c2 = arith.constant 2 : index
    %c0_14 = arith.constant 0 : index
    %26 = vector.load %arg2[%c2, %c0_14] : memref<9x256xf32, #tpu.memory_space<vmem>>, vector<1x256xf32>
    %27 = vector.broadcast %26 : vector<1x256xf32> to vector<8x256xf32>
    %28 = arith.mulf %25, %27 : vector<8x256xf32>
    %29 = arith.truncf %28 : vector<8x256xf32> to vector<8x256xbf16>
    %c16 = arith.constant 16 : index
    %c0_15 = arith.constant 0 : index
    %30 = vector.load %arg17[%c16, %c0_15] : memref<72x256xbf16, #tpu.memory_space<vmem>>, vector<8x256xbf16>
    tpu.vector_store %arg17[%c16, %c0_15], %29 {strides = array<i32>} : memref<72x256xbf16, #tpu.memory_space<vmem>>, vector<8x256xbf16>,
    %c1_i32_16 = arith.constant 1 : i32
    %31 = tpu.dynamic_rotate %12 by %c1_i32_16 dim 1 : vector<8x256xf32>, i32 -> vector<8x256xf32>
    %c3 = arith.constant 3 : index
    %c0_17 = arith.constant 0 : index
    %32 = vector.load %arg2[%c3, %c0_17] : memref<9x256xf32, #tpu.memory_space<vmem>>, vector<1x256xf32>
    %33 = vector.broadcast %32 : vector<1x256xf32> to vector<8x256xf32>
    %34 = arith.mulf %31, %33 : vector<8x256xf32>
    %35 = arith.truncf %34 : vector<8x256xf32> to vector<8x256xbf16>
    %c24 = arith.constant 24 : index
    %c0_18 = arith.constant 0 : index
    %36 = vector.load %arg17[%c24, %c0_18] : memref<72x256xbf16, #tpu.memory_space<vmem>>, vector<8x256xbf16>
    tpu.vector_store %arg17[%c24, %c0_18], %35 {strides = array<i32>} : memref<72x256xbf16, #tpu.memory_space<vmem>>, vector<8x256xbf16>,
    %c4 = arith.constant 4 : index
    %c0_19 = arith.constant 0 : index
    %37 = vector.load %arg2[%c4, %c0_19] : memref<9x256xf32, #tpu.memory_space<vmem>>, vector<1x256xf32>
    %38 = vector.broadcast %37 : vector<1x256xf32> to vector<8x256xf32>
    %39 = arith.mulf %12, %38 : vector<8x256xf32>
    %40 = arith.truncf %39 : vector<8x256xf32> to vector<8x256xbf16>
    %c32 = arith.constant 32 : index
    %c0_20 = arith.constant 0 : index
    %41 = vector.load %arg17[%c32, %c0_20] : memref<72x256xbf16, #tpu.memory_space<vmem>>, vector<8x256xbf16>
    tpu.vector_store %arg17[%c32, %c0_20], %40 {strides = array<i32>} : memref<72x256xbf16, #tpu.memory_space<vmem>>, vector<8x256xbf16>,
    %c255_i32_21 = arith.constant 255 : i32
    %42 = tpu.dynamic_rotate %12 by %c255_i32_21 dim 1 : vector<8x256xf32>, i32 -> vector<8x256xf32>
    %c5 = arith.constant 5 : index
    %c0_22 = arith.constant 0 : index
    %43 = vector.load %arg2[%c5, %c0_22] : memref<9x256xf32, #tpu.memory_space<vmem>>, vector<1x256xf32>
    %44 = vector.broadcast %43 : vector<1x256xf32> to vector<8x256xf32>
    %45 = arith.mulf %42, %44 : vector<8x256xf32>
    %46 = arith.truncf %45 : vector<8x256xf32> to vector<8x256xbf16>
    %c40 = arith.constant 40 : index
    %c0_23 = arith.constant 0 : index
    %47 = vector.load %arg17[%c40, %c0_23] : memref<72x256xbf16, #tpu.memory_space<vmem>>, vector<8x256xbf16>
    tpu.vector_store %arg17[%c40, %c0_23], %46 {strides = array<i32>} : memref<72x256xbf16, #tpu.memory_space<vmem>>, vector<8x256xbf16>,
    %c240_i32 = arith.constant 240 : i32
    %48 = tpu.dynamic_rotate %12 by %c240_i32 dim 1 : vector<8x256xf32>, i32 -> vector<8x256xf32>
    %c1_i32_24 = arith.constant 1 : i32
    %49 = tpu.dynamic_rotate %48 by %c1_i32_24 dim 1 : vector<8x256xf32>, i32 -> vector<8x256xf32>
    %c6 = arith.constant 6 : index
    %c0_25 = arith.constant 0 : index
    %50 = vector.load %arg2[%c6, %c0_25] : memref<9x256xf32, #tpu.memory_space<vmem>>, vector<1x256xf32>
    %51 = vector.broadcast %50 : vector<1x256xf32> to vector<8x256xf32>
    %52 = arith.mulf %49, %51 : vector<8x256xf32>
    %53 = arith.truncf %52 : vector<8x256xf32> to vector<8x256xbf16>
    %c48 = arith.constant 48 : index
    %c0_26 = arith.constant 0 : index
    %54 = vector.load %arg17[%c48, %c0_26] : memref<72x256xbf16, #tpu.memory_space<vmem>>, vector<8x256xbf16>
    tpu.vector_store %arg17[%c48, %c0_26], %53 {strides = array<i32>} : memref<72x256xbf16, #tpu.memory_space<vmem>>, vector<8x256xbf16>,
    %c7 = arith.constant 7 : index
    %c0_27 = arith.constant 0 : index
    %55 = vector.load %arg2[%c7, %c0_27] : memref<9x256xf32, #tpu.memory_space<vmem>>, vector<1x256xf32>
    %56 = vector.broadcast %55 : vector<1x256xf32> to vector<8x256xf32>
    %57 = arith.mulf %48, %56 : vector<8x256xf32>
    %58 = arith.truncf %57 : vector<8x256xf32> to vector<8x256xbf16>
    %c56 = arith.constant 56 : index
    %c0_28 = arith.constant 0 : index
    %59 = vector.load %arg17[%c56, %c0_28] : memref<72x256xbf16, #tpu.memory_space<vmem>>, vector<8x256xbf16>
    tpu.vector_store %arg17[%c56, %c0_28], %58 {strides = array<i32>} : memref<72x256xbf16, #tpu.memory_space<vmem>>, vector<8x256xbf16>,
    %c255_i32_29 = arith.constant 255 : i32
    %60 = tpu.dynamic_rotate %48 by %c255_i32_29 dim 1 : vector<8x256xf32>, i32 -> vector<8x256xf32>
    %c8_30 = arith.constant 8 : index
    %c0_31 = arith.constant 0 : index
    %61 = vector.load %arg2[%c8_30, %c0_31] : memref<9x256xf32, #tpu.memory_space<vmem>>, vector<1x256xf32>
    %62 = vector.broadcast %61 : vector<1x256xf32> to vector<8x256xf32>
    %63 = arith.mulf %60, %62 : vector<8x256xf32>
    %64 = arith.truncf %63 : vector<8x256xf32> to vector<8x256xbf16>
    %c64 = arith.constant 64 : index
    %c0_32 = arith.constant 0 : index
    %65 = vector.load %arg17[%c64, %c0_32] : memref<72x256xbf16, #tpu.memory_space<vmem>>, vector<8x256xbf16>
    tpu.vector_store %arg17[%c64, %c0_32], %64 {strides = array<i32>} : memref<72x256xbf16, #tpu.memory_space<vmem>>, vector<8x256xbf16>,
    %c0_33 = arith.constant 0 : index
    %c0_34 = arith.constant 0 : index
    %66 = vector.load %arg5[%c0_33, %c0_34] : memref<16x72xbf16, #tpu.memory_space<vmem>>, vector<16x72xbf16>
    %c0_35 = arith.constant 0 : index
    %c0_36 = arith.constant 0 : index
    %67 = vector.load %arg17[%c0_35, %c0_36] : memref<72x256xbf16, #tpu.memory_space<vmem>>, vector<72x256xbf16>
    %cst_37 = arith.constant dense<0.000000e+00> : vector<16x256xf32>
    %68 = tpu.matmul %66, %67, %cst_37 {dimension_numbers = #tpu.dot_dimension_numbers<[1], [0], [0], [1], [0, 0, 1, 1], [], []>} : vector<16x72xbf16>, vector<72x256xbf16>, vector<16x256xf32> -> vector<16x256xf32>
    %c0_38 = arith.constant 0 : index
    %c0_39 = arith.constant 0 : index
    %69 = vector.load %arg6[%c0_38, %c0_39] : memref<16x1xf32, #tpu.memory_space<vmem>>, vector<16x1xf32>
    %70 = vector.broadcast %69 : vector<16x1xf32> to vector<16x256xf32>
    %71 = arith.addf %68, %70 : vector<16x256xf32>
    %cst_40 = arith.constant 0.000000e+00 : f32
    %72 = vector.broadcast %cst_40 : f32 to vector<16x256xf32>
    %73 = arith.cmpf ogt, %71, %72 : vector<16x256xf32>
    %cst_41 = arith.constant 1.000000e-01 : f32
    %74 = vector.broadcast %cst_41 : f32 to vector<16x256xf32>
    %75 = arith.mulf %74, %71 : vector<16x256xf32>
    %76 = arith.select %73, %71, %75 : vector<16x256xi1>, vector<16x256xf32>
    %c0_42 = arith.constant 0 : index
    %c0_43 = arith.constant 0 : index
    %77 = vector.load %arg7[%c0_42, %c0_43] : memref<8x16xbf16, #tpu.memory_space<vmem>>, vector<8x16xbf16>
    %78 = arith.truncf %76 : vector<16x256xf32> to vector<16x256xbf16>
    %cst_44 = arith.constant dense<0.000000e+00> : vector<8x256xf32>
    %79 = tpu.matmul %77, %78, %cst_44 {dimension_numbers = #tpu.dot_dimension_numbers<[1], [0], [0], [1], [0, 0, 1, 1], [], []>} : vector<8x16xbf16>, vector<16x256xbf16>, vector<8x256xf32> -> vector<8x256xf32>
    %c0_45 = arith.constant 0 : index
    %c0_46 = arith.constant 0 : index
    %80 = vector.load %arg8[%c0_45, %c0_46] : memref<8x1xf32, #tpu.memory_space<vmem>>, vector<8x1xf32>
    %81 = vector.broadcast %80 : vector<8x1xf32> to vector<8x256xf32>
    %82 = arith.addf %79, %81 : vector<8x256xf32>
    %cst_47 = arith.constant 0.000000e+00 : f32
    %83 = vector.broadcast %cst_47 : f32 to vector<8x256xf32>
    %84 = arith.cmpf ogt, %82, %83 : vector<8x256xf32>
    %cst_48 = arith.constant 1.000000e-01 : f32
    %85 = vector.broadcast %cst_48 : f32 to vector<8x256xf32>
    %86 = arith.mulf %85, %82 : vector<8x256xf32>
    %87 = arith.select %84, %82, %86 : vector<8x256xi1>, vector<8x256xf32>
    %c16_i32_49 = arith.constant 16 : i32
    %88 = tpu.dynamic_rotate %87 by %c16_i32_49 dim 1 : vector<8x256xf32>, i32 -> vector<8x256xf32>
    %c1_i32_50 = arith.constant 1 : i32
    %89 = tpu.dynamic_rotate %88 by %c1_i32_50 dim 1 : vector<8x256xf32>, i32 -> vector<8x256xf32>
    %c0_51 = arith.constant 0 : index
    %c0_52 = arith.constant 0 : index
    %90 = vector.load %arg2[%c0_51, %c0_52] : memref<9x256xf32, #tpu.memory_space<vmem>>, vector<1x256xf32>
    %91 = vector.broadcast %90 : vector<1x256xf32> to vector<8x256xf32>
    %92 = arith.mulf %89, %91 : vector<8x256xf32>
    %93 = arith.truncf %92 : vector<8x256xf32> to vector<8x256xbf16>
    %c0_53 = arith.constant 0 : index
    %c0_54 = arith.constant 0 : index
    %94 = vector.load %arg17[%c0_53, %c0_54] : memref<72x256xbf16, #tpu.memory_space<vmem>>, vector<8x256xbf16>
    tpu.vector_store %arg17[%c0_53, %c0_54], %93 {strides = array<i32>} : memref<72x256xbf16, #tpu.memory_space<vmem>>, vector<8x256xbf16>,
    %c1_55 = arith.constant 1 : index
    %c0_56 = arith.constant 0 : index
    %95 = vector.load %arg2[%c1_55, %c0_56] : memref<9x256xf32, #tpu.memory_space<vmem>>, vector<1x256xf32>
    %96 = vector.broadcast %95 : vector<1x256xf32> to vector<8x256xf32>
    %97 = arith.mulf %88, %96 : vector<8x256xf32>
    %98 = arith.truncf %97 : vector<8x256xf32> to vector<8x256xbf16>
    %c8_57 = arith.constant 8 : index
    %c0_58 = arith.constant 0 : index
    %99 = vector.load %arg17[%c8_57, %c0_58] : memref<72x256xbf16, #tpu.memory_space<vmem>>, vector<8x256xbf16>
    tpu.vector_store %arg17[%c8_57, %c0_58], %98 {strides = array<i32>} : memref<72x256xbf16, #tpu.memory_space<vmem>>, vector<8x256xbf16>,
    %c255_i32_59 = arith.constant 255 : i32
    %100 = tpu.dynamic_rotate %88 by %c255_i32_59 dim 1 : vector<8x256xf32>, i32 -> vector<8x256xf32>
    %c2_60 = arith.constant 2 : index
    %c0_61 = arith.constant 0 : index
    %101 = vector.load %arg2[%c2_60, %c0_61] : memref<9x256xf32, #tpu.memory_space<vmem>>, vector<1x256xf32>
    %102 = vector.broadcast %101 : vector<1x256xf32> to vector<8x256xf32>
    %103 = arith.mulf %100, %102 : vector<8x256xf32>
    %104 = arith.truncf %103 : vector<8x256xf32> to vector<8x256xbf16>
    %c16_62 = arith.constant 16 : index
    %c0_63 = arith.constant 0 : index
    %105 = vector.load %arg17[%c16_62, %c0_63] : memref<72x256xbf16, #tpu.memory_space<vmem>>, vector<8x256xbf16>
    tpu.vector_store %arg17[%c16_62, %c0_63], %104 {strides = array<i32>} : memref<72x256xbf16, #tpu.memory_space<vmem>>, vector<8x256xbf16>,
    %c1_i32_64 = arith.constant 1 : i32
    %106 = tpu.dynamic_rotate %87 by %c1_i32_64 dim 1 : vector<8x256xf32>, i32 -> vector<8x256xf32>
    %c3_65 = arith.constant 3 : index
    %c0_66 = arith.constant 0 : index
    %107 = vector.load %arg2[%c3_65, %c0_66] : memref<9x256xf32, #tpu.memory_space<vmem>>, vector<1x256xf32>
    %108 = vector.broadcast %107 : vector<1x256xf32> to vector<8x256xf32>
    %109 = arith.mulf %106, %108 : vector<8x256xf32>
    %110 = arith.truncf %109 : vector<8x256xf32> to vector<8x256xbf16>
    %c24_67 = arith.constant 24 : index
    %c0_68 = arith.constant 0 : index
    %111 = vector.load %arg17[%c24_67, %c0_68] : memref<72x256xbf16, #tpu.memory_space<vmem>>, vector<8x256xbf16>
    tpu.vector_store %arg17[%c24_67, %c0_68], %110 {strides = array<i32>} : memref<72x256xbf16, #tpu.memory_space<vmem>>, vector<8x256xbf16>,
    %c4_69 = arith.constant 4 : index
    %c0_70 = arith.constant 0 : index
    %112 = vector.load %arg2[%c4_69, %c0_70] : memref<9x256xf32, #tpu.memory_space<vmem>>, vector<1x256xf32>
    %113 = vector.broadcast %112 : vector<1x256xf32> to vector<8x256xf32>
    %114 = arith.mulf %87, %113 : vector<8x256xf32>
    %115 = arith.truncf %114 : vector<8x256xf32> to vector<8x256xbf16>
    %c32_71 = arith.constant 32 : index
    %c0_72 = arith.constant 0 : index
    %116 = vector.load %arg17[%c32_71, %c0_72] : memref<72x256xbf16, #tpu.memory_space<vmem>>, vector<8x256xbf16>
    tpu.vector_store %arg17[%c32_71, %c0_72], %115 {strides = array<i32>} : memref<72x256xbf16, #tpu.memory_space<vmem>>, vector<8x256xbf16>,
    %c255_i32_73 = arith.constant 255 : i32
    %117 = tpu.dynamic_rotate %87 by %c255_i32_73 dim 1 : vector<8x256xf32>, i32 -> vector<8x256xf32>
    %c5_74 = arith.constant 5 : index
    %c0_75 = arith.constant 0 : index
    %118 = vector.load %arg2[%c5_74, %c0_75] : memref<9x256xf32, #tpu.memory_space<vmem>>, vector<1x256xf32>
    %119 = vector.broadcast %118 : vector<1x256xf32> to vector<8x256xf32>
    %120 = arith.mulf %117, %119 : vector<8x256xf32>
    %121 = arith.truncf %120 : vector<8x256xf32> to vector<8x256xbf16>
    %c40_76 = arith.constant 40 : index
    %c0_77 = arith.constant 0 : index
    %122 = vector.load %arg17[%c40_76, %c0_77] : memref<72x256xbf16, #tpu.memory_space<vmem>>, vector<8x256xbf16>
    tpu.vector_store %arg17[%c40_76, %c0_77], %121 {strides = array<i32>} : memref<72x256xbf16, #tpu.memory_space<vmem>>, vector<8x256xbf16>,
    %c240_i32_78 = arith.constant 240 : i32
    %123 = tpu.dynamic_rotate %87 by %c240_i32_78 dim 1 : vector<8x256xf32>, i32 -> vector<8x256xf32>
    %c1_i32_79 = arith.constant 1 : i32
    %124 = tpu.dynamic_rotate %123 by %c1_i32_79 dim 1 : vector<8x256xf32>, i32 -> vector<8x256xf32>
    %c6_80 = arith.constant 6 : index
    %c0_81 = arith.constant 0 : index
    %125 = vector.load %arg2[%c6_80, %c0_81] : memref<9x256xf32, #tpu.memory_space<vmem>>, vector<1x256xf32>
    %126 = vector.broadcast %125 : vector<1x256xf32> to vector<8x256xf32>
    %127 = arith.mulf %124, %126 : vector<8x256xf32>
    %128 = arith.truncf %127 : vector<8x256xf32> to vector<8x256xbf16>
    %c48_82 = arith.constant 48 : index
    %c0_83 = arith.constant 0 : index
    %129 = vector.load %arg17[%c48_82, %c0_83] : memref<72x256xbf16, #tpu.memory_space<vmem>>, vector<8x256xbf16>
    tpu.vector_store %arg17[%c48_82, %c0_83], %128 {strides = array<i32>} : memref<72x256xbf16, #tpu.memory_space<vmem>>, vector<8x256xbf16>,
    %c7_84 = arith.constant 7 : index
    %c0_85 = arith.constant 0 : index
    %130 = vector.load %arg2[%c7_84, %c0_85] : memref<9x256xf32, #tpu.memory_space<vmem>>, vector<1x256xf32>
    %131 = vector.broadcast %130 : vector<1x256xf32> to vector<8x256xf32>
    %132 = arith.mulf %123, %131 : vector<8x256xf32>
    %133 = arith.truncf %132 : vector<8x256xf32> to vector<8x256xbf16>
    %c56_86 = arith.constant 56 : index
    %c0_87 = arith.constant 0 : index
    %134 = vector.load %arg17[%c56_86, %c0_87] : memref<72x256xbf16, #tpu.memory_space<vmem>>, vector<8x256xbf16>
    tpu.vector_store %arg17[%c56_86, %c0_87], %133 {strides = array<i32>} : memref<72x256xbf16, #tpu.memory_space<vmem>>, vector<8x256xbf16>,
    %c255_i32_88 = arith.constant 255 : i32
    %135 = tpu.dynamic_rotate %123 by %c255_i32_88 dim 1 : vector<8x256xf32>, i32 -> vector<8x256xf32>
    %c8_89 = arith.constant 8 : index
    %c0_90 = arith.constant 0 : index
    %136 = vector.load %arg2[%c8_89, %c0_90] : memref<9x256xf32, #tpu.memory_space<vmem>>, vector<1x256xf32>
    %137 = vector.broadcast %136 : vector<1x256xf32> to vector<8x256xf32>
    %138 = arith.mulf %135, %137 : vector<8x256xf32>
    %139 = arith.truncf %138 : vector<8x256xf32> to vector<8x256xbf16>
    %c64_91 = arith.constant 64 : index
    %c0_92 = arith.constant 0 : index
    %140 = vector.load %arg17[%c64_91, %c0_92] : memref<72x256xbf16, #tpu.memory_space<vmem>>, vector<8x256xbf16>
    tpu.vector_store %arg17[%c64_91, %c0_92], %139 {strides = array<i32>} : memref<72x256xbf16, #tpu.memory_space<vmem>>, vector<8x256xbf16>,
    %c0_93 = arith.constant 0 : index
    %c0_94 = arith.constant 0 : index
    %141 = vector.load %arg9[%c0_93, %c0_94] : memref<16x72xbf16, #tpu.memory_space<vmem>>, vector<16x72xbf16>
    %c0_95 = arith.constant 0 : index
    %c0_96 = arith.constant 0 : index
    %142 = vector.load %arg17[%c0_95, %c0_96] : memref<72x256xbf16, #tpu.memory_space<vmem>>, vector<72x256xbf16>
    %cst_97 = arith.constant dense<0.000000e+00> : vector<16x256xf32>
    %143 = tpu.matmul %141, %142, %cst_97 {dimension_numbers = #tpu.dot_dimension_numbers<[1], [0], [0], [1], [0, 0, 1, 1], [], []>} : vector<16x72xbf16>, vector<72x256xbf16>, vector<16x256xf32> -> vector<16x256xf32>
    %c0_98 = arith.constant 0 : index
    %c0_99 = arith.constant 0 : index
    %144 = vector.load %arg10[%c0_98, %c0_99] : memref<16x1xf32, #tpu.memory_space<vmem>>, vector<16x1xf32>
    %145 = vector.broadcast %144 : vector<16x1xf32> to vector<16x256xf32>
    %146 = arith.addf %143, %145 : vector<16x256xf32>
    %cst_100 = arith.constant 0.000000e+00 : f32
    %147 = vector.broadcast %cst_100 : f32 to vector<16x256xf32>
    %148 = arith.cmpf ogt, %146, %147 : vector<16x256xf32>
    %cst_101 = arith.constant 1.000000e-01 : f32
    %149 = vector.broadcast %cst_101 : f32 to vector<16x256xf32>
    %150 = arith.mulf %149, %146 : vector<16x256xf32>
    %151 = arith.select %148, %146, %150 : vector<16x256xi1>, vector<16x256xf32>
    %c0_102 = arith.constant 0 : index
    %c0_103 = arith.constant 0 : index
    %152 = vector.load %arg11[%c0_102, %c0_103] : memref<8x16xbf16, #tpu.memory_space<vmem>>, vector<8x16xbf16>
    %153 = arith.truncf %151 : vector<16x256xf32> to vector<16x256xbf16>
    %cst_104 = arith.constant dense<0.000000e+00> : vector<8x256xf32>
    %154 = tpu.matmul %152, %153, %cst_104 {dimension_numbers = #tpu.dot_dimension_numbers<[1], [0], [0], [1], [0, 0, 1, 1], [], []>} : vector<8x16xbf16>, vector<16x256xbf16>, vector<8x256xf32> -> vector<8x256xf32>
    %c0_105 = arith.constant 0 : index
    %c0_106 = arith.constant 0 : index
    %155 = vector.load %arg12[%c0_105, %c0_106] : memref<8x1xf32, #tpu.memory_space<vmem>>, vector<8x1xf32>
    %156 = vector.broadcast %155 : vector<8x1xf32> to vector<8x256xf32>
    %157 = arith.addf %154, %156 : vector<8x256xf32>
    %cst_107 = arith.constant 0.000000e+00 : f32
    %158 = vector.broadcast %cst_107 : f32 to vector<8x256xf32>
    %159 = arith.cmpf ogt, %157, %158 : vector<8x256xf32>
    %cst_108 = arith.constant 1.000000e-01 : f32
    %160 = vector.broadcast %cst_108 : f32 to vector<8x256xf32>
    %161 = arith.mulf %160, %157 : vector<8x256xf32>
    %162 = arith.select %159, %157, %161 : vector<8x256xi1>, vector<8x256xf32>
    %c16_i32_109 = arith.constant 16 : i32
    %163 = tpu.dynamic_rotate %162 by %c16_i32_109 dim 1 : vector<8x256xf32>, i32 -> vector<8x256xf32>
    %c1_i32_110 = arith.constant 1 : i32
    %164 = tpu.dynamic_rotate %163 by %c1_i32_110 dim 1 : vector<8x256xf32>, i32 -> vector<8x256xf32>
    %c0_111 = arith.constant 0 : index
    %c0_112 = arith.constant 0 : index
    %165 = vector.load %arg2[%c0_111, %c0_112] : memref<9x256xf32, #tpu.memory_space<vmem>>, vector<1x256xf32>
    %166 = vector.broadcast %165 : vector<1x256xf32> to vector<8x256xf32>
    %167 = arith.mulf %164, %166 : vector<8x256xf32>
    %168 = arith.truncf %167 : vector<8x256xf32> to vector<8x256xbf16>
    %c0_113 = arith.constant 0 : index
    %c0_114 = arith.constant 0 : index
    %169 = vector.load %arg17[%c0_113, %c0_114] : memref<72x256xbf16, #tpu.memory_space<vmem>>, vector<8x256xbf16>
    tpu.vector_store %arg17[%c0_113, %c0_114], %168 {strides = array<i32>} : memref<72x256xbf16, #tpu.memory_space<vmem>>, vector<8x256xbf16>,
    %c1_115 = arith.constant 1 : index
    %c0_116 = arith.constant 0 : index
    %170 = vector.load %arg2[%c1_115, %c0_116] : memref<9x256xf32, #tpu.memory_space<vmem>>, vector<1x256xf32>
    %171 = vector.broadcast %170 : vector<1x256xf32> to vector<8x256xf32>
    %172 = arith.mulf %163, %171 : vector<8x256xf32>
    %173 = arith.truncf %172 : vector<8x256xf32> to vector<8x256xbf16>
    %c8_117 = arith.constant 8 : index
    %c0_118 = arith.constant 0 : index
    %174 = vector.load %arg17[%c8_117, %c0_118] : memref<72x256xbf16, #tpu.memory_space<vmem>>, vector<8x256xbf16>
    tpu.vector_store %arg17[%c8_117, %c0_118], %173 {strides = array<i32>} : memref<72x256xbf16, #tpu.memory_space<vmem>>, vector<8x256xbf16>,
    %c255_i32_119 = arith.constant 255 : i32
    %175 = tpu.dynamic_rotate %163 by %c255_i32_119 dim 1 : vector<8x256xf32>, i32 -> vector<8x256xf32>
    %c2_120 = arith.constant 2 : index
    %c0_121 = arith.constant 0 : index
    %176 = vector.load %arg2[%c2_120, %c0_121] : memref<9x256xf32, #tpu.memory_space<vmem>>, vector<1x256xf32>
    %177 = vector.broadcast %176 : vector<1x256xf32> to vector<8x256xf32>
    %178 = arith.mulf %175, %177 : vector<8x256xf32>
    %179 = arith.truncf %178 : vector<8x256xf32> to vector<8x256xbf16>
    %c16_122 = arith.constant 16 : index
    %c0_123 = arith.constant 0 : index
    %180 = vector.load %arg17[%c16_122, %c0_123] : memref<72x256xbf16, #tpu.memory_space<vmem>>, vector<8x256xbf16>
    tpu.vector_store %arg17[%c16_122, %c0_123], %179 {strides = array<i32>} : memref<72x256xbf16, #tpu.memory_space<vmem>>, vector<8x256xbf16>,
    %c1_i32_124 = arith.constant 1 : i32
    %181 = tpu.dynamic_rotate %162 by %c1_i32_124 dim 1 : vector<8x256xf32>, i32 -> vector<8x256xf32>
    %c3_125 = arith.constant 3 : index
    %c0_126 = arith.constant 0 : index
    %182 = vector.load %arg2[%c3_125, %c0_126] : memref<9x256xf32, #tpu.memory_space<vmem>>, vector<1x256xf32>
    %183 = vector.broadcast %182 : vector<1x256xf32> to vector<8x256xf32>
    %184 = arith.mulf %181, %183 : vector<8x256xf32>
    %185 = arith.truncf %184 : vector<8x256xf32> to vector<8x256xbf16>
    %c24_127 = arith.constant 24 : index
    %c0_128 = arith.constant 0 : index
    %186 = vector.load %arg17[%c24_127, %c0_128] : memref<72x256xbf16, #tpu.memory_space<vmem>>, vector<8x256xbf16>
    tpu.vector_store %arg17[%c24_127, %c0_128], %185 {strides = array<i32>} : memref<72x256xbf16, #tpu.memory_space<vmem>>, vector<8x256xbf16>,
    %c4_129 = arith.constant 4 : index
    %c0_130 = arith.constant 0 : index
    %187 = vector.load %arg2[%c4_129, %c0_130] : memref<9x256xf32, #tpu.memory_space<vmem>>, vector<1x256xf32>
    %188 = vector.broadcast %187 : vector<1x256xf32> to vector<8x256xf32>
    %189 = arith.mulf %162, %188 : vector<8x256xf32>
    %190 = arith.truncf %189 : vector<8x256xf32> to vector<8x256xbf16>
    %c32_131 = arith.constant 32 : index
    %c0_132 = arith.constant 0 : index
    %191 = vector.load %arg17[%c32_131, %c0_132] : memref<72x256xbf16, #tpu.memory_space<vmem>>, vector<8x256xbf16>
    tpu.vector_store %arg17[%c32_131, %c0_132], %190 {strides = array<i32>} : memref<72x256xbf16, #tpu.memory_space<vmem>>, vector<8x256xbf16>,
    %c255_i32_133 = arith.constant 255 : i32
    %192 = tpu.dynamic_rotate %162 by %c255_i32_133 dim 1 : vector<8x256xf32>, i32 -> vector<8x256xf32>
    %c5_134 = arith.constant 5 : index
    %c0_135 = arith.constant 0 : index
    %193 = vector.load %arg2[%c5_134, %c0_135] : memref<9x256xf32, #tpu.memory_space<vmem>>, vector<1x256xf32>
    %194 = vector.broadcast %193 : vector<1x256xf32> to vector<8x256xf32>
    %195 = arith.mulf %192, %194 : vector<8x256xf32>
    %196 = arith.truncf %195 : vector<8x256xf32> to vector<8x256xbf16>
    %c40_136 = arith.constant 40 : index
    %c0_137 = arith.constant 0 : index
    %197 = vector.load %arg17[%c40_136, %c0_137] : memref<72x256xbf16, #tpu.memory_space<vmem>>, vector<8x256xbf16>
    tpu.vector_store %arg17[%c40_136, %c0_137], %196 {strides = array<i32>} : memref<72x256xbf16, #tpu.memory_space<vmem>>, vector<8x256xbf16>,
    %c240_i32_138 = arith.constant 240 : i32
    %198 = tpu.dynamic_rotate %162 by %c240_i32_138 dim 1 : vector<8x256xf32>, i32 -> vector<8x256xf32>
    %c1_i32_139 = arith.constant 1 : i32
    %199 = tpu.dynamic_rotate %198 by %c1_i32_139 dim 1 : vector<8x256xf32>, i32 -> vector<8x256xf32>
    %c6_140 = arith.constant 6 : index
    %c0_141 = arith.constant 0 : index
    %200 = vector.load %arg2[%c6_140, %c0_141] : memref<9x256xf32, #tpu.memory_space<vmem>>, vector<1x256xf32>
    %201 = vector.broadcast %200 : vector<1x256xf32> to vector<8x256xf32>
    %202 = arith.mulf %199, %201 : vector<8x256xf32>
    %203 = arith.truncf %202 : vector<8x256xf32> to vector<8x256xbf16>
    %c48_142 = arith.constant 48 : index
    %c0_143 = arith.constant 0 : index
    %204 = vector.load %arg17[%c48_142, %c0_143] : memref<72x256xbf16, #tpu.memory_space<vmem>>, vector<8x256xbf16>
    tpu.vector_store %arg17[%c48_142, %c0_143], %203 {strides = array<i32>} : memref<72x256xbf16, #tpu.memory_space<vmem>>, vector<8x256xbf16>,
    %c7_144 = arith.constant 7 : index
    %c0_145 = arith.constant 0 : index
    %205 = vector.load %arg2[%c7_144, %c0_145] : memref<9x256xf32, #tpu.memory_space<vmem>>, vector<1x256xf32>
    %206 = vector.broadcast %205 : vector<1x256xf32> to vector<8x256xf32>
    %207 = arith.mulf %198, %206 : vector<8x256xf32>
    %208 = arith.truncf %207 : vector<8x256xf32> to vector<8x256xbf16>
    %c56_146 = arith.constant 56 : index
    %c0_147 = arith.constant 0 : index
    %209 = vector.load %arg17[%c56_146, %c0_147] : memref<72x256xbf16, #tpu.memory_space<vmem>>, vector<8x256xbf16>
    tpu.vector_store %arg17[%c56_146, %c0_147], %208 {strides = array<i32>} : memref<72x256xbf16, #tpu.memory_space<vmem>>, vector<8x256xbf16>,
    %c255_i32_148 = arith.constant 255 : i32
    %210 = tpu.dynamic_rotate %198 by %c255_i32_148 dim 1 : vector<8x256xf32>, i32 -> vector<8x256xf32>
    %c8_149 = arith.constant 8 : index
    %c0_150 = arith.constant 0 : index
    %211 = vector.load %arg2[%c8_149, %c0_150] : memref<9x256xf32, #tpu.memory_space<vmem>>, vector<1x256xf32>
    %212 = vector.broadcast %211 : vector<1x256xf32> to vector<8x256xf32>
    %213 = arith.mulf %210, %212 : vector<8x256xf32>
    %214 = arith.truncf %213 : vector<8x256xf32> to vector<8x256xbf16>
    %c64_151 = arith.constant 64 : index
    %c0_152 = arith.constant 0 : index
    %215 = vector.load %arg17[%c64_151, %c0_152] : memref<72x256xbf16, #tpu.memory_space<vmem>>, vector<8x256xbf16>
    tpu.vector_store %arg17[%c64_151, %c0_152], %214 {strides = array<i32>} : memref<72x256xbf16, #tpu.memory_space<vmem>>, vector<8x256xbf16>,
    %c0_153 = arith.constant 0 : index
    %c0_154 = arith.constant 0 : index
    %216 = vector.load %arg13[%c0_153, %c0_154] : memref<16x72xbf16, #tpu.memory_space<vmem>>, vector<16x72xbf16>
    %c0_155 = arith.constant 0 : index
    %c0_156 = arith.constant 0 : index
    %217 = vector.load %arg17[%c0_155, %c0_156] : memref<72x256xbf16, #tpu.memory_space<vmem>>, vector<72x256xbf16>
    %cst_157 = arith.constant dense<0.000000e+00> : vector<16x256xf32>
    %218 = tpu.matmul %216, %217, %cst_157 {dimension_numbers = #tpu.dot_dimension_numbers<[1], [0], [0], [1], [0, 0, 1, 1], [], []>} : vector<16x72xbf16>, vector<72x256xbf16>, vector<16x256xf32> -> vector<16x256xf32>
    %c0_158 = arith.constant 0 : index
    %c0_159 = arith.constant 0 : index
    %219 = vector.load %arg14[%c0_158, %c0_159] : memref<16x1xf32, #tpu.memory_space<vmem>>, vector<16x1xf32>
    %220 = vector.broadcast %219 : vector<16x1xf32> to vector<16x256xf32>
    %221 = arith.addf %218, %220 : vector<16x256xf32>
    %cst_160 = arith.constant 0.000000e+00 : f32
    %222 = vector.broadcast %cst_160 : f32 to vector<16x256xf32>
    %223 = arith.cmpf ogt, %221, %222 : vector<16x256xf32>
    %cst_161 = arith.constant 1.000000e-01 : f32
    %224 = vector.broadcast %cst_161 : f32 to vector<16x256xf32>
    %225 = arith.mulf %224, %221 : vector<16x256xf32>
    %226 = arith.select %223, %221, %225 : vector<16x256xi1>, vector<16x256xf32>
    %227 = vector.shape_cast %162 : vector<8x256xf32> to vector<1x8x256xf32>
    %c0_162 = arith.constant 0 : index
    %c0_163 = arith.constant 0 : index
    %c0_164 = arith.constant 0 : index
    %228 = vector.load %arg15[%c0_162, %c0_163, %c0_164] : memref<1x8x256xf32, #tpu.memory_space<vmem>>, vector<1x8x256xf32>
    tpu.vector_store %arg15[%c0_162, %c0_163, %c0_164], %227 {strides = array<i32>} : memref<1x8x256xf32, #tpu.memory_space<vmem>>, vector<1x8x256xf32>,
    %229 = vector.shape_cast %226 : vector<16x256xf32> to vector<1x16x256xf32>
    %c0_165 = arith.constant 0 : index
    %c0_166 = arith.constant 0 : index
    %c0_167 = arith.constant 0 : index
    %230 = vector.load %arg16[%c0_165, %c0_166, %c0_167] : memref<1x16x256xf32, #tpu.memory_space<vmem>>, vector<1x16x256xf32>
    tpu.vector_store %arg16[%c0_165, %c0_166, %c0_167], %229 {strides = array<i32>} : memref<1x16x256xf32, #tpu.memory_space<vmem>>, vector<1x16x256xf32>,
    return
  }
  func.func @transform_0(%arg0: i32) -> (i32, i32, i32) {
    %c0_i32 = arith.constant 0 : i32
    %c0_i32_0 = arith.constant 0 : i32
    %c0_i32_1 = arith.constant 0 : i32
    return %arg0, %c0_i32, %c0_i32_0 : i32, i32, i32
  }
  func.func @transform_1(%arg0: i32) -> (i32, i32) {
    %c0_i32 = arith.constant 0 : i32
    %c0_i32_0 = arith.constant 0 : i32
    %c0_i32_1 = arith.constant 0 : i32
    return %c0_i32, %c0_i32_0 : i32, i32
  }
  func.func @transform_2(%arg0: i32) -> (i32, i32) {
    %c0_i32 = arith.constant 0 : i32
    %c0_i32_0 = arith.constant 0 : i32
    %c0_i32_1 = arith.constant 0 : i32
    return %c0_i32, %c0_i32_0 : i32, i32
  }
  func.func @transform_3(%arg0: i32) -> (i32, i32) {
    %c0_i32 = arith.constant 0 : i32
    %c0_i32_0 = arith.constant 0 : i32
    %c0_i32_1 = arith.constant 0 : i32
    return %c0_i32, %c0_i32_0 : i32, i32
  }
  func.func @transform_4(%arg0: i32) -> (i32, i32) {
    %c0_i32 = arith.constant 0 : i32
    %c0_i32_0 = arith.constant 0 : i32
    %c0_i32_1 = arith.constant 0 : i32
    return %c0_i32, %c0_i32_0 : i32, i32
  }
  func.func @transform_5(%arg0: i32) -> (i32, i32) {
    %c0_i32 = arith.constant 0 : i32
    %c0_i32_0 = arith.constant 0 : i32
    %c0_i32_1 = arith.constant 0 : i32
    return %c0_i32, %c0_i32_0 : i32, i32
  }
  func.func @transform_6(%arg0: i32) -> (i32, i32) {
    %c0_i32 = arith.constant 0 : i32
    %c0_i32_0 = arith.constant 0 : i32
    %c0_i32_1 = arith.constant 0 : i32
    return %c0_i32, %c0_i32_0 : i32, i32
  }
  func.func @transform_7(%arg0: i32) -> (i32, i32) {
    %c0_i32 = arith.constant 0 : i32
    %c0_i32_0 = arith.constant 0 : i32
    %c0_i32_1 = arith.constant 0 : i32
    return %c0_i32, %c0_i32_0 : i32, i32
  }
  func.func @transform_8(%arg0: i32) -> (i32, i32) {
    %c0_i32 = arith.constant 0 : i32
    %c0_i32_0 = arith.constant 0 : i32
    %c0_i32_1 = arith.constant 0 : i32
    return %c0_i32, %c0_i32_0 : i32, i32
  }
  func.func @transform_9(%arg0: i32) -> (i32, i32) {
    %c0_i32 = arith.constant 0 : i32
    %c0_i32_0 = arith.constant 0 : i32
    %c0_i32_1 = arith.constant 0 : i32
    return %c0_i32, %c0_i32_0 : i32, i32
  }
  func.func @transform_10(%arg0: i32) -> (i32, i32) {
    %c0_i32 = arith.constant 0 : i32
    %c0_i32_0 = arith.constant 0 : i32
    %c0_i32_1 = arith.constant 0 : i32
    return %c0_i32, %c0_i32_0 : i32, i32
  }
  func.func @transform_11(%arg0: i32) -> (i32, i32) {
    %c0_i32 = arith.constant 0 : i32
    %c0_i32_0 = arith.constant 0 : i32
    %c0_i32_1 = arith.constant 0 : i32
    return %c0_i32, %c0_i32_0 : i32, i32
  }
  func.func @transform_12(%arg0: i32) -> (i32, i32) {
    %c0_i32 = arith.constant 0 : i32
    %c0_i32_0 = arith.constant 0 : i32
    %c0_i32_1 = arith.constant 0 : i32
    return %c0_i32, %c0_i32_0 : i32, i32
  }
  func.func @transform_13(%arg0: i32) -> (i32, i32) {
    %c0_i32 = arith.constant 0 : i32
    %c0_i32_0 = arith.constant 0 : i32
    %c0_i32_1 = arith.constant 0 : i32
    return %c0_i32, %c0_i32_0 : i32, i32
  }
  func.func @transform_14(%arg0: i32) -> (i32, i32, i32) {
    %c0_i32 = arith.constant 0 : i32
    %c0_i32_0 = arith.constant 0 : i32
    %c0_i32_1 = arith.constant 0 : i32
    return %arg0, %c0_i32, %c0_i32_0 : i32, i32, i32
  }
  func.func @transform_15(%arg0: i32) -> (i32, i32, i32) {
    %c0_i32 = arith.constant 0 : i32
    %c0_i32_0 = arith.constant 0 : i32
    %c0_i32_1 = arith.constant 0 : i32
    return %arg0, %c0_i32, %c0_i32_0 : i32, i32, i32
  }
}

</mosaic_0001>

<bundles_post_ra>
// kernel: yolo_block_forward.1
= control target key start
LH: loop header
LB: loop body
LE: loop exit
PB: predicated region body
PF: predicated region fallthrough
CT: control target
= control target key end

     0   :  { %s2264_s18 = smov 0   ;;  %s2716_s0 = inlined_call_operand.vmem [shape: f32[2,4,256], index: 0, kind: input, shape index: {}]   ;;  %s2717_s1 = inlined_call_operand.vmem [shape: f32[9,256], index: 1, kind: input, shape index: {}]   ;;  %s2718_s2 = inlined_call_operand.vmem [shape: bf16[8,4], index: 2, kind: input, shape index: {}]   ;;  %s2719_s3 = inlined_call_operand.vmem [shape: f32[8,1], index: 3, kind: input, shape index: {}]   ;;  %s2720_s4 = inlined_call_operand.vmem [shape: bf16[16,72], index: 4, kind: input, shape index: {}]   ;;  %s2721_s5 = inlined_call_operand.vmem [shape: f32[16,1], index: 5, kind: input, shape index: {}]   ;;  %s2722_s6 = inlined_call_operand.vmem [shape: bf16[8,16], index: 6, kind: input, shape index: {}]   ;;  %s2723_s7 = inlined_call_operand.vmem [shape: f32[8,1], index: 7, kind: input, shape index: {}]   ;;  %s2724_s8 = inlined_call_operand.vmem [shape: bf16[16,72], index: 8, kind: input, shape index: {}]   ;;  %s2725_s9 = inlined_call_operand.vmem [shape: f32[16,1], index: 9, kind: input, shape index: {}]   ;;  %s2726_s10 = inlined_call_operand.vmem [shape: bf16[8,16], index: 10, kind: input, shape index: {}]   ;;  %s2727_s11 = inlined_call_operand.vmem [shape: f32[8,1], index: 11, kind: input, shape index: {}]   ;;  %s2728_s12 = inlined_call_operand.vmem [shape: bf16[16,72], index: 12, kind: input, shape index: {}]   ;;  %s2729_s13 = inlined_call_operand.vmem [shape: f32[16,1], index: 13, kind: input, shape index: {}]   ;;  %s2730_s14 = inlined_call_operand.vmem [shape: f32[2,8,256], index: 14, kind: output, shape index: {0}]   ;;  %s2731_s15 = inlined_call_operand.vmem [shape: f32[2,16,256], index: 15, kind: output, shape index: {1}]  }
   0x1 LB: > { %s1985_s19 = sadd.s32 4294967295, %s2177_s18   ;;  %p1989_p0 = scmp.ge.s32.totalorder %s2177_s18, 1  ;;  %s2177_s18 = sphi %s2264_s18, %s26_s18  }
   0x2   : > { %p440_p1 = scmp.lt.s32.totalorder %s2177_s18, 3 }
   0x4   : > { %p441_p2 = pnand %p1989_p0, %p440_p1 }
   0x5   : > { %p493_p3 = scmp.lt.s32.totalorder (!%p441_p2), %s1985_s19, 1  ;;  %s2180_s28 = smov (!%p441_p2), 112  }
   0x6   : > { %444 = sbr.rel (%p441_p2) target bundleno = 2016 (0x7e0), region = 76  ;;  %s2181_s29 = smov (!%p441_p2), 16  }
   0x7   : > { %s2182_s30 = smov (!%p441_p2), 127   ;;  %s2183_s16 = smov (!%p441_p2), 1  }
   0xb   : > { %v2179_v0 = vmov 0   ;;  %v516_v1 = vld [vmem:[%s2719_s3] sm:$0xff]  ;;  %s2733_s19 = smov (!%p493_p3, %s1985_s19), 1  ;;  %vm526_vm0 = vcmask 1041408   ;;  %vm522_vm1 = vcmask 31744   ;;  %v584_v19 = vlaneseq  ;;  %v861_v29 = vld [vmem:[%s2721_s5 + $0x8] sm:$0xff] }
   0xc   : > { %565 = vmatprep.mubr.bf16.mxu0 %v2179_v0  ;;  %2165 = vset.pattern.permute.xlu0 %v2179_v0  ;;  %s2092_s22 = sshll.u32 %s2733_s19, 3  ;;  %v510_v7 = vld [vmem:[%s2718_s2] sm:$0xf]  ;;  %v2013_v33 = vld [vmem:[%s2717_s1 + $0x10] ss:$8 sm:$0x3] }
   0xd   : > { %519 = vperm.xlu0 %2165, %v516_v1   ;;  %965 = vmatprep.mubr.bf16.mxu1 %v2179_v0  ;;  %s497_s25 = scalar_lea.vmem %s2716_s0, %s2092_s22  ;;  %v2305_v20 = vand.u32 127, %v584_v19  ;;  %v860_v30 = vld [vmem:[%s2721_s5] sm:$0xff]  ;;  %v599_v32 = vshrl.u32 %v584_v19, 7  ;;  %vm926_vm8 = vcmask 1043456   ;;  %vm922_vm9 = vcmask 588800   ;;  %s2093_s21 = sshll.u32 %s2733_s19, 4 }
   0xe   : > { %2166 = vset.pattern.permute.xlu1 %v2179_v0  ;;  %v509_v2 = vld [vmem:[%s497_s25] sm:$0xff]  ;;  %vm997_vm14 = vcmask 130048   ;;  %s502_s24 = scalar_lea.vmem %s2730_s14, %s2093_s21  ;;  %s2094_s23 = sshll.u32 %s2733_s19, 5 }
   0xf   : > { %v512_v3 = vcombine.high %v509_v2, %v509_v2  ;;  %v514_v4 = vpack.c.bf16 %v509_v2, %v509_v2  ;;  %vm762_vm4 = vcmp.lt.s32.totalorder %v2305_v20, 112  ;;  %vm586_vm5 = vcmp.lt.s32.totalorder %v2305_v20, 16  ;;  %v991_v31 = vld [vmem:[%s2723_s7] sm:$0xff] }
  0x10   : > { %v2349_v34 = vsub.s32 0, %v599_v32  ;;  %v2351_v35 = vsub.s32 1, %v599_v32  ;;  %v2011_v38 = vld [vmem:[%s2717_s1 + $0x7] ss:$8 sm:$0x3]  ;;  %vm593_vm6 = vcmp.lt.s32.totalorder %v2305_v20, 1 }
  0x11   : > { %v515_v5 = vpack.c.bf16 %v512_v3, %v512_v3  ;;  %v528_v6 = vsel %vm526_vm0, %v514_v4, 0  ;;  %v2007_v39 = vld [vmem:[%s2717_s1 + $0x5] ss:$8 sm:$0x3]  ;;  %vm647_vm7 = vcmp.lt.s32.totalorder %v2305_v20, 127 }
  0x12   : > { %v831_v40 = vrot.slane %v2013_v33, %v2349_v34  ;;  %v835_v41 = vrot.slane %v2013_v33, %v2351_v35  ;;  %v2009_v42 = vld [vmem:[%s2717_s1 + $0x6] ss:$8 sm:$0x3]  ;;  %v805_v43 = vrot.slane %v2011_v38, %v2351_v35  ;;  %v801_v46 = vrot.slane %v2011_v38, %v2349_v34  ;;  %v2005_v54 = vld [vmem:[%s2717_s1 + $0x4] ss:$8 sm:$0x3] }
  0x13   : > { %1996 = vmatprep.subr.msk.bf16.mxu0 %vm526_vm0, %v515_v5  ;;  %v744_v47 = vrot.slane %v2007_v39, %v2351_v35  ;;  %v777_v51 = vrot.slane %v2009_v42, %v2349_v34  ;;  %v781_v52 = vrot.slane %v2009_v42, %v2351_v35  ;;  %v714_v56 = vrot.slane %v2005_v54, %v2351_v35  ;;  %v1999_v19 = vld [vmem:[%s2717_s1 + $0x1] ss:$8 sm:$0x3] }
  0x14   : > { %548 = vmatpush1.bf16.msra.mxu0 %v528_v6  ;;  %v740_v58 = vrot.slane %v2007_v39, %v2349_v34  ;;  %v629_v32 = vrot.slane %v1999_v19, %v2351_v35 }
  0x17   : > { %1997 = vmatmul.mubr.msk.bf16.vlgmr.msra.gmra.mxu0 %vm522_vm1, %v510_v7 }
  0x18   : > { %1033 = vmatprep.mubr.bf16.mxu0 %v2179_v0 }
  0x88   : > { %v520_v8 = vpop.permute.xlu0 %519 }
  0xd7   : > { %v567_v9 = vpop.f32.mrf.mxu0 }
  0xd8   : > { %v568_v10 = vadd.f32 %v567_v9, %v520_v8  ;;  %v2001_v9 = vld [vmem:[%s2717_s1 + $0x2] ss:$8 sm:$0x3] }
  0xd9   : > { %v569_v11 = vpop.f32.mrf.mxu0 }
  0xda   : > { %vm574_vm2 = vcmp.gt.f32.partialorder %v568_v10, 0.0  ;;  %v576_v12 = vmul.f32 0.1, %v568_v10  ;;  %v570_v13 = vadd.f32 %v569_v11, %v520_v8  ;;  %v2003_v8 = vld [vmem:[%s2717_s1 + $0x3] ss:$8 sm:$0x3] }
  0xdb   : > { %v571_v14 = vpop.f32.mrf.mxu0 }
  0xdc   : > { %v2289_v15 = vsel %vm574_vm2, %v568_v10, %v576_v12  ;;  %vm575_vm3 = vcmp.gt.f32.partialorder %v570_v13, 0.0  ;;  %v577_v16 = vmul.f32 0.1, %v570_v13  ;;  %v710_v10 = vrot.slane %v2005_v54, %v2349_v34 }
  0xdd   : > { %v572_v17 = vpop.f32.mrf.mxu0  ;;  %758 = vrot.lane.b32.xlu0 %v2289_v15, %s2180_s28 }
  0xde   : > { %v2293_v18 = vsel %vm575_vm3, %v570_v13, %v577_v16 }
  0xdf   : > { %760 = vrot.lane.b32.xlu1 %v2293_v18, %s2180_s28  ;;  %v718_v16 = vmul.f32 %v714_v56, %v2293_v18 }
  0xe1   : > { %582 = vrot.lane.b32.xlu0 %v2293_v18, %s2181_s29 }
  0xe3   : > { %580 = vrot.lane.b32.xlu1 %v2289_v15, %s2181_s29 }
  0xe5   : > { %730 = vrot.lane.b32.xlu0 %v2293_v18, %s2182_s30 }
  0xe7   : > { %728 = vrot.lane.b32.xlu1 %v2289_v15, %s2182_s30 }
 0x14f   : > { %v759_v21 = vpop.permute.xlu0 %758 }
 0x151   : > { %v761_v22 = vpop.permute.xlu1 %760 }
 0x152   : > { %v764_v23 = vsel %vm762_vm4, %v761_v22, %v759_v21  ;;  %v763_v24 = vsel %vm762_vm4, %v759_v21, %v761_v22  ;;  %v686_v21 = vrot.slane %v2003_v8, %v2349_v34  ;;  %v596_v22 = vld [vmem:[%s2717_s1] ss:$8 sm:$0x3] }
 0x153   : > { %821 = vrot.lane.b32.xlu0 %v764_v23, %s2182_s30  ;;  %819 = vrot.lane.b32.xlu1 %v763_v24, %s2182_s30  ;;  %v583_v26 = vpop.permute.xlu0 %582  ;;  %v809_v57 = vmul.f32 %v805_v43, %v764_v23  ;;  %v808_v63 = vmul.f32 %v801_v46, %v763_v24 }
 0x155   : > { %v581_v25 = vpop.permute.xlu1 %580 }
 0x156   : > { %v2323_v27 = vsel %vm586_vm5, %v583_v26, %v581_v25  ;;  %v2327_v28 = vsel %vm586_vm5, %v581_v25, %v583_v26  ;;  %v656_v25 = vrot.slane %v2001_v9, %v2349_v34  ;;  %v660_v26 = vrot.slane %v2001_v9, %v2351_v35 }
 0x157   : > { %767 = vrot.lane.b32.xlu0 %v764_v23, %s2183_s16  ;;  %765 = vrot.lane.b32.xlu1 %v763_v24, %s2183_s16  ;;  %v731_v36 = vpop.permute.xlu0 %730  ;;  %v690_v23 = vrot.slane %v2003_v8, %v2351_v35 }
 0x159   : > { %v729_v37 = vpop.permute.xlu1 %728 }
 0x15a   : > { %v733_v55 = vsel %vm647_vm7, %v731_v36, %v729_v37  ;;  %v732_v1 = vsel %vm647_vm7, %v729_v37, %v731_v36  ;;  %v601_v37 = vrot.slane %v596_v22, %v2349_v34 }
 0x15b   : > { %676 = vrot.lane.b32.xlu0 %v2293_v18, %s2183_s16  ;;  %674 = vrot.lane.b32.xlu1 %v2289_v15, %s2183_s16  ;;  %v748_v4 = vmul.f32 %v744_v47, %v733_v55  ;;  %v747_v17 = vmul.f32 %v740_v58, %v732_v1 }
 0x15d   : > { %v2127_v24 = vpack.c.bf16 %v748_v4, %v718_v16 }
 0x15f   : > { %643 = vrot.lane.b32.xlu1 %v2323_v27, %s2182_s30  ;;  %645 = vrot.lane.b32.xlu0 %v2327_v28, %s2182_s30 }
 0x163   : > { %589 = vrot.lane.b32.xlu1 %v2323_v27, %s2183_s16  ;;  %591 = vrot.lane.b32.xlu0 %v2327_v28, %s2183_s16 }
 0x167   : > { %869 = vperm.xlu0 %2165, %v861_v29   ;;  %864 = vperm.xlu1 %2166, %v860_v30   ;;  %v717_v30 = vmul.f32 %v710_v10, %v2289_v15 }
 0x16b   : > { %994 = vperm.xlu1 %2166, %v991_v31   ;;  %v625_v31 = vrot.slane %v1999_v19, %v2349_v34 }
 0x1c5   : > { %v820_v44 = vpop.permute.xlu1 %819  ;;  %v822_v45 = vpop.permute.xlu0 %821 }
 0x1c6   : > { %v823_v48 = vsel %vm647_vm7, %v820_v44, %v822_v45  ;;  %v824_v49 = vsel %vm647_vm7, %v822_v45, %v820_v44 }
 0x1c7   : > { %v838_v50 = vmul.f32 %v831_v40, %v823_v48  ;;  %v839_v53 = vmul.f32 %v835_v41, %v824_v49  ;;  %v2126_v40 = vpack.c.bf16 %v747_v17, %v717_v30  ;;  %v605_v41 = vrot.slane %v596_v22, %v2351_v35 }
 0x1c9   : > { %v766_v59 = vpop.permute.xlu1 %765  ;;  %v768_v60 = vpop.permute.xlu0 %767  ;;  %v2131_v61 = vpack.c.bf16 %v839_v53, %v839_v53  ;;  %v2130_v62 = vpack.c.bf16 %v838_v50, %v838_v50 }
 0x1ca   : > { %v769_v2 = vsel %vm593_vm6, %v766_v59, %v768_v60  ;;  %v770_v3 = vsel %vm593_vm6, %v768_v60, %v766_v59 }
 0x1cb   : > { %v784_v5 = vmul.f32 %v777_v51, %v770_v3  ;;  %v785_v6 = vmul.f32 %v781_v52, %v769_v2  ;;  %2026 = vmatprep.subr.msk.bf16.mxu1 %vm926_vm8, %v2131_v61  ;;  %v928_v7 = vsel %vm926_vm8, %v2130_v62, 0  ;;  %v632_v51 = vmul.f32 %v625_v31, %v2323_v27 }
 0x1cc   : > { %940 = vmatpush1.bf16.msra.mxu1 %v928_v7  ;;  %v633_v52 = vmul.f32 %v629_v32, %v2327_v28 }
 0x1cd   : > { %v675_v11 = vpop.permute.xlu1 %674  ;;  %v677_v12 = vpop.permute.xlu0 %676  ;;  %v2129_v13 = vpack.c.bf16 %v809_v57, %v785_v6  ;;  %v2128_v14 = vpack.c.bf16 %v808_v63, %v784_v5  ;;  %v2168_v57 = vld [vmem:[%s2720_s4] sm:$0xff]  }
 0x1ce   : > { %v678_v18 = vsel %vm593_vm6, %v675_v11, %v677_v12  ;;  %v679_v29 = vsel %vm593_vm6, %v677_v12, %v675_v11 }
 0x1cf   : > { %941 = vmatprep.subr.bf16.mxu1 %v2129_v13  ;;  %v693_v42 = vmul.f32 %v686_v21, %v679_v29  ;;  %v694_v15 = vmul.f32 %v690_v23, %v678_v18  ;;  %v988_v13 = vld [vmem:[%s2722_s6] sm:$0xf] }
 0x1d0   : > { %942 = vmatpush1.bf16.msra.mxu1 %v2128_v14 }
 0x1d1   : > { %v644_v33 = vpop.permute.xlu1 %643  ;;  %943 = vmatprep.subr.bf16.mxu1 %v2127_v24  ;;  %v646_v36 = vpop.permute.xlu0 %645 }
 0x1d2   : > { %v648_v38 = vsel %vm647_vm7, %v644_v33, %v646_v36  ;;  %v649_v39 = vsel %vm647_vm7, %v646_v36, %v644_v33 }
 0x1d3   : > { %v663_v43 = vmul.f32 %v656_v25, %v648_v38  ;;  %v664_v44 = vmul.f32 %v660_v26, %v649_v39  ;;  %v1314_v39 = vld [vmem:[%s2725_s9] sm:$0xff] }
 0x1d4   : > { %944 = vmatpush1.bf16.msra.mxu1 %v2126_v40  ;;  %v1315_v40 = vld [vmem:[%s2725_s9 + $0x8] sm:$0xff] }
 0x1d5   : > { %v590_v45 = vpop.permute.xlu1 %589  ;;  %v592_v46 = vpop.permute.xlu0 %591  ;;  %v2125_v47 = vpack.c.bf16 %v694_v15, %v664_v44  ;;  %v2124_v48 = vpack.c.bf16 %v693_v42, %v663_v43  ;;  %v2044_v42 = vld [vmem:[%s2717_s1 + $0x10] ss:$8 sm:$0x3]  ;;  %v2042_v44 = vld [vmem:[%s2717_s1 + $0x7] ss:$8 sm:$0x3] }
 0x1d6   : > { %v594_v49 = vsel %vm593_vm6, %v590_v45, %v592_v46  ;;  %v595_v50 = vsel %vm593_vm6, %v592_v46, %v590_v45  ;;  %v2038_v45 = vld [vmem:[%s2717_s1 + $0x5] ss:$8 sm:$0x3]  ;;  %v1285_v46 = vrot.slane %v2044_v42, %v2349_v34 }
 0x1d7   : > { %v608_v53 = vmul.f32 %v601_v37, %v595_v50  ;;  %v609_v54 = vmul.f32 %v605_v41, %v594_v49  ;;  %945 = vmatprep.subr.bf16.mxu1 %v2125_v47  ;;  %v1443_v41 = vld [vmem:[%s2727_s11] sm:$0xff]  ;;  %v1289_v47 = vrot.slane %v2044_v42, %v2351_v35  ;;  %v1260_v49 = vrot.slane %v2042_v44, %v2351_v35 }
 0x1d8   : > { %946 = vmatpush1.bf16.msra.mxu1 %v2124_v48  ;;  %v2040_v48 = vld [vmem:[%s2717_s1 + $0x6] ss:$8 sm:$0x3] }
 0x1d9   : > { %v2123_v55 = vpack.c.bf16 %v633_v52, %v609_v54  ;;  %v2122_v56 = vpack.c.bf16 %v632_v51, %v608_v53  ;;  %v1256_v52 = vrot.slane %v2042_v44, %v2349_v34  ;;  %v1202_v53 = vrot.slane %v2038_v45, %v2351_v35 }
 0x1db   : > { %947 = vmatprep.subr.bf16.mxu1 %v2123_v55 }
 0x1dc   : > { %948 = vmatpush1.bf16.msra.mxu1 %v2122_v56  ;;  %v2036_v56 = vld [vmem:[%s2717_s1 + $0x4] ss:$8 sm:$0x3] }
 0x1df   : > { %2027 = vmatmul.mubr.msk.bf16.vlgmr.msra.gmra.mxu1 %vm922_vm9, %v2168_v57 }
 0x1e0   : > { %1868 = vmatprep.mubr.bf16.mxu1 %v2179_v0 }
 0x1e2   : > { %v865_v58 = vpop.permute.xlu1 %864  ;;  %v870_v60 = vpop.permute.xlu0 %869 }
 0x1e6   : > { %v995_v14 = vpop.permute.xlu1 %994 }
 0x29f   : > { %v967_v27 = vpop.f32.mrf.mxu1 }
 0x2a0   : > { %v968_v61 = vadd.f32 %v967_v27, %v865_v58 }
 0x2a1   : > { %v969_v28 = vpop.f32.mrf.mxu1 }
 0x2a2   : > { %v970_v59 = vadd.f32 %v969_v28, %v865_v58  ;;  %v980_v5 = vmul.f32 0.1, %v968_v61  ;;  %vm976_vm12 = vcmp.gt.f32.partialorder %v968_v61, 0.0  ;;  %v1233_v58 = vrot.slane %v2040_v48, %v2349_v34 }
 0x2a3   : > { %v971_v62 = vpop.f32.mrf.mxu1  ;;  %v1237_v28 = vrot.slane %v2040_v48, %v2351_v35 }
 0x2a4   : > { %v972_v63 = vadd.f32 %v971_v62, %v870_v60  ;;  %v981_v2 = vmul.f32 0.1, %v970_v59  ;;  %vm977_vm11 = vcmp.gt.f32.partialorder %v970_v59, 0.0  ;;  %v984_v10 = vsel %vm976_vm12, %v968_v61, %v980_v5 }
 0x2a5   : > { %v973_v1 = vpop.f32.mrf.mxu1  ;;  %v1198_v62 = vrot.slane %v2038_v45, %v2349_v34 }
 0x2a6   : > { %vm978_vm10 = vcmp.gt.f32.partialorder %v972_v63, 0.0  ;;  %v982_v3 = vmul.f32 0.1, %v972_v63  ;;  %v974_v4 = vadd.f32 %v973_v1, %v870_v60  ;;  %v985_v8 = vsel %vm977_vm11, %v970_v59, %v981_v2 }
 0x2a7   : > { %v1173_v60 = vrot.slane %v2036_v56, %v2351_v35 }
 0x2a8   : > { %vm979_vm13 = vcmp.gt.f32.partialorder %v974_v4, 0.0  ;;  %v983_v6 = vmul.f32 0.1, %v974_v4  ;;  %v986_v7 = vsel %vm978_vm10, %v972_v63, %v982_v3 }
 0x2a9   : > { %v989_v12 = vpack.c.bf16 %v986_v7, %v984_v10 }
 0x2aa   : > { %v987_v9 = vsel %vm979_vm13, %v974_v4, %v983_v6 }
 0x2ab   : > { %v990_v11 = vpack.c.bf16 %v987_v9, %v985_v8 }
 0x2ad   : > { %1015 = vmatprep.subr.bf16.mxu0 %v990_v11 }
 0x2ae   : > { %1016 = vmatpush1.bf16.msra.mxu0 %v989_v12  ;;  %v2034_v12 = vld [vmem:[%s2717_s1 + $0x3] ss:$8 sm:$0x3] }
 0x2b1   : > { %2028 = vmatmul.mubr.msk.bf16.vlgmr.msra.gmra.mxu0 %vm997_vm14, %v988_v13  ;;  %v1169_v13 = vrot.slane %v2036_v56, %v2349_v34 }
 0x2b2   : > { %1417 = vmatprep.mubr.bf16.mxu0 %v2179_v0 }
 0x371   : > { %v1035_v16 = vpop.f32.mrf.mxu0 }
 0x372   : > { %v1036_v17 = vadd.f32 %v1035_v16, %v995_v14 }
 0x373   : > { %v1037_v19 = vpop.f32.mrf.mxu0 }
 0x374   : > { %vm1042_vm15 = vcmp.gt.f32.partialorder %v1036_v17, 0.0  ;;  %v1044_v21 = vmul.f32 0.1, %v1036_v17  ;;  %v1038_v22 = vadd.f32 %v1037_v19, %v995_v14  ;;  %v2032_v14 = vld [vmem:[%s2717_s1 + $0x2] ss:$8 sm:$0x3] }
 0x375   : > { %v1039_v23 = vpop.f32.mrf.mxu0 }
 0x376   : > { %v2437_v24 = vsel %vm1042_vm15, %v1036_v17, %v1044_v21  ;;  %vm1043_vm0 = vcmp.gt.f32.partialorder %v1038_v22, 0.0  ;;  %v1045_v25 = vmul.f32 0.1, %v1038_v22 }
 0x377   : > { %v1040_v26 = vpop.f32.mrf.mxu0  ;;  %1216 = vrot.lane.b32.xlu0 %v2437_v24, %s2180_s28 }
 0x378   : > { %v2441_v18 = vsel %vm1043_vm0, %v1038_v22, %v1045_v25  ;;  %v2030_v25 = vld [vmem:[%s2717_s1 + $0x1] ss:$8 sm:$0x3]  ;;  %v1146_v26 = vrot.slane %v2034_v12, %v2349_v34 }
 0x379   : > { %1218 = vrot.lane.b32.xlu1 %v2441_v18, %s2180_s28  ;;  %v1177_v22 = vmul.f32 %v1173_v60, %v2441_v18 }
 0x37b   : > { %1048 = vrot.lane.b32.xlu0 %v2437_v24, %s2181_s29 }
 0x37d   : > { %1050 = vrot.lane.b32.xlu1 %v2441_v18, %s2181_s29 }
 0x37f   : > { %1187 = vrot.lane.b32.xlu0 %v2437_v24, %s2182_s30 }
 0x381   : > { %1189 = vrot.lane.b32.xlu1 %v2441_v18, %s2182_s30 }
 0x3e9   : > { %v1217_v29 = vpop.permute.xlu0 %1216 }
 0x3eb   : > { %v1219_v30 = vpop.permute.xlu1 %1218 }
 0x3ec   : > { %v1221_v31 = vsel %vm762_vm4, %v1219_v30, %v1217_v29  ;;  %v1220_v32 = vsel %vm762_vm4, %v1217_v29, %v1219_v30  ;;  %v1060_v29 = vld [vmem:[%s2717_s1] ss:$8 sm:$0x3]  ;;  %v1150_v30 = vrot.slane %v2034_v12, %v2351_v35 }
 0x3ed   : > { %1276 = vrot.lane.b32.xlu1 %v1221_v31, %s2182_s30  ;;  %1274 = vrot.lane.b32.xlu0 %v1220_v32, %s2182_s30  ;;  %v1049_v36 = vpop.permute.xlu0 %1048  ;;  %v1264_v61 = vmul.f32 %v1260_v49, %v1221_v31  ;;  %v1263_v4 = vmul.f32 %v1256_v52, %v1220_v32 }
 0x3ef   : > { %v1051_v33 = vpop.permute.xlu1 %1050 }
 0x3f0   : > { %v2467_v37 = vsel %vm586_vm5, %v1051_v33, %v1049_v36  ;;  %v2471_v38 = vsel %vm586_vm5, %v1049_v36, %v1051_v33  ;;  %v1121_v33 = vrot.slane %v2032_v14, %v2351_v35 }
 0x3f1   : > { %1224 = vrot.lane.b32.xlu1 %v1221_v31, %s2183_s16  ;;  %1222 = vrot.lane.b32.xlu0 %v1220_v32, %s2183_s16  ;;  %v1188_v15 = vpop.permute.xlu0 %1187  ;;  %v1117_v32 = vrot.slane %v2032_v14, %v2349_v34 }
 0x3f3   : > { %v1190_v43 = vpop.permute.xlu1 %1189 }
 0x3f4   : > { %v1192_v59 = vsel %vm647_vm7, %v1190_v43, %v1188_v15  ;;  %v1191_v5 = vsel %vm647_vm7, %v1188_v15, %v1190_v43  ;;  %v1065_v43 = vrot.slane %v1060_v29, %v2349_v34 }
 0x3f5   : > { %1137 = vrot.lane.b32.xlu1 %v2441_v18, %s2183_s16  ;;  %1135 = vrot.lane.b32.xlu0 %v2437_v24, %s2183_s16  ;;  %v1206_v8 = vmul.f32 %v1202_v53, %v1192_v59  ;;  %v1205_v23 = vmul.f32 %v1198_v62, %v1191_v5  ;;  %v1176_v18 = vmul.f32 %v1169_v13, %v2437_v24 }
 0x3f7   : > { %v2137_v31 = vpack.c.bf16 %v1206_v8, %v1177_v22  ;;  %v2136_v44 = vpack.c.bf16 %v1205_v23, %v1176_v18 }
 0x3f9   : > { %1106 = vrot.lane.b32.xlu0 %v2467_v37, %s2182_s30  ;;  %1108 = vrot.lane.b32.xlu1 %v2471_v38, %s2182_s30 }
 0x3fd   : > { %1054 = vrot.lane.b32.xlu0 %v2467_v37, %s2183_s16  ;;  %1056 = vrot.lane.b32.xlu1 %v2471_v38, %s2183_s16 }
 0x401   : > { %1318 = vperm.xlu0 %2165, %v1314_v39   ;;  %1323 = vperm.xlu1 %2166, %v1315_v40   ;;  %v1088_v40 = vrot.slane %v2030_v25, %v2349_v34 }
 0x405   : > { %1446 = vperm.xlu0 %2165, %v1443_v41   ;;  %v1092_v41 = vrot.slane %v2030_v25, %v2351_v35 }
 0x45f   : > { %v1277_v50 = vpop.permute.xlu1 %1276  ;;  %v1275_v51 = vpop.permute.xlu0 %1274 }
 0x460   : > { %v1278_v54 = vsel %vm647_vm7, %v1275_v51, %v1277_v50  ;;  %v1279_v55 = vsel %vm647_vm7, %v1277_v50, %v1275_v51 }
 0x461   : > { %v1292_v57 = vmul.f32 %v1285_v46, %v1278_v54  ;;  %v1293_v27 = vmul.f32 %v1289_v47, %v1279_v55  ;;  %v1069_v46 = vrot.slane %v1060_v29, %v2351_v35 }
 0x463   : > { %v2140_v63 = vpack.c.bf16 %v1292_v57, %v1292_v57  ;;  %v2141_v1 = vpack.c.bf16 %v1293_v27, %v1293_v27  ;;  %v1225_v2 = vpop.permute.xlu1 %1224  ;;  %v1223_v3 = vpop.permute.xlu0 %1222  ;;  %v1095_v57 = vmul.f32 %v1088_v40, %v2467_v37  ;;  %v1096_v27 = vmul.f32 %v1092_v41, %v2471_v38 }
 0x464   : > { %v1226_v6 = vsel %vm593_vm6, %v1223_v3, %v1225_v2  ;;  %v1227_v7 = vsel %vm593_vm6, %v1225_v2, %v1223_v3 }
 0x465   : > { %v1240_v9 = vmul.f32 %v1233_v58, %v1227_v7  ;;  %v1241_v10 = vmul.f32 %v1237_v28, %v1226_v6  ;;  %2057 = vmatprep.subr.msk.bf16.mxu0 %vm926_vm8, %v2141_v1  ;;  %v1380_v11 = vsel %vm926_vm8, %v2140_v63, 0 }
 0x466   : > { %1392 = vmatpush1.bf16.msra.mxu0 %v1380_v11 }
 0x467   : > { %v2138_v16 = vpack.c.bf16 %v1263_v4, %v1240_v9  ;;  %v1138_v17 = vpop.permute.xlu1 %1137  ;;  %v1136_v19 = vpop.permute.xlu0 %1135  ;;  %v2139_v21 = vpack.c.bf16 %v1264_v61, %v1241_v10  ;;  %v2169_v61 = vld [vmem:[%s2724_s8] sm:$0xff]  }
 0x468   : > { %v1139_v36 = vsel %vm593_vm6, %v1136_v19, %v1138_v17  ;;  %v1140_v39 = vsel %vm593_vm6, %v1138_v17, %v1136_v19  ;;  %v1440_v17 = vld [vmem:[%s2726_s10] sm:$0xf] }
 0x469   : > { %1393 = vmatprep.subr.bf16.mxu0 %v2139_v21  ;;  %v1153_v47 = vmul.f32 %v1146_v26, %v1140_v39  ;;  %v1154_v48 = vmul.f32 %v1150_v30, %v1139_v36 }
 0x46a   : > { %1394 = vmatpush1.bf16.msra.mxu0 %v2138_v16 }
 0x46b   : > { %v1109_v42 = vpop.permute.xlu1 %1108  ;;  %1395 = vmatprep.subr.bf16.mxu0 %v2137_v31  ;;  %v1107_v15 = vpop.permute.xlu0 %1106 }
 0x46c   : > { %v1110_v24 = vsel %vm647_vm7, %v1107_v15, %v1109_v42  ;;  %v1111_v45 = vsel %vm647_vm7, %v1109_v42, %v1107_v15 }
 0x46d   : > { %v1124_v49 = vmul.f32 %v1117_v32, %v1110_v24  ;;  %v1125_v50 = vmul.f32 %v1121_v33, %v1111_v45  ;;  %v1766_v24 = vld [vmem:[%s2729_s13 + $0x8] sm:$0xff]  ;;  %v2075_v45 = vld [vmem:[%s2717_s1 + $0x10] ss:$8 sm:$0x3] }
 0x46e   : > { %1396 = vmatpush1.bf16.msra.mxu0 %v2136_v44  ;;  %v1765_v44 = vld [vmem:[%s2729_s13] sm:$0xff] }
 0x46f   : > { %v2134_v51 = vpack.c.bf16 %v1153_v47, %v1124_v49  ;;  %v1057_v52 = vpop.permute.xlu1 %1056  ;;  %v1055_v53 = vpop.permute.xlu0 %1054  ;;  %v2135_v54 = vpack.c.bf16 %v1154_v48, %v1125_v50  ;;  %v2073_v48 = vld [vmem:[%s2717_s1 + $0x7] ss:$8 sm:$0x3]  ;;  %v2069_v49 = vld [vmem:[%s2717_s1 + $0x5] ss:$8 sm:$0x3]  ;;  %v1736_v50 = vrot.slane %v2075_v45, %v2349_v34 }
 0x470   : > { %v1058_v55 = vsel %vm593_vm6, %v1055_v53, %v1057_v52  ;;  %v1059_v56 = vsel %vm593_vm6, %v1057_v52, %v1055_v53  ;;  %v2071_v52 = vld [vmem:[%s2717_s1 + $0x6] ss:$8 sm:$0x3]  ;;  %v1711_v53 = vrot.slane %v2073_v48, %v2351_v35 }
 0x471   : > { %v1072_v58 = vmul.f32 %v1065_v43, %v1059_v56  ;;  %v1073_v28 = vmul.f32 %v1069_v46, %v1058_v55  ;;  %1397 = vmatprep.subr.bf16.mxu0 %v2135_v54  ;;  %v1707_v56 = vrot.slane %v2073_v48, %v2349_v34 }
 0x472   : > { %1398 = vmatpush1.bf16.msra.mxu0 %v2134_v51  ;;  %v1740_v51 = vrot.slane %v2075_v45, %v2351_v35 }
 0x473   : > { %v2132_v59 = vpack.c.bf16 %v1095_v57, %v1072_v58  ;;  %v2133_v60 = vpack.c.bf16 %v1096_v27, %v1073_v28  ;;  %v1653_v57 = vrot.slane %v2069_v49, %v2351_v35  ;;  %v2067_v28 = vld [vmem:[%s2717_s1 + $0x4] ss:$8 sm:$0x3] }
 0x475   : > { %1399 = vmatprep.subr.bf16.mxu0 %v2133_v60 }
 0x476   : > { %1400 = vmatpush1.bf16.msra.mxu0 %v2132_v59 }
 0x479   : > { %2058 = vmatmul.mubr.msk.bf16.vlgmr.msra.gmra.mxu0 %vm922_vm9, %v2169_v61  ;;  %v1684_v61 = vrot.slane %v2071_v52, %v2349_v34 }
 0x47a   : > { %1484 = vmatprep.mubr.bf16.mxu0 %v2179_v0 }
 0x47c   : > { %v1319_v37 = vpop.permute.xlu0 %1318  ;;  %v1324_v1 = vpop.permute.xlu1 %1323 }
 0x480   : > { %v1447_v19 = vpop.permute.xlu0 %1446 }
 0x539   : > { %v1419_v62 = vpop.f32.mrf.mxu0 }
 0x53a   : > { %v1420_v2 = vadd.f32 %v1419_v62, %v1319_v37  ;;  %v1688_v62 = vrot.slane %v2071_v52, %v2351_v35 }
 0x53b   : > { %v1421_v63 = vpop.f32.mrf.mxu0 }
 0x53c   : > { %v1422_v38 = vadd.f32 %v1421_v63, %v1319_v37  ;;  %v1432_v9 = vmul.f32 0.1, %v1420_v2  ;;  %vm1428_vm3 = vcmp.gt.f32.partialorder %v1420_v2, 0.0  ;;  %v1624_v63 = vrot.slane %v2067_v28, %v2351_v35 }
 0x53d   : > { %v1423_v3 = vpop.f32.mrf.mxu0 }
 0x53e   : > { %v1424_v4 = vadd.f32 %v1423_v3, %v1324_v1  ;;  %v1433_v6 = vmul.f32 0.1, %v1422_v38  ;;  %vm1429_vm2 = vcmp.gt.f32.partialorder %v1422_v38, 0.0  ;;  %v1436_v13 = vsel %vm1428_vm3, %v1420_v2, %v1432_v9 }
 0x53f   : > { %v1425_v5 = vpop.f32.mrf.mxu0 }
 0x540   : > { %vm1430_vm1 = vcmp.gt.f32.partialorder %v1424_v4, 0.0  ;;  %v1434_v7 = vmul.f32 0.1, %v1424_v4  ;;  %v1426_v8 = vadd.f32 %v1425_v5, %v1324_v1  ;;  %v1437_v11 = vsel %vm1429_vm2, %v1422_v38, %v1433_v6 }
 0x541   : > { %v1649_v1 = vrot.slane %v2069_v49, %v2349_v34 }
 0x542   : > { %vm1431_vm10 = vcmp.gt.f32.partialorder %v1426_v8, 0.0  ;;  %v1435_v10 = vmul.f32 0.1, %v1426_v8  ;;  %v1438_v0 = vsel %vm1430_vm1, %v1424_v4, %v1434_v7 }
 0x543   : > { %v1441_v16 = vpack.c.bf16 %v1438_v0, %v1436_v13  ;;  %v2065_v13 = vld [vmem:[%s2717_s1 + $0x3] ss:$8 sm:$0x3] }
 0x544   : > { %v1439_v12 = vsel %vm1431_vm10, %v1426_v8, %v1435_v10 }
 0x545   : > { %v1442_v14 = vpack.c.bf16 %v1439_v12, %v1437_v11 }
 0x547   : > { %1466 = vmatprep.subr.bf16.mxu0 %v1442_v14  ;;  %v1620_v14 = vrot.slane %v2067_v28, %v2349_v34 }
 0x548   : > { %1467 = vmatpush1.bf16.msra.mxu0 %v1441_v16  ;;  %v2063_v16 = vld [vmem:[%s2717_s1 + $0x2] ss:$8 sm:$0x3] }
 0x54b   : > { %2059 = vmatmul.mubr.msk.bf16.vlgmr.msra.gmra.mxu0 %vm997_vm14, %v1440_v17 }
 0x60b   : > { %v1486_v21 = vpop.f32.mrf.mxu0 }
 0x60c   : > { %v1487_v22 = vadd.f32 %v1486_v21, %v1447_v19 }
 0x60d   : > { %v1488_v23 = vpop.f32.mrf.mxu0 }
 0x60e   : > { %vm1493_vm11 = vcmp.gt.f32.partialorder %v1487_v22, 0.0  ;;  %v1495_v25 = vmul.f32 0.1, %v1487_v22  ;;  %v1489_v26 = vadd.f32 %v1488_v23, %v1447_v19 }
 0x60f   : > { %v1490_v29 = vpop.f32.mrf.mxu0 }
 0x610   : > { %v2578_v30 = vsel %vm1493_vm11, %v1487_v22, %v1495_v25  ;;  %vm1494_vm12 = vcmp.gt.f32.partialorder %v1489_v26, 0.0  ;;  %v1496_v31 = vmul.f32 0.1, %v1489_v26  ;;  %v1597_v29 = vrot.slane %v2065_v13, %v2349_v34 }
 0x611   : > { %1891 = vst [vmem:[%s502_s24] sm:$0xff] %v2578_v30  ;;  %v1491_v32 = vpop.f32.mrf.mxu0  ;;  %1667 = vrot.lane.b32.xlu1 %v2578_v30, %s2180_s28 }
 0x612   : > { %v2583_v33 = vsel %vm1494_vm12, %v1489_v26, %v1496_v31  ;;  %v2061_v26 = vld [vmem:[%s2717_s1 + $0x1] ss:$8 sm:$0x3]  ;;  %v1511_v31 = vld [vmem:[%s2717_s1] ss:$8 sm:$0x3]  ;;  %v1601_v32 = vrot.slane %v2065_v13, %v2351_v35 }
 0x613   : > { %1892 = vst [vmem:[%s502_s24 + $0x8] sm:$0xff] %v2583_v33  ;;  %1669 = vrot.lane.b32.xlu0 %v2583_v33, %s2180_s28  ;;  %v1628_v23 = vmul.f32 %v1624_v63, %v2583_v33  ;;  %v1520_v49 = vrot.slane %v1511_v31, %v2351_v35 }
 0x615   : > { %1499 = vrot.lane.b32.xlu1 %v2578_v30, %s2181_s29 }
 0x617   : > { %1501 = vrot.lane.b32.xlu0 %v2583_v33, %s2181_s29  ;;  %s507_s29 = scalar_lea.vmem %s2731_s15, %s2094_s23 }
 0x619   : > { %1638 = vrot.lane.b32.xlu1 %v2578_v30, %s2182_s30 }
 0x61b   : > { %1640 = vrot.lane.b32.xlu0 %v2583_v33, %s2182_s30 }
 0x683   : > { %v1668_v18 = vpop.permute.xlu1 %1667 }
 0x685   : > { %v1670_v36 = vpop.permute.xlu0 %1669 }
 0x686   : > { %v1672_v39 = vsel %vm762_vm4, %v1670_v36, %v1668_v18  ;;  %v1671_v40 = vsel %vm762_vm4, %v1668_v18, %v1670_v36  ;;  %v1568_v36 = vrot.slane %v2063_v16, %v2349_v34 }
 0x687   : > { %1727 = vrot.lane.b32.xlu0 %v1672_v39, %s2182_s30  ;;  %1725 = vrot.lane.b32.xlu1 %v1671_v40, %s2182_s30  ;;  %v1500_v42 = vpop.permute.xlu1 %1499  ;;  %v1715_v38 = vmul.f32 %v1711_v53, %v1672_v39  ;;  %v1714_v6 = vmul.f32 %v1707_v56, %v1671_v40 }
 0x689   : > { %v1502_v41 = vpop.permute.xlu0 %1501 }
 0x68a   : > { %v2610_v15 = vsel %vm586_vm5, %v1502_v41, %v1500_v42  ;;  %v2614_v43 = vsel %vm586_vm5, %v1500_v42, %v1502_v41  ;;  %v1539_v42 = vrot.slane %v2061_v26, %v2349_v34 }
 0x68b   : > { %1675 = vrot.lane.b32.xlu0 %v1672_v39, %s2183_s16  ;;  %1673 = vrot.lane.b32.xlu1 %v1671_v40, %s2183_s16  ;;  %v1639_v46 = vpop.permute.xlu1 %1638  ;;  %v1572_v39 = vrot.slane %v2063_v16, %v2351_v35 }
 0x68d   : > { %v1641_v47 = vpop.permute.xlu0 %1640 }
 0x68e   : > { %v1643_v37 = vsel %vm647_vm7, %v1641_v47, %v1639_v46  ;;  %v1642_v7 = vsel %vm647_vm7, %v1639_v46, %v1641_v47  ;;  %v1516_v46 = vrot.slane %v1511_v31, %v2349_v34 }
 0x68f   : > { %1588 = vrot.lane.b32.xlu0 %v2583_v33, %s2183_s16  ;;  %1586 = vrot.lane.b32.xlu1 %v2578_v30, %s2183_s16  ;;  %v1657_v10 = vmul.f32 %v1653_v57, %v1643_v37  ;;  %v1656_v25 = vmul.f32 %v1649_v1, %v1642_v7  ;;  %v1627_v33 = vmul.f32 %v1620_v14, %v2578_v30 }
 0x691   : > { %v2147_v18 = vpack.c.bf16 %v1657_v10, %v1628_v23  ;;  %v2146_v47 = vpack.c.bf16 %v1656_v25, %v1627_v33 }
 0x693   : > { %1557 = vrot.lane.b32.xlu1 %v2610_v15, %s2182_s30  ;;  %1559 = vrot.lane.b32.xlu0 %v2614_v43, %s2182_s30 }
 0x697   : > { %1505 = vrot.lane.b32.xlu1 %v2610_v15, %s2183_s16  ;;  %1507 = vrot.lane.b32.xlu0 %v2614_v43, %s2183_s16 }
 0x69b   : > { %1769 = vperm.xlu1 %2166, %v1765_v44   ;;  %1774 = vperm.xlu0 %2165, %v1766_v24   ;;  %v1543_v44 = vrot.slane %v2061_v26, %v2351_v35 }
 0x69d   : > { %v1547_v35 = vmul.f32 %v1543_v44, %v2614_v43 }
 0x6f9   : > { %v1728_v54 = vpop.permute.xlu0 %1727  ;;  %v1726_v55 = vpop.permute.xlu1 %1725 }
 0x6fa   : > { %v1729_v27 = vsel %vm647_vm7, %v1726_v55, %v1728_v54  ;;  %v1730_v58 = vsel %vm647_vm7, %v1728_v54, %v1726_v55 }
 0x6fb   : > { %v1743_v59 = vmul.f32 %v1736_v50, %v1729_v27  ;;  %v1744_v60 = vmul.f32 %v1740_v51, %v1730_v58  ;;  %v1546_v58 = vmul.f32 %v1539_v42, %v2610_v15 }
 0x6fd   : > { %v2150_v2 = vpack.c.bf16 %v1743_v59, %v1743_v59  ;;  %v2151_v3 = vpack.c.bf16 %v1744_v60, %v1744_v60  ;;  %v1676_v4 = vpop.permute.xlu0 %1675  ;;  %v1674_v5 = vpop.permute.xlu1 %1673 }
 0x6fe   : > { %v1677_v8 = vsel %vm593_vm6, %v1674_v5, %v1676_v4  ;;  %v1678_v9 = vsel %vm593_vm6, %v1676_v4, %v1674_v5 }
 0x6ff   : > { %v1691_v0 = vmul.f32 %v1684_v61, %v1678_v9  ;;  %v1692_v11 = vmul.f32 %v1688_v62, %v1677_v8  ;;  %2088 = vmatprep.subr.msk.bf16.mxu1 %vm926_vm8, %v2151_v3  ;;  %v1831_v12 = vsel %vm926_vm8, %v2150_v2, 0  ;;  %v2170_v62 = vld [vmem:[%s2728_s12] sm:$0xff]  }
 0x700   : > { %1843 = vmatpush1.bf16.msra.mxu1 %v1831_v12 }
 0x701   : > { %v2148_v17 = vpack.c.bf16 %v1714_v6, %v1691_v0  ;;  %v1589_v19 = vpop.permute.xlu0 %1588  ;;  %v1587_v21 = vpop.permute.xlu1 %1586  ;;  %v2149_v22 = vpack.c.bf16 %v1715_v38, %v1692_v11 }
 0x702   : > { %v1590_v40 = vsel %vm593_vm6, %v1587_v21, %v1589_v19  ;;  %v1591_v41 = vsel %vm593_vm6, %v1589_v19, %v1587_v21 }
 0x703   : > { %1844 = vmatprep.subr.bf16.mxu1 %v2149_v22  ;;  %v1604_v50 = vmul.f32 %v1597_v29, %v1591_v41  ;;  %v1605_v51 = vmul.f32 %v1601_v32, %v1590_v40 }
 0x704   : > { %1845 = vmatpush1.bf16.msra.mxu1 %v2148_v17 }
 0x705   : > { %v1560_v24 = vpop.permute.xlu0 %1559  ;;  %1846 = vmatprep.subr.bf16.mxu1 %v2147_v18  ;;  %v1558_v45 = vpop.permute.xlu1 %1557 }
 0x706   : > { %v1561_v30 = vsel %vm647_vm7, %v1558_v45, %v1560_v24  ;;  %v1562_v48 = vsel %vm647_vm7, %v1560_v24, %v1558_v45 }
 0x707   : > { %v1575_v52 = vmul.f32 %v1568_v36, %v1561_v30  ;;  %v1576_v53 = vmul.f32 %v1572_v39, %v1562_v48 }
 0x708   : > { %1847 = vmatpush1.bf16.msra.mxu1 %v2146_v47 }
 0x709   : > { %v2144_v54 = vpack.c.bf16 %v1604_v50, %v1575_v52  ;;  %v1508_v55 = vpop.permute.xlu0 %1507  ;;  %v1506_v56 = vpop.permute.xlu1 %1505  ;;  %v2145_v57 = vpack.c.bf16 %v1605_v51, %v1576_v53 }
 0x70a   : > { %v1509_v34 = vsel %vm593_vm6, %v1506_v56, %v1508_v55  ;;  %v1510_v27 = vsel %vm593_vm6, %v1508_v55, %v1506_v56 }
 0x70b   : > { %v1523_v28 = vmul.f32 %v1516_v46, %v1510_v27  ;;  %v1524_v59 = vmul.f32 %v1520_v49, %v1509_v34  ;;  %1848 = vmatprep.subr.bf16.mxu1 %v2145_v57 }
 0x70c   : > { %1849 = vmatpush1.bf16.msra.mxu1 %v2144_v54 }
 0x70d   : > { %v2142_v60 = vpack.c.bf16 %v1546_v58, %v1523_v28  ;;  %v2143_v61 = vpack.c.bf16 %v1547_v35, %v1524_v59 }
 0x70f   : > { %1850 = vmatprep.subr.bf16.mxu1 %v2143_v61 }
 0x710   : > { %1851 = vmatpush1.bf16.msra.mxu1 %v2142_v60 }
 0x713   : > { %2089 = vmatmul.mubr.msk.bf16.vlgmr.msra.gmra.mxu1 %vm922_vm9, %v2170_v62 }
 0x716   : > { %v1770_v20 = vpop.permute.xlu1 %1769  ;;  %v1775_v1 = vpop.permute.xlu0 %1774 }
 0x7d3   : > { %v1870_v37 = vpop.f32.mrf.mxu1 }
 0x7d4   : > { %v1871_v15 = vadd.f32 %v1870_v37, %v1770_v20 }
 0x7d5   : > { %v1872_v63 = vpop.f32.mrf.mxu1 }
 0x7d6   : > { %vm1879_vm4 = vcmp.gt.f32.partialorder %v1871_v15, 0.0  ;;  %v1883_v43 = vmul.f32 0.1, %v1871_v15  ;;  %v1873_v38 = vadd.f32 %v1872_v63, %v1770_v20 }
 0x7d7   : > { %v1874_v2 = vpop.f32.mrf.mxu1 }
 0x7d8   : > { %v1887_v3 = vsel %vm1879_vm4, %v1871_v15, %v1883_v43  ;;  %vm1880_vm5 = vcmp.gt.f32.partialorder %v1873_v38, 0.0  ;;  %v1884_v4 = vmul.f32 0.1, %v1873_v38  ;;  %v1875_v5 = vadd.f32 %v1874_v2, %v1775_v1 }
 0x7d9   : > { %1893 = vst [vmem:[%s507_s29] sm:$0xff] %v1887_v3  ;;  %v1876_v6 = vpop.f32.mrf.mxu1 }
 0x7da   : > { %v1888_v7 = vsel %vm1880_vm5, %v1873_v38, %v1884_v4  ;;  %vm1881_vm6 = vcmp.gt.f32.partialorder %v1875_v5, 0.0  ;;  %v1885_v8 = vmul.f32 0.1, %v1875_v5  ;;  %v1877_v9 = vadd.f32 %v1876_v6, %v1775_v1 }
 0x7db   : > { %1894 = vst [vmem:[%s507_s29 + $0x8] sm:$0xff] %v1888_v7 }
 0x7dc   : > { %v1889_v10 = vsel %vm1881_vm6, %v1875_v5, %v1885_v8  ;;  %vm1882_vm7 = vcmp.gt.f32.partialorder %v1877_v9, 0.0  ;;  %v1886_v0 = vmul.f32 0.1, %v1877_v9 }
 0x7dd   : > { %1895 = vst [vmem:[%s507_s29 + $0x10] sm:$0xff] %v1889_v10 }
 0x7de   : > { %v1890_v11 = vsel %vm1882_vm7, %v1877_v9, %v1886_v0 }
 0x7df   : > { %1896 = vst [vmem:[%s507_s29 + $0x18] sm:$0xff] %v1890_v11 }
 0x7e0 PF: > { %s26_s18 = sadd.s32 1, %s2177_s18  }
 0x7e1   : > { %p23_p4 = scmp.ge.s32.totalorder %s26_s18, 4  }
 0x7e3   :  { %25 = sbr.rel (!%p23_p4) target bundleno = 1 (0x1), region = 126 }

// kernel: yolo_block_forward.1
= control target key start
LH: loop header
LB: loop body
LE: loop exit
PB: predicated region body
PF: predicated region fallthrough
CT: control target
= control target key end

     0   :  { %s2264_s18 = smov 0   ;;  %s2716_s0 = inlined_call_operand.vmem [shape: f32[2,4,256], index: 0, kind: input, shape index: {}]   ;;  %s2717_s1 = inlined_call_operand.vmem [shape: f32[9,256], index: 1, kind: input, shape index: {}]   ;;  %s2718_s2 = inlined_call_operand.vmem [shape: bf16[8,4], index: 2, kind: input, shape index: {}]   ;;  %s2719_s3 = inlined_call_operand.vmem [shape: f32[8,1], index: 3, kind: input, shape index: {}]   ;;  %s2720_s4 = inlined_call_operand.vmem [shape: bf16[16,72], index: 4, kind: input, shape index: {}]   ;;  %s2721_s5 = inlined_call_operand.vmem [shape: f32[16,1], index: 5, kind: input, shape index: {}]   ;;  %s2722_s6 = inlined_call_operand.vmem [shape: bf16[8,16], index: 6, kind: input, shape index: {}]   ;;  %s2723_s7 = inlined_call_operand.vmem [shape: f32[8,1], index: 7, kind: input, shape index: {}]   ;;  %s2724_s8 = inlined_call_operand.vmem [shape: bf16[16,72], index: 8, kind: input, shape index: {}]   ;;  %s2725_s9 = inlined_call_operand.vmem [shape: f32[16,1], index: 9, kind: input, shape index: {}]   ;;  %s2726_s10 = inlined_call_operand.vmem [shape: bf16[8,16], index: 10, kind: input, shape index: {}]   ;;  %s2727_s11 = inlined_call_operand.vmem [shape: f32[8,1], index: 11, kind: input, shape index: {}]   ;;  %s2728_s12 = inlined_call_operand.vmem [shape: bf16[16,72], index: 12, kind: input, shape index: {}]   ;;  %s2729_s13 = inlined_call_operand.vmem [shape: f32[16,1], index: 13, kind: input, shape index: {}]   ;;  %s2730_s14 = inlined_call_operand.vmem [shape: f32[2,8,256], index: 14, kind: output, shape index: {0}]   ;;  %s2731_s15 = inlined_call_operand.vmem [shape: f32[2,16,256], index: 15, kind: output, shape index: {1}]  }
   0x1 LB: > { %s1985_s19 = sadd.s32 4294967295, %s2177_s18   ;;  %p1989_p0 = scmp.ge.s32.totalorder %s2177_s18, 1  ;;  %s2177_s18 = sphi %s2264_s18, %s26_s18  }
   0x2   : > { %p440_p1 = scmp.lt.s32.totalorder %s2177_s18, 3 }
   0x4   : > { %p441_p2 = pnand %p1989_p0, %p440_p1 }
   0x5   : > { %p493_p3 = scmp.lt.s32.totalorder (!%p441_p2), %s1985_s19, 1  ;;  %s2180_s28 = smov (!%p441_p2), 112  }
   0x6   : > { %444 = sbr.rel (%p441_p2) target bundleno = 2016 (0x7e0), region = 76  ;;  %s2181_s29 = smov (!%p441_p2), 16  }
   0x7   : > { %s2182_s30 = smov (!%p441_p2), 127   ;;  %s2183_s16 = smov (!%p441_p2), 1  }
   0xb   : > { %v2179_v0 = vmov 0   ;;  %v516_v1 = vld [vmem:[%s2719_s3] sm:$0xff]  ;;  %s2733_s19 = smov (!%p493_p3, %s1985_s19), 1  ;;  %vm526_vm0 = vcmask 1041408   ;;  %vm522_vm1 = vcmask 31744   ;;  %v584_v19 = vlaneseq  ;;  %v861_v29 = vld [vmem:[%s2721_s5 + $0x8] sm:$0xff] }
   0xc   : > { %565 = vmatprep.mubr.bf16.mxu0 %v2179_v0  ;;  %2165 = vset.pattern.permute.xlu0 %v2179_v0  ;;  %s2092_s22 = sshll.u32 %s2733_s19, 3  ;;  %v510_v7 = vld [vmem:[%s2718_s2] sm:$0xf]  ;;  %v2013_v33 = vld [vmem:[%s2717_s1 + $0x10] ss:$8 sm:$0x3] }
   0xd   : > { %519 = vperm.xlu0 %2165, %v516_v1   ;;  %965 = vmatprep.mubr.bf16.mxu1 %v2179_v0  ;;  %s497_s25 = scalar_lea.vmem %s2716_s0, %s2092_s22  ;;  %v2305_v20 = vand.u32 127, %v584_v19  ;;  %v860_v30 = vld [vmem:[%s2721_s5] sm:$0xff]  ;;  %v599_v32 = vshrl.u32 %v584_v19, 7  ;;  %vm926_vm8 = vcmask 1043456   ;;  %vm922_vm9 = vcmask 588800   ;;  %s2093_s21 = sshll.u32 %s2733_s19, 4 }
   0xe   : > { %2166 = vset.pattern.permute.xlu1 %v2179_v0  ;;  %v509_v2 = vld [vmem:[%s497_s25] sm:$0xff]  ;;  %vm997_vm14 = vcmask 130048   ;;  %s502_s24 = scalar_lea.vmem %s2730_s14, %s2093_s21  ;;  %s2094_s23 = sshll.u32 %s2733_s19, 5 }
   0xf   : > { %v512_v3 = vcombine.high %v509_v2, %v509_v2  ;;  %v514_v4 = vpack.c.bf16 %v509_v2, %v509_v2  ;;  %vm762_vm4 = vcmp.lt.s32.totalorder %v2305_v20, 112  ;;  %vm586_vm5 = vcmp.lt.s32.totalorder %v2305_v20, 16  ;;  %v991_v31 = vld [vmem:[%s2723_s7] sm:$0xff] }
  0x10   : > { %v2349_v34 = vsub.s32 0, %v599_v32  ;;  %v2351_v35 = vsub.s32 1, %v599_v32  ;;  %v2011_v38 = vld [vmem:[%s2717_s1 + $0x7] ss:$8 sm:$0x3]  ;;  %vm593_vm6 = vcmp.lt.s32.totalorder %v2305_v20, 1 }
  0x11   : > { %v515_v5 = vpack.c.bf16 %v512_v3, %v512_v3  ;;  %v528_v6 = vsel %vm526_vm0, %v514_v4, 0  ;;  %v2007_v39 = vld [vmem:[%s2717_s1 + $0x5] ss:$8 sm:$0x3]  ;;  %vm647_vm7 = vcmp.lt.s32.totalorder %v2305_v20, 127 }
  0x12   : > { %v831_v40 = vrot.slane %v2013_v33, %v2349_v34  ;;  %v835_v41 = vrot.slane %v2013_v33, %v2351_v35  ;;  %v2009_v42 = vld [vmem:[%s2717_s1 + $0x6] ss:$8 sm:$0x3]  ;;  %v805_v43 = vrot.slane %v2011_v38, %v2351_v35  ;;  %v801_v46 = vrot.slane %v2011_v38, %v2349_v34  ;;  %v2005_v54 = vld [vmem:[%s2717_s1 + $0x4] ss:$8 sm:$0x3] }
  0x13   : > { %1996 = vmatprep.subr.msk.bf16.mxu0 %vm526_vm0, %v515_v5  ;;  %v744_v47 = vrot.slane %v2007_v39, %v2351_v35  ;;  %v777_v51 = vrot.slane %v2009_v42, %v2349_v34  ;;  %v781_v52 = vrot.slane %v2009_v42, %v2351_v35  ;;  %v714_v56 = vrot.slane %v2005_v54, %v2351_v35  ;;  %v1999_v19 = vld [vmem:[%s2717_s1 + $0x1] ss:$8 sm:$0x3] }
  0x14   : > { %548 = vmatpush1.bf16.msra.mxu0 %v528_v6  ;;  %v740_v58 = vrot.slane %v2007_v39, %v2349_v34  ;;  %v629_v32 = vrot.slane %v1999_v19, %v2351_v35 }
  0x17   : > { %1997 = vmatmul.mubr.msk.bf16.vlgmr.msra.gmra.mxu0 %vm522_vm1, %v510_v7 }
  0x18   : > { %1033 = vmatprep.mubr.bf16.mxu0 %v2179_v0 }
  0x88   : > { %v520_v8 = vpop.permute.xlu0 %519 }
  0xd7   : > { %v567_v9 = vpop.f32.mrf.mxu0 }
  0xd8   : > { %v568_v10 = vadd.f32 %v567_v9, %v520_v8  ;;  %v2001_v9 = vld [vmem:[%s2717_s1 + $0x2] ss:$8 sm:$0x3] }
  0xd9   : > { %v569_v11 = vpop.f32.mrf.mxu0 }
  0xda   : > { %vm574_vm2 = vcmp.gt.f32.partialorder %v568_v10, 0.0  ;;  %v576_v12 = vmul.f32 0.1, %v568_v10  ;;  %v570_v13 = vadd.f32 %v569_v11, %v520_v8  ;;  %v2003_v8 = vld [vmem:[%s2717_s1 + $0x3] ss:$8 sm:$0x3] }
  0xdb   : > { %v571_v14 = vpop.f32.mrf.mxu0 }
  0xdc   : > { %v2289_v15 = vsel %vm574_vm2, %v568_v10, %v576_v12  ;;  %vm575_vm3 = vcmp.gt.f32.partialorder %v570_v13, 0.0  ;;  %v577_v16 = vmul.f32 0.1, %v570_v13  ;;  %v710_v10 = vrot.slane %v2005_v54, %v2349_v34 }
  0xdd   : > { %v572_v17 = vpop.f32.mrf.mxu0  ;;  %758 = vrot.lane.b32.xlu0 %v2289_v15, %s2180_s28 }
  0xde   : > { %v2293_v18 = vsel %vm575_vm3, %v570_v13, %v577_v16 }
  0xdf   : > { %760 = vrot.lane.b32.xlu1 %v2293_v18, %s2180_s28  ;;  %v718_v16 = vmul.f32 %v714_v56, %v2293_v18 }
  0xe1   : > { %582 = vrot.lane.b32.xlu0 %v2293_v18, %s2181_s29 }
  0xe3   : > { %580 = vrot.lane.b32.xlu1 %v2289_v15, %s2181_s29 }
  0xe5   : > { %730 = vrot.lane.b32.xlu0 %v2293_v18, %s2182_s30 }
  0xe7   : > { %728 = vrot.lane.b32.xlu1 %v2289_v15, %s2182_s30 }
 0x14f   : > { %v759_v21 = vpop.permute.xlu0 %758 }
 0x151   : > { %v761_v22 = vpop.permute.xlu1 %760 }
 0x152   : > { %v764_v23 = vsel %vm762_vm4, %v761_v22, %v759_v21  ;;  %v763_v24 = vsel %vm762_vm4, %v759_v21, %v761_v22  ;;  %v686_v21 = vrot.slane %v2003_v8, %v2349_v34  ;;  %v596_v22 = vld [vmem:[%s2717_s1] ss:$8 sm:$0x3] }
 0x153   : > { %821 = vrot.lane.b32.xlu0 %v764_v23, %s2182_s30  ;;  %819 = vrot.lane.b32.xlu1 %v763_v24, %s2182_s30  ;;  %v583_v26 = vpop.permute.xlu0 %582  ;;  %v809_v57 = vmul.f32 %v805_v43, %v764_v23  ;;  %v808_v63 = vmul.f32 %v801_v46, %v763_v24 }
 0x155   : > { %v581_v25 = vpop.permute.xlu1 %580 }
 0x156   : > { %v2323_v27 = vsel %vm586_vm5, %v583_v26, %v581_v25  ;;  %v2327_v28 = vsel %vm586_vm5, %v581_v25, %v583_v26  ;;  %v656_v25 = vrot.slane %v2001_v9, %v2349_v34  ;;  %v660_v26 = vrot.slane %v2001_v9, %v2351_v35 }
 0x157   : > { %767 = vrot.lane.b32.xlu0 %v764_v23, %s2183_s16  ;;  %765 = vrot.lane.b32.xlu1 %v763_v24, %s2183_s16  ;;  %v731_v36 = vpop.permute.xlu0 %730  ;;  %v690_v23 = vrot.slane %v2003_v8, %v2351_v35 }
 0x159   : > { %v729_v37 = vpop.permute.xlu1 %728 }
 0x15a   : > { %v733_v55 = vsel %vm647_vm7, %v731_v36, %v729_v37  ;;  %v732_v1 = vsel %vm647_vm7, %v729_v37, %v731_v36  ;;  %v601_v37 = vrot.slane %v596_v22, %v2349_v34 }
 0x15b   : > { %676 = vrot.lane.b32.xlu0 %v2293_v18, %s2183_s16  ;;  %674 = vrot.lane.b32.xlu1 %v2289_v15, %s2183_s16  ;;  %v748_v4 = vmul.f32 %v744_v47, %v733_v55  ;;  %v747_v17 = vmul.f32 %v740_v58, %v732_v1 }
 0x15d   : > { %v2127_v24 = vpack.c.bf16 %v748_v4, %v718_v16 }
 0x15f   : > { %643 = vrot.lane.b32.xlu1 %v2323_v27, %s2182_s30  ;;  %645 = vrot.lane.b32.xlu0 %v2327_v28, %s2182_s30 }
 0x163   : > { %589 = vrot.lane.b32.xlu1 %v2323_v27, %s2183_s16  ;;  %591 = vrot.lane.b32.xlu0 %v2327_v28, %s2183_s16 }
 0x167   : > { %869 = vperm.xlu0 %2165, %v861_v29   ;;  %864 = vperm.xlu1 %2166, %v860_v30   ;;  %v717_v30 = vmul.f32 %v710_v10, %v2289_v15 }
 0x16b   : > { %994 = vperm.xlu1 %2166, %v991_v31   ;;  %v625_v31 = vrot.slane %v1999_v19, %v2349_v34 }
 0x1c5   : > { %v820_v44 = vpop.permute.xlu1 %819  ;;  %v822_v45 = vpop.permute.xlu0 %821 }
 0x1c6   : > { %v823_v48 = vsel %vm647_vm7, %v820_v44, %v822_v45  ;;  %v824_v49 = vsel %vm647_vm7, %v822_v45, %v820_v44 }
 0x1c7   : > { %v838_v50 = vmul.f32 %v831_v40, %v823_v48  ;;  %v839_v53 = vmul.f32 %v835_v41, %v824_v49  ;;  %v2126_v40 = vpack.c.bf16 %v747_v17, %v717_v30  ;;  %v605_v41 = vrot.slane %v596_v22, %v2351_v35 }
 0x1c9   : > { %v766_v59 = vpop.permute.xlu1 %765  ;;  %v768_v60 = vpop.permute.xlu0 %767  ;;  %v2131_v61 = vpack.c.bf16 %v839_v53, %v839_v53  ;;  %v2130_v62 = vpack.c.bf16 %v838_v50, %v838_v50 }
 0x1ca   : > { %v769_v2 = vsel %vm593_vm6, %v766_v59, %v768_v60  ;;  %v770_v3 = vsel %vm593_vm6, %v768_v60, %v766_v59 }
 0x1cb   : > { %v784_v5 = vmul.f32 %v777_v51, %v770_v3  ;;  %v785_v6 = vmul.f32 %v781_v52, %v769_v2  ;;  %2026 = vmatprep.subr.msk.bf16.mxu1 %vm926_vm8, %v2131_v61  ;;  %v928_v7 = vsel %vm926_vm8, %v2130_v62, 0  ;;  %v632_v51 = vmul.f32 %v625_v31, %v2323_v27 }
 0x1cc   : > { %940 = vmatpush1.bf16.msra.mxu1 %v928_v7  ;;  %v633_v52 = vmul.f32 %v629_v32, %v2327_v28 }
 0x1cd   : > { %v675_v11 = vpop.permute.xlu1 %674  ;;  %v677_v12 = vpop.permute.xlu0 %676  ;;  %v2129_v13 = vpack.c.bf16 %v809_v57, %v785_v6  ;;  %v2128_v14 = vpack.c.bf16 %v808_v63, %v784_v5  ;;  %v2168_v57 = vld [vmem:[%s2720_s4] sm:$0xff]  }
 0x1ce   : > { %v678_v18 = vsel %vm593_vm6, %v675_v11, %v677_v12  ;;  %v679_v29 = vsel %vm593_vm6, %v677_v12, %v675_v11 }
 0x1cf   : > { %941 = vmatprep.subr.bf16.mxu1 %v2129_v13  ;;  %v693_v42 = vmul.f32 %v686_v21, %v679_v29  ;;  %v694_v15 = vmul.f32 %v690_v23, %v678_v18  ;;  %v988_v13 = vld [vmem:[%s2722_s6] sm:$0xf] }
 0x1d0   : > { %942 = vmatpush1.bf16.msra.mxu1 %v2128_v14 }
 0x1d1   : > { %v644_v33 = vpop.permute.xlu1 %643  ;;  %943 = vmatprep.subr.bf16.mxu1 %v2127_v24  ;;  %v646_v36 = vpop.permute.xlu0 %645 }
 0x1d2   : > { %v648_v38 = vsel %vm647_vm7, %v644_v33, %v646_v36  ;;  %v649_v39 = vsel %vm647_vm7, %v646_v36, %v644_v33 }
 0x1d3   : > { %v663_v43 = vmul.f32 %v656_v25, %v648_v38  ;;  %v664_v44 = vmul.f32 %v660_v26, %v649_v39  ;;  %v1314_v39 = vld [vmem:[%s2725_s9] sm:$0xff] }
 0x1d4   : > { %944 = vmatpush1.bf16.msra.mxu1 %v2126_v40  ;;  %v1315_v40 = vld [vmem:[%s2725_s9 + $0x8] sm:$0xff] }
 0x1d5   : > { %v590_v45 = vpop.permute.xlu1 %589  ;;  %v592_v46 = vpop.permute.xlu0 %591  ;;  %v2125_v47 = vpack.c.bf16 %v694_v15, %v664_v44  ;;  %v2124_v48 = vpack.c.bf16 %v693_v42, %v663_v43  ;;  %v2044_v42 = vld [vmem:[%s2717_s1 + $0x10] ss:$8 sm:$0x3]  ;;  %v2042_v44 = vld [vmem:[%s2717_s1 + $0x7] ss:$8 sm:$0x3] }
 0x1d6   : > { %v594_v49 = vsel %vm593_vm6, %v590_v45, %v592_v46  ;;  %v595_v50 = vsel %vm593_vm6, %v592_v46, %v590_v45  ;;  %v2038_v45 = vld [vmem:[%s2717_s1 + $0x5] ss:$8 sm:$0x3]  ;;  %v1285_v46 = vrot.slane %v2044_v42, %v2349_v34 }
 0x1d7   : > { %v608_v53 = vmul.f32 %v601_v37, %v595_v50  ;;  %v609_v54 = vmul.f32 %v605_v41, %v594_v49  ;;  %945 = vmatprep.subr.bf16.mxu1 %v2125_v47  ;;  %v1443_v41 = vld [vmem:[%s2727_s11] sm:$0xff]  ;;  %v1289_v47 = vrot.slane %v2044_v42, %v2351_v35  ;;  %v1260_v49 = vrot.slane %v2042_v44, %v2351_v35 }
 0x1d8   : > { %946 = vmatpush1.bf16.msra.mxu1 %v2124_v48  ;;  %v2040_v48 = vld [vmem:[%s2717_s1 + $0x6] ss:$8 sm:$0x3] }
 0x1d9   : > { %v2123_v55 = vpack.c.bf16 %v633_v52, %v609_v54  ;;  %v2122_v56 = vpack.c.bf16 %v632_v51, %v608_v53  ;;  %v1256_v52 = vrot.slane %v2042_v44, %v2349_v34  ;;  %v1202_v53 = vrot.slane %v2038_v45, %v2351_v35 }
 0x1db   : > { %947 = vmatprep.subr.bf16.mxu1 %v2123_v55 }
 0x1dc   : > { %948 = vmatpush1.bf16.msra.mxu1 %v2122_v56  ;;  %v2036_v56 = vld [vmem:[%s2717_s1 + $0x4] ss:$8 sm:$0x3] }
 0x1df   : > { %2027 = vmatmul.mubr.msk.bf16.vlgmr.msra.gmra.mxu1 %vm922_vm9, %v2168_v57 }
 0x1e0   : > { %1868 = vmatprep.mubr.bf16.mxu1 %v2179_v0 }
 0x1e2   : > { %v865_v58 = vpop.permute.xlu1 %864  ;;  %v870_v60 = vpop.permute.xlu0 %869 }
 0x1e6   : > { %v995_v14 = vpop.permute.xlu1 %994 }
 0x29f   : > { %v967_v27 = vpop.f32.mrf.mxu1 }
 0x2a0   : > { %v968_v61 = vadd.f32 %v967_v27, %v865_v58 }
 0x2a1   : > { %v969_v28 = vpop.f32.mrf.mxu1 }
 0x2a2   : > { %v970_v59 = vadd.f32 %v969_v28, %v865_v58  ;;  %v980_v5 = vmul.f32 0.1, %v968_v61  ;;  %vm976_vm12 = vcmp.gt.f32.partialorder %v968_v61, 0.0  ;;  %v1233_v58 = vrot.slane %v2040_v48, %v2349_v34 }
 0x2a3   : > { %v971_v62 = vpop.f32.mrf.mxu1  ;;  %v1237_v28 = vrot.slane %v2040_v48, %v2351_v35 }
 0x2a4   : > { %v972_v63 = vadd.f32 %v971_v62, %v870_v60  ;;  %v981_v2 = vmul.f32 0.1, %v970_v59  ;;  %vm977_vm11 = vcmp.gt.f32.partialorder %v970_v59, 0.0  ;;  %v984_v10 = vsel %vm976_vm12, %v968_v61, %v980_v5 }
 0x2a5   : > { %v973_v1 = vpop.f32.mrf.mxu1  ;;  %v1198_v62 = vrot.slane %v2038_v45, %v2349_v34 }
 0x2a6   : > { %vm978_vm10 = vcmp.gt.f32.partialorder %v972_v63, 0.0  ;;  %v982_v3 = vmul.f32 0.1, %v972_v63  ;;  %v974_v4 = vadd.f32 %v973_v1, %v870_v60  ;;  %v985_v8 = vsel %vm977_vm11, %v970_v59, %v981_v2 }
 0x2a7   : > { %v1173_v60 = vrot.slane %v2036_v56, %v2351_v35 }
 0x2a8   : > { %vm979_vm13 = vcmp.gt.f32.partialorder %v974_v4, 0.0  ;;  %v983_v6 = vmul.f32 0.1, %v974_v4  ;;  %v986_v7 = vsel %vm978_vm10, %v972_v63, %v982_v3 }
 0x2a9   : > { %v989_v12 = vpack.c.bf16 %v986_v7, %v984_v10 }
 0x2aa   : > { %v987_v9 = vsel %vm979_vm13, %v974_v4, %v983_v6 }
 0x2ab   : > { %v990_v11 = vpack.c.bf16 %v987_v9, %v985_v8 }
 0x2ad   : > { %1015 = vmatprep.subr.bf16.mxu0 %v990_v11 }
 0x2ae   : > { %1016 = vmatpush1.bf16.msra.mxu0 %v989_v12  ;;  %v2034_v12 = vld [vmem:[%s2717_s1 + $0x3] ss:$8 sm:$0x3] }
 0x2b1   : > { %2028 = vmatmul.mubr.msk.bf16.vlgmr.msra.gmra.mxu0 %vm997_vm14, %v988_v13  ;;  %v1169_v13 = vrot.slane %v2036_v56, %v2349_v34 }
 0x2b2   : > { %1417 = vmatprep.mubr.bf16.mxu0 %v2179_v0 }
 0x371   : > { %v1035_v16 = vpop.f32.mrf.mxu0 }
 0x372   : > { %v1036_v17 = vadd.f32 %v1035_v16, %v995_v14 }
 0x373   : > { %v1037_v19 = vpop.f32.mrf.mxu0 }
 0x374   : > { %vm1042_vm15 = vcmp.gt.f32.partialorder %v1036_v17, 0.0  ;;  %v1044_v21 = vmul.f32 0.1, %v1036_v17  ;;  %v1038_v22 = vadd.f32 %v1037_v19, %v995_v14  ;;  %v2032_v14 = vld [vmem:[%s2717_s1 + $0x2] ss:$8 sm:$0x3] }
 0x375   : > { %v1039_v23 = vpop.f32.mrf.mxu0 }
 0x376   : > { %v2437_v24 = vsel %vm1042_vm15, %v1036_v17, %v1044_v21  ;;  %vm1043_vm0 = vcmp.gt.f32.partialorder %v1038_v22, 0.0  ;;  %v1045_v25 = vmul.f32 0.1, %v1038_v22 }
 0x377   : > { %v1040_v26 = vpop.f32.mrf.mxu0  ;;  %1216 = vrot.lane.b32.xlu0 %v2437_v24, %s2180_s28 }
 0x378   : > { %v2441_v18 = vsel %vm1043_vm0, %v1038_v22, %v1045_v25  ;;  %v2030_v25 = vld [vmem:[%s2717_s1 + $0x1] ss:$8 sm:$0x3]  ;;  %v1146_v26 = vrot.slane %v2034_v12, %v2349_v34 }
 0x379   : > { %1218 = vrot.lane.b32.xlu1 %v2441_v18, %s2180_s28  ;;  %v1177_v22 = vmul.f32 %v1173_v60, %v2441_v18 }
 0x37b   : > { %1048 = vrot.lane.b32.xlu0 %v2437_v24, %s2181_s29 }
 0x37d   : > { %1050 = vrot.lane.b32.xlu1 %v2441_v18, %s2181_s29 }
 0x37f   : > { %1187 = vrot.lane.b32.xlu0 %v2437_v24, %s2182_s30 }
 0x381   : > { %1189 = vrot.lane.b32.xlu1 %v2441_v18, %s2182_s30 }
 0x3e9   : > { %v1217_v29 = vpop.permute.xlu0 %1216 }
 0x3eb   : > { %v1219_v30 = vpop.permute.xlu1 %1218 }
 0x3ec   : > { %v1221_v31 = vsel %vm762_vm4, %v1219_v30, %v1217_v29  ;;  %v1220_v32 = vsel %vm762_vm4, %v1217_v29, %v1219_v30  ;;  %v1060_v29 = vld [vmem:[%s2717_s1] ss:$8 sm:$0x3]  ;;  %v1150_v30 = vrot.slane %v2034_v12, %v2351_v35 }
 0x3ed   : > { %1276 = vrot.lane.b32.xlu1 %v1221_v31, %s2182_s30  ;;  %1274 = vrot.lane.b32.xlu0 %v1220_v32, %s2182_s30  ;;  %v1049_v36 = vpop.permute.xlu0 %1048  ;;  %v1264_v61 = vmul.f32 %v1260_v49, %v1221_v31  ;;  %v1263_v4 = vmul.f32 %v1256_v52, %v1220_v32 }
 0x3ef   : > { %v1051_v33 = vpop.permute.xlu1 %1050 }
 0x3f0   : > { %v2467_v37 = vsel %vm586_vm5, %v1051_v33, %v1049_v36  ;;  %v2471_v38 = vsel %vm586_vm5, %v1049_v36, %v1051_v33  ;;  %v1121_v33 = vrot.slane %v2032_v14, %v2351_v35 }
 0x3f1   : > { %1224 = vrot.lane.b32.xlu1 %v1221_v31, %s2183_s16  ;;  %1222 = vrot.lane.b32.xlu0 %v1220_v32, %s2183_s16  ;;  %v1188_v15 = vpop.permute.xlu0 %1187  ;;  %v1117_v32 = vrot.slane %v2032_v14, %v2349_v34 }
 0x3f3   : > { %v1190_v43 = vpop.permute.xlu1 %1189 }
 0x3f4   : > { %v1192_v59 = vsel %vm647_vm7, %v1190_v43, %v1188_v15  ;;  %v1191_v5 = vsel %vm647_vm7, %v1188_v15, %v1190_v43  ;;  %v1065_v43 = vrot.slane %v1060_v29, %v2349_v34 }
 0x3f5   : > { %1137 = vrot.lane.b32.xlu1 %v2441_v18, %s2183_s16  ;;  %1135 = vrot.lane.b32.xlu0 %v2437_v24, %s2183_s16  ;;  %v1206_v8 = vmul.f32 %v1202_v53, %v1192_v59  ;;  %v1205_v23 = vmul.f32 %v1198_v62, %v1191_v5  ;;  %v1176_v18 = vmul.f32 %v1169_v13, %v2437_v24 }
 0x3f7   : > { %v2137_v31 = vpack.c.bf16 %v1206_v8, %v1177_v22  ;;  %v2136_v44 = vpack.c.bf16 %v1205_v23, %v1176_v18 }
 0x3f9   : > { %1106 = vrot.lane.b32.xlu0 %v2467_v37, %s2182_s30  ;;  %1108 = vrot.lane.b32.xlu1 %v2471_v38, %s2182_s30 }
 0x3fd   : > { %1054 = vrot.lane.b32.xlu0 %v2467_v37, %s2183_s16  ;;  %1056 = vrot.lane.b32.xlu1 %v2471_v38, %s2183_s16 }
 0x401   : > { %1318 = vperm.xlu0 %2165, %v1314_v39   ;;  %1323 = vperm.xlu1 %2166, %v1315_v40   ;;  %v1088_v40 = vrot.slane %v2030_v25, %v2349_v34 }
 0x405   : > { %1446 = vperm.xlu0 %2165, %v1443_v41   ;;  %v1092_v41 = vrot.slane %v2030_v25, %v2351_v35 }
 0x45f   : > { %v1277_v50 = vpop.permute.xlu1 %1276  ;;  %v1275_v51 = vpop.permute.xlu0 %1274 }
 0x460   : > { %v1278_v54 = vsel %vm647_vm7, %v1275_v51, %v1277_v50  ;;  %v1279_v55 = vsel %vm647_vm7, %v1277_v50, %v1275_v51 }
 0x461   : > { %v1292_v57 = vmul.f32 %v1285_v46, %v1278_v54  ;;  %v1293_v27 = vmul.f32 %v1289_v47, %v1279_v55  ;;  %v1069_v46 = vrot.slane %v1060_v29, %v2351_v35 }
 0x463   : > { %v2140_v63 = vpack.c.bf16 %v1292_v57, %v1292_v57  ;;  %v2141_v1 = vpack.c.bf16 %v1293_v27, %v1293_v27  ;;  %v1225_v2 = vpop.permute.xlu1 %1224  ;;  %v1223_v3 = vpop.permute.xlu0 %1222  ;;  %v1095_v57 = vmul.f32 %v1088_v40, %v2467_v37  ;;  %v1096_v27 = vmul.f32 %v1092_v41, %v2471_v38 }
 0x464   : > { %v1226_v6 = vsel %vm593_vm6, %v1223_v3, %v1225_v2  ;;  %v1227_v7 = vsel %vm593_vm6, %v1225_v2, %v1223_v3 }
 0x465   : > { %v1240_v9 = vmul.f32 %v1233_v58, %v1227_v7  ;;  %v1241_v10 = vmul.f32 %v1237_v28, %v1226_v6  ;;  %2057 = vmatprep.subr.msk.bf16.mxu0 %vm926_vm8, %v2141_v1  ;;  %v1380_v11 = vsel %vm926_vm8, %v2140_v63, 0 }
 0x466   : > { %1392 = vmatpush1.bf16.msra.mxu0 %v1380_v11 }
 0x467   : > { %v2138_v16 = vpack.c.bf16 %v1263_v4, %v1240_v9  ;;  %v1138_v17 = vpop.permute.xlu1 %1137  ;;  %v1136_v19 = vpop.permute.xlu0 %1135  ;;  %v2139_v21 = vpack.c.bf16 %v1264_v61, %v1241_v10  ;;  %v2169_v61 = vld [vmem:[%s2724_s8] sm:$0xff]  }
 0x468   : > { %v1139_v36 = vsel %vm593_vm6, %v1136_v19, %v1138_v17  ;;  %v1140_v39 = vsel %vm593_vm6, %v1138_v17, %v1136_v19  ;;  %v1440_v17 = vld [vmem:[%s2726_s10] sm:$0xf] }
 0x469   : > { %1393 = vmatprep.subr.bf16.mxu0 %v2139_v21  ;;  %v1153_v47 = vmul.f32 %v1146_v26, %v1140_v39  ;;  %v1154_v48 = vmul.f32 %v1150_v30, %v1139_v36 }
 0x46a   : > { %1394 = vmatpush1.bf16.msra.mxu0 %v2138_v16 }
 0x46b   : > { %v1109_v42 = vpop.permute.xlu1 %1108  ;;  %1395 = vmatprep.subr.bf16.mxu0 %v2137_v31  ;;  %v1107_v15 = vpop.permute.xlu0 %1106 }
 0x46c   : > { %v1110_v24 = vsel %vm647_vm7, %v1107_v15, %v1109_v42  ;;  %v1111_v45 = vsel %vm647_vm7, %v1109_v42, %v1107_v15 }
 0x46d   : > { %v1124_v49 = vmul.f32 %v1117_v32, %v1110_v24  ;;  %v1125_v50 = vmul.f32 %v1121_v33, %v1111_v45  ;;  %v1766_v24 = vld [vmem:[%s2729_s13 + $0x8] sm:$0xff]  ;;  %v2075_v45 = vld [vmem:[%s2717_s1 + $0x10] ss:$8 sm:$0x3] }
 0x46e   : > { %1396 = vmatpush1.bf16.msra.mxu0 %v2136_v44  ;;  %v1765_v44 = vld [vmem:[%s2729_s13] sm:$0xff] }
 0x46f   : > { %v2134_v51 = vpack.c.bf16 %v1153_v47, %v1124_v49  ;;  %v1057_v52 = vpop.permute.xlu1 %1056  ;;  %v1055_v53 = vpop.permute.xlu0 %1054  ;;  %v2135_v54 = vpack.c.bf16 %v1154_v48, %v1125_v50  ;;  %v2073_v48 = vld [vmem:[%s2717_s1 + $0x7] ss:$8 sm:$0x3]  ;;  %v2069_v49 = vld [vmem:[%s2717_s1 + $0x5] ss:$8 sm:$0x3]  ;;  %v1736_v50 = vrot.slane %v2075_v45, %v2349_v34 }
 0x470   : > { %v1058_v55 = vsel %vm593_vm6, %v1055_v53, %v1057_v52  ;;  %v1059_v56 = vsel %vm593_vm6, %v1057_v52, %v1055_v53  ;;  %v2071_v52 = vld [vmem:[%s2717_s1 + $0x6] ss:$8 sm:$0x3]  ;;  %v1711_v53 = vrot.slane %v2073_v48, %v2351_v35 }
 0x471   : > { %v1072_v58 = vmul.f32 %v1065_v43, %v1059_v56  ;;  %v1073_v28 = vmul.f32 %v1069_v46, %v1058_v55  ;;  %1397 = vmatprep.subr.bf16.mxu0 %v2135_v54  ;;  %v1707_v56 = vrot.slane %v2073_v48, %v2349_v34 }
 0x472   : > { %1398 = vmatpush1.bf16.msra.mxu0 %v2134_v51  ;;  %v1740_v51 = vrot.slane %v2075_v45, %v2351_v35 }
 0x473   : > { %v2132_v59 = vpack.c.bf16 %v1095_v57, %v1072_v58  ;;  %v2133_v60 = vpack.c.bf16 %v1096_v27, %v1073_v28  ;;  %v1653_v57 = vrot.slane %v2069_v49, %v2351_v35  ;;  %v2067_v28 = vld [vmem:[%s2717_s1 + $0x4] ss:$8 sm:$0x3] }
 0x475   : > { %1399 = vmatprep.subr.bf16.mxu0 %v2133_v60 }
 0x476   : > { %1400 = vmatpush1.bf16.msra.mxu0 %v2132_v59 }
 0x479   : > { %2058 = vmatmul.mubr.msk.bf16.vlgmr.msra.gmra.mxu0 %vm922_vm9, %v2169_v61  ;;  %v1684_v61 = vrot.slane %v2071_v52, %v2349_v34 }
 0x47a   : > { %1484 = vmatprep.mubr.bf16.mxu0 %v2179_v0 }
 0x47c   : > { %v1319_v37 = vpop.permute.xlu0 %1318  ;;  %v1324_v1 = vpop.permute.xlu1 %1323 }
 0x480   : > { %v1447_v19 = vpop.permute.xlu0 %1446 }
 0x539   : > { %v1419_v62 = vpop.f32.mrf.mxu0 }
 0x53a   : > { %v1420_v2 = vadd.f32 %v1419_v62, %v1319_v37  ;;  %v1688_v62 = vrot.slane %v2071_v52, %v2351_v35 }
 0x53b   : > { %v1421_v63 = vpop.f32.mrf.mxu0 }
 0x53c   : > { %v1422_v38 = vadd.f32 %v1421_v63, %v1319_v37  ;;  %v1432_v9 = vmul.f32 0.1, %v1420_v2  ;;  %vm1428_vm3 = vcmp.gt.f32.partialorder %v1420_v2, 0.0  ;;  %v1624_v63 = vrot.slane %v2067_v28, %v2351_v35 }
 0x53d   : > { %v1423_v3 = vpop.f32.mrf.mxu0 }
 0x53e   : > { %v1424_v4 = vadd.f32 %v1423_v3, %v1324_v1  ;;  %v1433_v6 = vmul.f32 0.1, %v1422_v38  ;;  %vm1429_vm2 = vcmp.gt.f32.partialorder %v1422_v38, 0.0  ;;  %v1436_v13 = vsel %vm1428_vm3, %v1420_v2, %v1432_v9 }
 0x53f   : > { %v1425_v5 = vpop.f32.mrf.mxu0 }
 0x540   : > { %vm1430_vm1 = vcmp.gt.f32.partialorder %v1424_v4, 0.0  ;;  %v1434_v7 = vmul.f32 0.1, %v1424_v4  ;;  %v1426_v8 = vadd.f32 %v1425_v5, %v1324_v1  ;;  %v1437_v11 = vsel %vm1429_vm2, %v1422_v38, %v1433_v6 }
 0x541   : > { %v1649_v1 = vrot.slane %v2069_v49, %v2349_v34 }
 0x542   : > { %vm1431_vm10 = vcmp.gt.f32.partialorder %v1426_v8, 0.0  ;;  %v1435_v10 = vmul.f32 0.1, %v1426_v8  ;;  %v1438_v0 = vsel %vm1430_vm1, %v1424_v4, %v1434_v7 }
 0x543   : > { %v1441_v16 = vpack.c.bf16 %v1438_v0, %v1436_v13  ;;  %v2065_v13 = vld [vmem:[%s2717_s1 + $0x3] ss:$8 sm:$0x3] }
 0x544   : > { %v1439_v12 = vsel %vm1431_vm10, %v1426_v8, %v1435_v10 }
 0x545   : > { %v1442_v14 = vpack.c.bf16 %v1439_v12, %v1437_v11 }
 0x547   : > { %1466 = vmatprep.subr.bf16.mxu0 %v1442_v14  ;;  %v1620_v14 = vrot.slane %v2067_v28, %v2349_v34 }
 0x548   : > { %1467 = vmatpush1.bf16.msra.mxu0 %v1441_v16  ;;  %v2063_v16 = vld [vmem:[%s2717_s1 + $0x2] ss:$8 sm:$0x3] }
 0x54b   : > { %2059 = vmatmul.mubr.msk.bf16.vlgmr.msra.gmra.mxu0 %vm997_vm14, %v1440_v17 }
 0x60b   : > { %v1486_v21 = vpop.f32.mrf.mxu0 }
 0x60c   : > { %v1487_v22 = vadd.f32 %v1486_v21, %v1447_v19 }
 0x60d   : > { %v1488_v23 = vpop.f32.mrf.mxu0 }
 0x60e   : > { %vm1493_vm11 = vcmp.gt.f32.partialorder %v1487_v22, 0.0  ;;  %v1495_v25 = vmul.f32 0.1, %v1487_v22  ;;  %v1489_v26 = vadd.f32 %v1488_v23, %v1447_v19 }
 0x60f   : > { %v1490_v29 = vpop.f32.mrf.mxu0 }
 0x610   : > { %v2578_v30 = vsel %vm1493_vm11, %v1487_v22, %v1495_v25  ;;  %vm1494_vm12 = vcmp.gt.f32.partialorder %v1489_v26, 0.0  ;;  %v1496_v31 = vmul.f32 0.1, %v1489_v26  ;;  %v1597_v29 = vrot.slane %v2065_v13, %v2349_v34 }
 0x611   : > { %1891 = vst [vmem:[%s502_s24] sm:$0xff] %v2578_v30  ;;  %v1491_v32 = vpop.f32.mrf.mxu0  ;;  %1667 = vrot.lane.b32.xlu1 %v2578_v30, %s2180_s28 }
 0x612   : > { %v2583_v33 = vsel %vm1494_vm12, %v1489_v26, %v1496_v31  ;;  %v2061_v26 = vld [vmem:[%s2717_s1 + $0x1] ss:$8 sm:$0x3]  ;;  %v1511_v31 = vld [vmem:[%s2717_s1] ss:$8 sm:$0x3]  ;;  %v1601_v32 = vrot.slane %v2065_v13, %v2351_v35 }
 0x613   : > { %1892 = vst [vmem:[%s502_s24 + $0x8] sm:$0xff] %v2583_v33  ;;  %1669 = vrot.lane.b32.xlu0 %v2583_v33, %s2180_s28  ;;  %v1628_v23 = vmul.f32 %v1624_v63, %v2583_v33  ;;  %v1520_v49 = vrot.slane %v1511_v31, %v2351_v35 }
 0x615   : > { %1499 = vrot.lane.b32.xlu1 %v2578_v30, %s2181_s29 }
 0x617   : > { %1501 = vrot.lane.b32.xlu0 %v2583_v33, %s2181_s29  ;;  %s507_s29 = scalar_lea.vmem %s2731_s15, %s2094_s23 }
 0x619   : > { %1638 = vrot.lane.b32.xlu1 %v2578_v30, %s2182_s30 }
 0x61b   : > { %1640 = vrot.lane.b32.xlu0 %v2583_v33, %s2182_s30 }
 0x683   : > { %v1668_v18 = vpop.permute.xlu1 %1667 }
 0x685   : > { %v1670_v36 = vpop.permute.xlu0 %1669 }
 0x686   : > { %v1672_v39 = vsel %vm762_vm4, %v1670_v36, %v1668_v18  ;;  %v1671_v40 = vsel %vm762_vm4, %v1668_v18, %v1670_v36  ;;  %v1568_v36 = vrot.slane %v2063_v16, %v2349_v34 }
 0x687   : > { %1727 = vrot.lane.b32.xlu0 %v1672_v39, %s2182_s30  ;;  %1725 = vrot.lane.b32.xlu1 %v1671_v40, %s2182_s30  ;;  %v1500_v42 = vpop.permute.xlu1 %1499  ;;  %v1715_v38 = vmul.f32 %v1711_v53, %v1672_v39  ;;  %v1714_v6 = vmul.f32 %v1707_v56, %v1671_v40 }
 0x689   : > { %v1502_v41 = vpop.permute.xlu0 %1501 }
 0x68a   : > { %v2610_v15 = vsel %vm586_vm5, %v1502_v41, %v1500_v42  ;;  %v2614_v43 = vsel %vm586_vm5, %v1500_v42, %v1502_v41  ;;  %v1539_v42 = vrot.slane %v2061_v26, %v2349_v34 }
 0x68b   : > { %1675 = vrot.lane.b32.xlu0 %v1672_v39, %s2183_s16  ;;  %1673 = vrot.lane.b32.xlu1 %v1671_v40, %s2183_s16  ;;  %v1639_v46 = vpop.permute.xlu1 %1638  ;;  %v1572_v39 = vrot.slane %v2063_v16, %v2351_v35 }
 0x68d   : > { %v1641_v47 = vpop.permute.xlu0 %1640 }
 0x68e   : > { %v1643_v37 = vsel %vm647_vm7, %v1641_v47, %v1639_v46  ;;  %v1642_v7 = vsel %vm647_vm7, %v1639_v46, %v1641_v47  ;;  %v1516_v46 = vrot.slane %v1511_v31, %v2349_v34 }
 0x68f   : > { %1588 = vrot.lane.b32.xlu0 %v2583_v33, %s2183_s16  ;;  %1586 = vrot.lane.b32.xlu1 %v2578_v30, %s2183_s16  ;;  %v1657_v10 = vmul.f32 %v1653_v57, %v1643_v37  ;;  %v1656_v25 = vmul.f32 %v1649_v1, %v1642_v7  ;;  %v1627_v33 = vmul.f32 %v1620_v14, %v2578_v30 }
 0x691   : > { %v2147_v18 = vpack.c.bf16 %v1657_v10, %v1628_v23  ;;  %v2146_v47 = vpack.c.bf16 %v1656_v25, %v1627_v33 }
 0x693   : > { %1557 = vrot.lane.b32.xlu1 %v2610_v15, %s2182_s30  ;;  %1559 = vrot.lane.b32.xlu0 %v2614_v43, %s2182_s30 }
 0x697   : > { %1505 = vrot.lane.b32.xlu1 %v2610_v15, %s2183_s16  ;;  %1507 = vrot.lane.b32.xlu0 %v2614_v43, %s2183_s16 }
 0x69b   : > { %1769 = vperm.xlu1 %2166, %v1765_v44   ;;  %1774 = vperm.xlu0 %2165, %v1766_v24   ;;  %v1543_v44 = vrot.slane %v2061_v26, %v2351_v35 }
 0x69d   : > { %v1547_v35 = vmul.f32 %v1543_v44, %v2614_v43 }
 0x6f9   : > { %v1728_v54 = vpop.permute.xlu0 %1727  ;;  %v1726_v55 = vpop.permute.xlu1 %1725 }
 0x6fa   : > { %v1729_v27 = vsel %vm647_vm7, %v1726_v55, %v1728_v54  ;;  %v1730_v58 = vsel %vm647_vm7, %v1728_v54, %v1726_v55 }
 0x6fb   : > { %v1743_v59 = vmul.f32 %v1736_v50, %v1729_v27  ;;  %v1744_v60 = vmul.f32 %v1740_v51, %v1730_v58  ;;  %v1546_v58 = vmul.f32 %v1539_v42, %v2610_v15 }
 0x6fd   : > { %v2150_v2 = vpack.c.bf16 %v1743_v59, %v1743_v59  ;;  %v2151_v3 = vpack.c.bf16 %v1744_v60, %v1744_v60  ;;  %v1676_v4 = vpop.permute.xlu0 %1675  ;;  %v1674_v5 = vpop.permute.xlu1 %1673 }
 0x6fe   : > { %v1677_v8 = vsel %vm593_vm6, %v1674_v5, %v1676_v4  ;;  %v1678_v9 = vsel %vm593_vm6, %v1676_v4, %v1674_v5 }
 0x6ff   : > { %v1691_v0 = vmul.f32 %v1684_v61, %v1678_v9  ;;  %v1692_v11 = vmul.f32 %v1688_v62, %v1677_v8  ;;  %2088 = vmatprep.subr.msk.bf16.mxu1 %vm926_vm8, %v2151_v3  ;;  %v1831_v12 = vsel %vm926_vm8, %v2150_v2, 0  ;;  %v2170_v62 = vld [vmem:[%s2728_s12] sm:$0xff]  }
 0x700   : > { %1843 = vmatpush1.bf16.msra.mxu1 %v1831_v12 }
 0x701   : > { %v2148_v17 = vpack.c.bf16 %v1714_v6, %v1691_v0  ;;  %v1589_v19 = vpop.permute.xlu0 %1588  ;;  %v1587_v21 = vpop.permute.xlu1 %1586  ;;  %v2149_v22 = vpack.c.bf16 %v1715_v38, %v1692_v11 }
 0x702   : > { %v1590_v40 = vsel %vm593_vm6, %v1587_v21, %v1589_v19  ;;  %v1591_v41 = vsel %vm593_vm6, %v1589_v19, %v1587_v21 }
 0x703   : > { %1844 = vmatprep.subr.bf16.mxu1 %v2149_v22  ;;  %v1604_v50 = vmul.f32 %v1597_v29, %v1591_v41  ;;  %v1605_v51 = vmul.f32 %v1601_v32, %v1590_v40 }
 0x704   : > { %1845 = vmatpush1.bf16.msra.mxu1 %v2148_v17 }
 0x705   : > { %v1560_v24 = vpop.permute.xlu0 %1559  ;;  %1846 = vmatprep.subr.bf16.mxu1 %v2147_v18  ;;  %v1558_v45 = vpop.permute.xlu1 %1557 }
 0x706   : > { %v1561_v30 = vsel %vm647_vm7, %v1558_v45, %v1560_v24  ;;  %v1562_v48 = vsel %vm647_vm7, %v1560_v24, %v1558_v45 }
 0x707   : > { %v1575_v52 = vmul.f32 %v1568_v36, %v1561_v30  ;;  %v1576_v53 = vmul.f32 %v1572_v39, %v1562_v48 }
 0x708   : > { %1847 = vmatpush1.bf16.msra.mxu1 %v2146_v47 }
 0x709   : > { %v2144_v54 = vpack.c.bf16 %v1604_v50, %v1575_v52  ;;  %v1508_v55 = vpop.permute.xlu0 %1507  ;;  %v1506_v56 = vpop.permute.xlu1 %1505  ;;  %v2145_v57 = vpack.c.bf16 %v1605_v51, %v1576_v53 }
 0x70a   : > { %v1509_v34 = vsel %vm593_vm6, %v1506_v56, %v1508_v55  ;;  %v1510_v27 = vsel %vm593_vm6, %v1508_v55, %v1506_v56 }
 0x70b   : > { %v1523_v28 = vmul.f32 %v1516_v46, %v1510_v27  ;;  %v1524_v59 = vmul.f32 %v1520_v49, %v1509_v34  ;;  %1848 = vmatprep.subr.bf16.mxu1 %v2145_v57 }
 0x70c   : > { %1849 = vmatpush1.bf16.msra.mxu1 %v2144_v54 }
 0x70d   : > { %v2142_v60 = vpack.c.bf16 %v1546_v58, %v1523_v28  ;;  %v2143_v61 = vpack.c.bf16 %v1547_v35, %v1524_v59 }
 0x70f   : > { %1850 = vmatprep.subr.bf16.mxu1 %v2143_v61 }
 0x710   : > { %1851 = vmatpush1.bf16.msra.mxu1 %v2142_v60 }
 0x713   : > { %2089 = vmatmul.mubr.msk.bf16.vlgmr.msra.gmra.mxu1 %vm922_vm9, %v2170_v62 }
 0x716   : > { %v1770_v20 = vpop.permute.xlu1 %1769  ;;  %v1775_v1 = vpop.permute.xlu0 %1774 }
 0x7d3   : > { %v1870_v37 = vpop.f32.mrf.mxu1 }
 0x7d4   : > { %v1871_v15 = vadd.f32 %v1870_v37, %v1770_v20 }
 0x7d5   : > { %v1872_v63 = vpop.f32.mrf.mxu1 }
 0x7d6   : > { %vm1879_vm4 = vcmp.gt.f32.partialorder %v1871_v15, 0.0  ;;  %v1883_v43 = vmul.f32 0.1, %v1871_v15  ;;  %v1873_v38 = vadd.f32 %v1872_v63, %v1770_v20 }
 0x7d7   : > { %v1874_v2 = vpop.f32.mrf.mxu1 }
 0x7d8   : > { %v1887_v3 = vsel %vm1879_vm4, %v1871_v15, %v1883_v43  ;;  %vm1880_vm5 = vcmp.gt.f32.partialorder %v1873_v38, 0.0  ;;  %v1884_v4 = vmul.f32 0.1, %v1873_v38  ;;  %v1875_v5 = vadd.f32 %v1874_v2, %v1775_v1 }
 0x7d9   : > { %1893 = vst [vmem:[%s507_s29] sm:$0xff] %v1887_v3  ;;  %v1876_v6 = vpop.f32.mrf.mxu1 }
 0x7da   : > { %v1888_v7 = vsel %vm1880_vm5, %v1873_v38, %v1884_v4  ;;  %vm1881_vm6 = vcmp.gt.f32.partialorder %v1875_v5, 0.0  ;;  %v1885_v8 = vmul.f32 0.1, %v1875_v5  ;;  %v1877_v9 = vadd.f32 %v1876_v6, %v1775_v1 }
 0x7db   : > { %1894 = vst [vmem:[%s507_s29 + $0x8] sm:$0xff] %v1888_v7 }
 0x7dc   : > { %v1889_v10 = vsel %vm1881_vm6, %v1875_v5, %v1885_v8  ;;  %vm1882_vm7 = vcmp.gt.f32.partialorder %v1877_v9, 0.0  ;;  %v1886_v0 = vmul.f32 0.1, %v1877_v9 }
 0x7dd   : > { %1895 = vst [vmem:[%s507_s29 + $0x10] sm:$0xff] %v1889_v10 }
 0x7de   : > { %v1890_v11 = vsel %vm1882_vm7, %v1877_v9, %v1886_v0 }
 0x7df   : > { %1896 = vst [vmem:[%s507_s29 + $0x18] sm:$0xff] %v1890_v11 }
 0x7e0 PF: > { %s26_s18 = sadd.s32 1, %s2177_s18  }
 0x7e1   : > { %p23_p4 = scmp.ge.s32.totalorder %s26_s18, 4  }
 0x7e3   :  { %25 = sbr.rel (!%p23_p4) target bundleno = 1 (0x1), region = 126 }

</bundles_post_ra>
